<compile_context>
chip_gen: v6e
topology: v6e:2x2x1
jax: 0.10.0
libtpu: 0.0.40
codegen_flags: <defaults>
</compile_context>

<pallas_src>
import functools

import jax
import jax.numpy as jnp
from jax.experimental import pallas as pl
from jax.experimental.pallas import tpu as pltpu

# ---- config (stand-in for SDFFieldConfig defaults, kept small) ----
NUM_FREQ = 6                      # NeRF encoding frequencies 2^0 .. 2^(F-1)
IN_DIM = 3
SC_DIM = 2 * NUM_FREQ * IN_DIM    # 36 sin/cos columns
PRE_DIM = IN_DIM + NUM_FREQ * IN_DIM   # 21 = [x | prescaled frequencies]
HIDDEN = 64
GEO_FEATURE_DIM = 128             # lane-dense stand-in for the default 256
OUT_DIM = 1 + GEO_FEATURE_DIM     # sdf + geo feature (module layout)
N_POINTS = 256
TILE_M = 128                      # raise to 512-2048 for real workloads


def _sdf_field_kernel(xf_ref, w0x_ref, w0sc_ref, b0_ref, w1_ref, b1_ref,
                      w2g_ref, b2g_ref, w2s_ref, b2s_ref, sdf_ref, geo_ref):
    """One row-tile of points through PE + 3-layer MLP.

    xf_ref : [TILE_M, 21]  f32   [x(3) | x*2^0(3) | ... | x*2^5(3)]
    w0x_ref: [3, HIDDEN]   f32   layer-0 weights for the raw-position columns
    w0sc_ref:[36, HIDDEN]  bf16  layer-0 weights, rows ordered [sins | coss]
    b0_ref : [1, HIDDEN]   f32
    w1_ref : [HIDDEN, HIDDEN] bf16 ; b1_ref: [1, HIDDEN] f32
    w2g_ref: [HIDDEN, GEO] bf16  (geo columns only) ; b2g_ref: [1, GEO] f32
    w2s_ref: [1, HIDDEN]   f32   (sdf weight row) ; b2s_ref: [1, 1] f32
    sdf_ref: [TILE_M, 1]   f32
    geo_ref: [TILE_M, GEO] bf16
    """
    xf = xf_ref[...]                                   # [T, 21] f32
    x = xf[:, :IN_DIM]                                 # [T, 3]
    xs = xf[:, IN_DIM:]                                # [T, 18] prescaled

    # Positional encoding: exactly one sin, one cos, one 2-piece lane concat.
    s = jnp.sin(xs)
    c = jnp.cos(xs)
    enc_sc = jnp.concatenate([s, c], axis=-1)          # [T, 36]

    # Layer 0: single MXU contraction over the sin/cos block (bf16 operands,
    # f32 accumulation) + f32 VPU contribution of the 3 raw-position columns
    # (keeps positions at full precision, no extra MXU pass).
    h = jnp.dot(enc_sc.astype(jnp.bfloat16), w0sc_ref[...],
                preferred_element_type=jnp.float32) + b0_ref[...]
    w0x = w0x_ref[...]                                 # [3, H] f32
    h = (h
         + x[:, 0:1] * w0x[0:1, :]
         + x[:, 1:2] * w0x[1:2, :]
         + x[:, 2:3] * w0x[2:3, :])
    h = jnp.maximum(h, 0.0)

    # Layer 1.
    h = jnp.dot(h.astype(jnp.bfloat16), w1_ref[...],
                preferred_element_type=jnp.float32) + b1_ref[...]
    h = jnp.maximum(h, 0.0)

    # Layer 2a: geo feature — exactly 128 MXU columns, stored as bf16.
    geo = jnp.dot(h.astype(jnp.bfloat16), w2g_ref[...],
                  preferred_element_type=jnp.float32) + b2g_ref[...]
    geo_ref[...] = geo.astype(geo_ref.dtype)

    # Layer 2b: sdf scalar — f32 VPU mul + lane reduce (avoids a nearly empty
    # second MXU N-pass on v5e's 128-wide MXU).
    sdf = jnp.sum(h * w2s_ref[...], axis=-1, keepdims=True) + b2s_ref[...]
    sdf_ref[...] = sdf.astype(sdf_ref.dtype)


def prepare_params(w0, b0, w1, b1, w2, b2):
    """One-time (per weight update) prep — NOT in the per-call hot path.

    Module layout in:
      w0: [39, H], encoding row order [x, sin0, cos0, sin1, cos1, ..., sin5, cos5]
      w2: [H, 1 + GEO] with the sdf column FIRST (torch.split order).
    Kernel layout out: identity rows kept f32, sin/cos rows regrouped as
    [sin0..sin5 | cos0..cos5] and cast bf16, sdf column split out as a f32 row.
    """
    w0 = jnp.asarray(w0, jnp.float32)
    w0x = w0[:IN_DIM]                                             # [3, H] f32
    freq_rows = w0[IN_DIM:].reshape(NUM_FREQ, 2, IN_DIM, HIDDEN)  # [F, sin/cos, 3, H]
    w0sin = freq_rows[:, 0].reshape(NUM_FREQ * IN_DIM, HIDDEN)
    w0cos = freq_rows[:, 1].reshape(NUM_FREQ * IN_DIM, HIDDEN)
    w0sc = jnp.concatenate([w0sin, w0cos], axis=0).astype(jnp.bfloat16)  # [36, H]

    w1b = jnp.asarray(w1, jnp.bfloat16)
    w2 = jnp.asarray(w2, jnp.float32)
    b2 = jnp.asarray(b2, jnp.float32)
    w2g = w2[:, 1:].astype(jnp.bfloat16)                          # [H, GEO] bf16
    b2g = b2[:, 1:]                                               # [1, GEO] f32
    w2s = w2[:, :1].T                                             # [1, H]  f32
    b2s = b2[:, :1]                                               # [1, 1]  f32
    return (w0x, w0sc, jnp.asarray(b0, jnp.float32),
            w1b, jnp.asarray(b1, jnp.float32),
            w2g, b2g, w2s, b2s)


@functools.partial(jax.jit, static_argnames=("tile_m",))
def sdf_field_forward(x, params, *, tile_m=TILE_M):
    """Returns (sdf [N,1] f32, geo_feature [N, GEO_FEATURE_DIM] bf16).

    `params` is the tuple produced by `prepare_params` (prep hoisted out of
    the hot path). The only per-call XLA work is the frequency prescale of x.
    """
    w0x, w0sc, b0, w1b, b1, w2g, b2g, w2s, b2s = params
    n = x.shape[0]
    x = x.astype(jnp.float32)

    # One broadcast-mul + one concat: xf = [x | 2^0 x | ... | 2^(F-1) x].
    freqs = 2.0 ** jnp.arange(NUM_FREQ, dtype=jnp.float32)
    xs = (x[:, None, :] * freqs[None, :, None]).reshape(n, NUM_FREQ * IN_DIM)
    xf = jnp.concatenate([x, xs], axis=-1)                        # [N, 21]

    # Pad the point batch to a multiple of tile_m (tail rows discarded below).
    n_pad = (-n) % tile_m
    if n_pad:
        xf = jnp.pad(xf, ((0, n_pad), (0, 0)))
    n_full = n + n_pad
    grid = (n_full // tile_m,)

    flops = 2 * n_full * (SC_DIM * HIDDEN + IN_DIM * HIDDEN
                          + HIDDEN * HIDDEN + HIDDEN * GEO_FEATURE_DIM + HIDDEN)
    bytes_accessed = int(
        xf.size * 4
        + (w0sc.size + w1b.size + w2g.size) * 2
        + (w0x.size + b0.size + b1.size + b2g.size + w2s.size + b2s.size) * 4
        + n_full * (4 + GEO_FEATURE_DIM * 2))

    sdf, geo = pl.pallas_call(
        _sdf_field_kernel,
        out_shape=(
            jax.ShapeDtypeStruct((n_full, 1), jnp.float32),
            jax.ShapeDtypeStruct((n_full, GEO_FEATURE_DIM), jnp.bfloat16),
        ),
        grid_spec=pltpu.PrefetchScalarGridSpec(
            num_scalar_prefetch=0,
            grid=grid,
            in_specs=[
                pl.BlockSpec((tile_m, PRE_DIM), lambda i: (i, 0)),
                pl.BlockSpec((IN_DIM, HIDDEN), lambda i: (0, 0)),
                pl.BlockSpec((SC_DIM, HIDDEN), lambda i: (0, 0)),
                pl.BlockSpec((1, HIDDEN), lambda i: (0, 0)),
                pl.BlockSpec((HIDDEN, HIDDEN), lambda i: (0, 0)),
                pl.BlockSpec((1, HIDDEN), lambda i: (0, 0)),
                pl.BlockSpec((HIDDEN, GEO_FEATURE_DIM), lambda i: (0, 0)),
                pl.BlockSpec((1, GEO_FEATURE_DIM), lambda i: (0, 0)),
                pl.BlockSpec((1, HIDDEN), lambda i: (0, 0)),
                pl.BlockSpec((1, 1), lambda i: (0, 0)),
            ],
            out_specs=[
                pl.BlockSpec((tile_m, 1), lambda i: (i, 0)),
                pl.BlockSpec((tile_m, GEO_FEATURE_DIM), lambda i: (i, 0)),
            ],
        ),
        compiler_params=pltpu.CompilerParams(
            dimension_semantics=("parallel",),
            vmem_limit_bytes=32 * 1024 * 1024),
        cost_estimate=pl.CostEstimate(
            flops=int(flops),
            transcendentals=int(2 * n_full * NUM_FREQ * IN_DIM),
            bytes_accessed=bytes_accessed),
    )(xf, w0x, w0sc, b0, w1b, b1, w2g, b2g, w2s, b2s)

    if n_pad:
        sdf = sdf[:n]
        geo = geo[:n]
    return sdf, geo


# ----------------------------- references ------------------------------------
def _reference_forward_f32(x, w0, b0, w1, b1, w2, b2):
    """Exact module math: direct sin/cos, f32 matmuls, PyTorch split order."""
    pieces = [x]
    for k in range(NUM_FREQ):
        pieces.append(jnp.sin(x * (2.0 ** k)))
        pieces.append(jnp.cos(x * (2.0 ** k)))
    enc = jnp.concatenate(pieces, axis=-1)
    h = jax.nn.relu(enc @ w0 + b0)
    h = jax.nn.relu(h @ w1 + b1)
    out = h @ w2 + b2
    return out[:, :1], out[:, 1:]


def _reference_forward_mirror(x, params):
    """Mirrors the kernel numerics (bf16 dot operands, f32 identity path,
    f32 sdf reduce, bf16 geo store) for a tight-tolerance check."""
    w0x, w0sc, b0, w1b, b1, w2g, b2g, w2s, b2s = params
    n = x.shape[0]
    freqs = 2.0 ** jnp.arange(NUM_FREQ, dtype=jnp.float32)
    xs = (x[:, None, :] * freqs[None, :, None]).reshape(n, NUM_FREQ * IN_DIM)
    enc_sc = jnp.concatenate([jnp.sin(xs), jnp.cos(xs)], axis=-1)

    def mm(a, w):
        return jnp.dot(a.astype(jnp.bfloat16), w, preferred_element_type=jnp.float32)

    h = mm(enc_sc, w0sc) + b0
    h = h + x[:, 0:1] * w0x[0:1, :] + x[:, 1:2] * w0x[1:2, :] + x[:, 2:3] * w0x[2:3, :]
    h = jax.nn.relu(h)
    h = jax.nn.relu(mm(h, w1b) + b1)
    geo = (mm(h, w2g) + b2g).astype(jnp.bfloat16)
    sdf = jnp.sum(h * w2s, axis=-1, keepdims=True) + b2s
    return sdf, geo


def _init_params(key):
    """Deterministic synthetic parameter init (fan-in scaled normals),
    in the module's native layout (encoding order, sdf column first)."""
    enc_dim = IN_DIM * (1 + 2 * NUM_FREQ)
    k0, k1, k2, kb = jax.random.split(key, 4)
    w0 = jax.random.normal(k0, (enc_dim, HIDDEN), jnp.float32) / jnp.sqrt(enc_dim)
    w1 = jax.random.normal(k1, (HIDDEN, HIDDEN), jnp.float32) / jnp.sqrt(HIDDEN)
    w2 = jax.random.normal(k2, (HIDDEN, OUT_DIM), jnp.float32) / jnp.sqrt(HIDDEN)
    b0 = 0.01 * jax.random.normal(kb, (1, HIDDEN), jnp.float32)
    b1 = jnp.zeros((1, HIDDEN), jnp.float32)
    b2 = jnp.zeros((1, OUT_DIM), jnp.float32)
    return w0, b0, w1, b1, w2, b2


if __name__ == "__main__":
    key = jax.random.PRNGKey(0)
    kx, kp = jax.random.split(key)
    x = jax.random.uniform(kx, (N_POINTS, IN_DIM), jnp.float32,
                           minval=-1.0, maxval=1.0)
    raw_params = _init_params(kp)

    # Weight prep happens ONCE, outside the per-call hot path.
    params = prepare_params(*raw_params)
    params = jax.block_until_ready(params)

    sdf, geo = sdf_field_forward(x, params)
    jax.block_until_ready((sdf, geo))
    assert sdf.shape == (N_POINTS, 1) and sdf.dtype == jnp.float32
    assert geo.shape == (N_POINTS, GEO_FEATURE_DIM) and geo.dtype == jnp.bfloat16

    # Tight check vs. a reference that mirrors the kernel's numerics.
    sdf_m, geo_m = _reference_forward_mirror(x, params)
    assert jnp.allclose(sdf, sdf_m, atol=5e-3, rtol=5e-3)
    assert jnp.allclose(geo.astype(jnp.float32), geo_m.astype(jnp.float32),
                        atol=2e-2, rtol=2e-2)

    # Looser check vs. the true f32 module math (bf16 dot inputs + bf16 geo).
    sdf_r, geo_r = _reference_forward_f32(x, *raw_params)
    assert jnp.allclose(sdf, sdf_r, atol=3e-2, rtol=3e-2)
    assert jnp.allclose(geo.astype(jnp.float32), geo_r, atol=4e-2, rtol=4e-2)

    print("KERNEL_OK")
</pallas_src>

<mosaic_0001>
module attributes {stable_mosaic.version = 11 : i64} {
  func.func @_sdf_field_kernel(%arg0: i32, %arg1: memref<128x21xf32, #tpu.memory_space<vmem>>, %arg2: memref<3x64xf32, #tpu.memory_space<vmem>>, %arg3: memref<36x64xbf16, #tpu.memory_space<vmem>>, %arg4: memref<1x64xf32, #tpu.memory_space<vmem>>, %arg5: memref<64x64xbf16, #tpu.memory_space<vmem>>, %arg6: memref<1x64xf32, #tpu.memory_space<vmem>>, %arg7: memref<64x128xbf16, #tpu.memory_space<vmem>>, %arg8: memref<1x128xf32, #tpu.memory_space<vmem>>, %arg9: memref<1x64xf32, #tpu.memory_space<vmem>>, %arg10: memref<1x1xf32, #tpu.memory_space<vmem>>, %arg11: memref<128x1xf32, #tpu.memory_space<vmem>>, %arg12: memref<128x128xbf16, #tpu.memory_space<vmem>>) attributes {dimension_semantics = [#tpu.dimension_semantics<parallel>], iteration_bounds = array<i64: 2>, scalar_prefetch = 0 : i64, scratch_operands = 0 : i64, tpu.core_type = #tpu.core_type<tc>, window_params = [{transform_indices = @transform_0, window_bounds = array<i64: 128, 21>}, {pipeline_mode = #tpu.pipeline_mode<synchronous>, transform_indices = @transform_1, window_bounds = array<i64: 3, 64>}, {pipeline_mode = #tpu.pipeline_mode<synchronous>, transform_indices = @transform_2, window_bounds = array<i64: 36, 64>}, {pipeline_mode = #tpu.pipeline_mode<synchronous>, transform_indices = @transform_3, window_bounds = array<i64: 1, 64>}, {pipeline_mode = #tpu.pipeline_mode<synchronous>, transform_indices = @transform_4, window_bounds = array<i64: 64, 64>}, {pipeline_mode = #tpu.pipeline_mode<synchronous>, transform_indices = @transform_5, window_bounds = array<i64: 1, 64>}, {pipeline_mode = #tpu.pipeline_mode<synchronous>, transform_indices = @transform_6, window_bounds = array<i64: 64, 128>}, {pipeline_mode = #tpu.pipeline_mode<synchronous>, transform_indices = @transform_7, window_bounds = array<i64: 1, 128>}, {pipeline_mode = #tpu.pipeline_mode<synchronous>, transform_indices = @transform_8, window_bounds = array<i64: 1, 64>}, {pipeline_mode = #tpu.pipeline_mode<synchronous>, transform_indices = @transform_9, window_bounds = array<i64: 1, 1>}, {transform_indices = @transform_10, window_bounds = array<i64: 128, 1>}, {transform_indices = @transform_11, window_bounds = array<i64: 128, 128>}]} {
    %c0 = arith.constant 0 : index
    %c0_0 = arith.constant 0 : index
    %0 = vector.load %arg1[%c0, %c0_0] : memref<128x21xf32, #tpu.memory_space<vmem>>, vector<128x21xf32>
    %1 = vector.extract_strided_slice %0 {offsets = [0, 0], sizes = [128, 3], strides = [1, 1]} : vector<128x21xf32> to vector<128x3xf32>
    %2 = vector.extract_strided_slice %0 {offsets = [0, 3], sizes = [128, 18], strides = [1, 1]} : vector<128x21xf32> to vector<128x18xf32>
    %3 = math.sin %2 : vector<128x18xf32>
    %4 = math.cos %2 : vector<128x18xf32>
    %5 = tpu.concatenate %3, %4 in 1 : vector<128x18xf32>, vector<128x18xf32> -> vector<128x36xf32>
    %6 = arith.truncf %5 : vector<128x36xf32> to vector<128x36xbf16>
    %c0_1 = arith.constant 0 : index
    %c0_2 = arith.constant 0 : index
    %7 = vector.load %arg3[%c0_1, %c0_2] : memref<36x64xbf16, #tpu.memory_space<vmem>>, vector<36x64xbf16>
    %cst = arith.constant dense<0.000000e+00> : vector<128x64xf32>
    %8 = tpu.matmul %6, %7, %cst {dimension_numbers = #tpu.dot_dimension_numbers<[1], [0], [0], [1], [0, 0, 1, 1], [], []>} : vector<128x36xbf16>, vector<36x64xbf16>, vector<128x64xf32> -> vector<128x64xf32>
    %c0_3 = arith.constant 0 : index
    %c0_4 = arith.constant 0 : index
    %9 = vector.load %arg4[%c0_3, %c0_4] : memref<1x64xf32, #tpu.memory_space<vmem>>, vector<1x64xf32>
    %10 = vector.broadcast %9 : vector<1x64xf32> to vector<128x64xf32>
    %11 = arith.addf %8, %10 : vector<128x64xf32>
    %c0_5 = arith.constant 0 : index
    %c0_6 = arith.constant 0 : index
    %12 = vector.load %arg2[%c0_5, %c0_6] : memref<3x64xf32, #tpu.memory_space<vmem>>, vector<3x64xf32>
    %13 = vector.extract_strided_slice %1 {offsets = [0, 0], sizes = [128, 1], strides = [1, 1]} : vector<128x3xf32> to vector<128x1xf32>
    %14 = vector.extract_strided_slice %12 {offsets = [0, 0], sizes = [1, 64], strides = [1, 1]} : vector<3x64xf32> to vector<1x64xf32>
    %15 = vector.broadcast %13 : vector<128x1xf32> to vector<128x64xf32>
    %16 = vector.broadcast %14 : vector<1x64xf32> to vector<128x64xf32>
    %17 = arith.mulf %15, %16 : vector<128x64xf32>
    %18 = arith.addf %11, %17 : vector<128x64xf32>
    %19 = vector.extract_strided_slice %1 {offsets = [0, 1], sizes = [128, 1], strides = [1, 1]} : vector<128x3xf32> to vector<128x1xf32>
    %20 = vector.extract_strided_slice %12 {offsets = [1, 0], sizes = [1, 64], strides = [1, 1]} : vector<3x64xf32> to vector<1x64xf32>
    %21 = vector.broadcast %19 : vector<128x1xf32> to vector<128x64xf32>
    %22 = vector.broadcast %20 : vector<1x64xf32> to vector<128x64xf32>
    %23 = arith.mulf %21, %22 : vector<128x64xf32>
    %24 = arith.addf %18, %23 : vector<128x64xf32>
    %25 = vector.extract_strided_slice %1 {offsets = [0, 2], sizes = [128, 1], strides = [1, 1]} : vector<128x3xf32> to vector<128x1xf32>
    %26 = vector.extract_strided_slice %12 {offsets = [2, 0], sizes = [1, 64], strides = [1, 1]} : vector<3x64xf32> to vector<1x64xf32>
    %27 = vector.broadcast %25 : vector<128x1xf32> to vector<128x64xf32>
    %28 = vector.broadcast %26 : vector<1x64xf32> to vector<128x64xf32>
    %29 = arith.mulf %27, %28 : vector<128x64xf32>
    %30 = arith.addf %24, %29 : vector<128x64xf32>
    %cst_7 = arith.constant 0.000000e+00 : f32
    %31 = vector.broadcast %cst_7 : f32 to vector<128x64xf32>
    %32 = arith.maximumf %30, %31 : vector<128x64xf32>
    %33 = arith.truncf %32 : vector<128x64xf32> to vector<128x64xbf16>
    %c0_8 = arith.constant 0 : index
    %c0_9 = arith.constant 0 : index
    %34 = vector.load %arg5[%c0_8, %c0_9] : memref<64x64xbf16, #tpu.memory_space<vmem>>, vector<64x64xbf16>
    %cst_10 = arith.constant dense<0.000000e+00> : vector<128x64xf32>
    %35 = tpu.matmul %33, %34, %cst_10 {dimension_numbers = #tpu.dot_dimension_numbers<[1], [0], [0], [1], [0, 0, 1, 1], [], []>} : vector<128x64xbf16>, vector<64x64xbf16>, vector<128x64xf32> -> vector<128x64xf32>
    %c0_11 = arith.constant 0 : index
    %c0_12 = arith.constant 0 : index
    %36 = vector.load %arg6[%c0_11, %c0_12] : memref<1x64xf32, #tpu.memory_space<vmem>>, vector<1x64xf32>
    %37 = vector.broadcast %36 : vector<1x64xf32> to vector<128x64xf32>
    %38 = arith.addf %35, %37 : vector<128x64xf32>
    %cst_13 = arith.constant 0.000000e+00 : f32
    %39 = vector.broadcast %cst_13 : f32 to vector<128x64xf32>
    %40 = arith.maximumf %38, %39 : vector<128x64xf32>
    %41 = arith.truncf %40 : vector<128x64xf32> to vector<128x64xbf16>
    %c0_14 = arith.constant 0 : index
    %c0_15 = arith.constant 0 : index
    %42 = vector.load %arg7[%c0_14, %c0_15] : memref<64x128xbf16, #tpu.memory_space<vmem>>, vector<64x128xbf16>
    %cst_16 = arith.constant dense<0.000000e+00> : vector<128x128xf32>
    %43 = tpu.matmul %41, %42, %cst_16 {dimension_numbers = #tpu.dot_dimension_numbers<[1], [0], [0], [1], [0, 0, 1, 1], [], []>} : vector<128x64xbf16>, vector<64x128xbf16>, vector<128x128xf32> -> vector<128x128xf32>
    %c0_17 = arith.constant 0 : index
    %c0_18 = arith.constant 0 : index
    %44 = vector.load %arg8[%c0_17, %c0_18] : memref<1x128xf32, #tpu.memory_space<vmem>>, vector<1x128xf32>
    %45 = vector.broadcast %44 : vector<1x128xf32> to vector<128x128xf32>
    %46 = arith.addf %43, %45 : vector<128x128xf32>
    %47 = arith.truncf %46 : vector<128x128xf32> to vector<128x128xbf16>
    %c0_19 = arith.constant 0 : index
    %c0_20 = arith.constant 0 : index
    %48 = vector.load %arg12[%c0_19, %c0_20] : memref<128x128xbf16, #tpu.memory_space<vmem>>, vector<128x128xbf16>
    tpu.vector_store %arg12[%c0_19, %c0_20], %47 {strides = array<i32>} : memref<128x128xbf16, #tpu.memory_space<vmem>>, vector<128x128xbf16>,
    %c0_21 = arith.constant 0 : index
    %c0_22 = arith.constant 0 : index
    %49 = vector.load %arg9[%c0_21, %c0_22] : memref<1x64xf32, #tpu.memory_space<vmem>>, vector<1x64xf32>
    %50 = vector.broadcast %49 : vector<1x64xf32> to vector<128x64xf32>
    %51 = arith.mulf %40, %50 : vector<128x64xf32>
    %cst_23 = arith.constant dense<0.000000e+00> : vector<128xf32>
    %52 = vector.multi_reduction <add>, %51, %cst_23 [1] : vector<128x64xf32> to vector<128xf32>
    %53 = vector.shape_cast %52 : vector<128xf32> to vector<128x1xf32>
    %c0_24 = arith.constant 0 : index
    %c0_25 = arith.constant 0 : index
    %54 = vector.load %arg10[%c0_24, %c0_25] : memref<1x1xf32, #tpu.memory_space<vmem>>, vector<1x1xf32>
    %55 = vector.broadcast %54 : vector<1x1xf32> to vector<128x1xf32>
    %56 = arith.addf %53, %55 : vector<128x1xf32>
    %c0_26 = arith.constant 0 : index
    %c0_27 = arith.constant 0 : index
    %57 = vector.load %arg11[%c0_26, %c0_27] : memref<128x1xf32, #tpu.memory_space<vmem>>, vector<128x1xf32>
    tpu.vector_store %arg11[%c0_26, %c0_27], %56 {strides = array<i32>} : memref<128x1xf32, #tpu.memory_space<vmem>>, vector<128x1xf32>,
    return
  }
  func.func @transform_0(%arg0: i32) -> (i32, i32) {
    %c0_i32 = arith.constant 0 : i32
    %c0_i32_0 = arith.constant 0 : i32
    return %arg0, %c0_i32 : i32, i32
  }
  func.func @transform_1(%arg0: i32) -> (i32, i32) {
    %c0_i32 = arith.constant 0 : i32
    %c0_i32_0 = arith.constant 0 : i32
    %c0_i32_1 = arith.constant 0 : i32
    return %c0_i32, %c0_i32_0 : i32, i32
  }
  func.func @transform_2(%arg0: i32) -> (i32, i32) {
    %c0_i32 = arith.constant 0 : i32
    %c0_i32_0 = arith.constant 0 : i32
    %c0_i32_1 = arith.constant 0 : i32
    return %c0_i32, %c0_i32_0 : i32, i32
  }
  func.func @transform_3(%arg0: i32) -> (i32, i32) {
    %c0_i32 = arith.constant 0 : i32
    %c0_i32_0 = arith.constant 0 : i32
    %c0_i32_1 = arith.constant 0 : i32
    return %c0_i32, %c0_i32_0 : i32, i32
  }
  func.func @transform_4(%arg0: i32) -> (i32, i32) {
    %c0_i32 = arith.constant 0 : i32
    %c0_i32_0 = arith.constant 0 : i32
    %c0_i32_1 = arith.constant 0 : i32
    return %c0_i32, %c0_i32_0 : i32, i32
  }
  func.func @transform_5(%arg0: i32) -> (i32, i32) {
    %c0_i32 = arith.constant 0 : i32
    %c0_i32_0 = arith.constant 0 : i32
    %c0_i32_1 = arith.constant 0 : i32
    return %c0_i32, %c0_i32_0 : i32, i32
  }
  func.func @transform_6(%arg0: i32) -> (i32, i32) {
    %c0_i32 = arith.constant 0 : i32
    %c0_i32_0 = arith.constant 0 : i32
    %c0_i32_1 = arith.constant 0 : i32
    return %c0_i32, %c0_i32_0 : i32, i32
  }
  func.func @transform_7(%arg0: i32) -> (i32, i32) {
    %c0_i32 = arith.constant 0 : i32
    %c0_i32_0 = arith.constant 0 : i32
    %c0_i32_1 = arith.constant 0 : i32
    return %c0_i32, %c0_i32_0 : i32, i32
  }
  func.func @transform_8(%arg0: i32) -> (i32, i32) {
    %c0_i32 = arith.constant 0 : i32
    %c0_i32_0 = arith.constant 0 : i32
    %c0_i32_1 = arith.constant 0 : i32
    return %c0_i32, %c0_i32_0 : i32, i32
  }
  func.func @transform_9(%arg0: i32) -> (i32, i32) {
    %c0_i32 = arith.constant 0 : i32
    %c0_i32_0 = arith.constant 0 : i32
    %c0_i32_1 = arith.constant 0 : i32
    return %c0_i32, %c0_i32_0 : i32, i32
  }
  func.func @transform_10(%arg0: i32) -> (i32, i32) {
    %c0_i32 = arith.constant 0 : i32
    %c0_i32_0 = arith.constant 0 : i32
    return %arg0, %c0_i32 : i32, i32
  }
  func.func @transform_11(%arg0: i32) -> (i32, i32) {
    %c0_i32 = arith.constant 0 : i32
    %c0_i32_0 = arith.constant 0 : i32
    return %arg0, %c0_i32 : i32, i32
  }
}

</mosaic_0001>

<bundles_post_ra>
// kernel: sdf_field_forward.1
= control target key start
LH: loop header
LB: loop body
LE: loop exit
PB: predicated region body
PF: predicated region fallthrough
CT: control target
= control target key end

     0   :  { %s7912_s0 = inlined_call_operand.vmem [shape: f32[256,21], index: 0, kind: input, shape index: {}]   ;;  %s7913_s1 = inlined_call_operand.vmem [shape: f32[3,64], index: 1, kind: input, shape index: {}]   ;;  %s7914_s2 = inlined_call_operand.vmem [shape: bf16[36,64], index: 2, kind: input, shape index: {}]   ;;  %s7915_s3 = inlined_call_operand.vmem [shape: f32[1,64], index: 3, kind: input, shape index: {}]   ;;  %s7916_s4 = inlined_call_operand.vmem [shape: bf16[64,64], index: 4, kind: input, shape index: {}]   ;;  %s7917_s5 = inlined_call_operand.vmem [shape: f32[1,64], index: 5, kind: input, shape index: {}]   ;;  %s7918_s6 = inlined_call_operand.vmem [shape: bf16[64,128], index: 6, kind: input, shape index: {}]   ;;  %s7919_s7 = inlined_call_operand.vmem [shape: f32[1,128], index: 7, kind: input, shape index: {}]   ;;  %s7920_s8 = inlined_call_operand.vmem [shape: f32[1,64], index: 8, kind: input, shape index: {}]   ;;  %s7921_s9 = inlined_call_operand.<no memory space> [shape: f32[1,1], index: 9, kind: input, shape index: {}]   ;;  %s7922_s10 = inlined_call_operand.vmem [shape: f32[256,1], index: 10, kind: output, shape index: {0}]   ;;  %s7923_s11 = inlined_call_operand.hbm [shape: bf16[256,128], index: 11, kind: output, shape index: {1}]  }
   0x1   :  { %v17_v0 = vstv %s7921_s9 }
   0x2   :  { %18 = vst [vmem:[#allocation2] sm:$0x1] %v17_v0 }
   0x3   :  { %19 = vsyncpa [#allocation4], 0 }
   0x4   :  { %21 = vsyncpa [#allocation4 + $0x1], 0  ;;  %s5842_s19 = smov 0   ;;  %s5844_s20 = smov 0  }
   0x5   :  { %s5846_s21 = smov 0   ;;  %s5848_s22 = smov 0  }
   0x6 LB: > { %s5863_s9 = sadd.s32 4294967295, %s5763_s22   ;;  %s5026_s23 = sadd.s32 4294967294, %s5763_s22   ;;  %s5763_s22 = sphi %s5848_s22, %s7957_s22   ;;  %s5759_s21 = sphi %s5846_s21, %s7956_s21   ;;  %s5755_s20 = sphi %s5844_s20, %s7955_s20   ;;  %s5751_s19 = sphi %s5842_s19, %s7954_s19  }
   0x7   : > { %s5867_s24 = sadd.s32 1, %s5763_s22   ;;  %s275_s25 = sadd.s32 1, %s5759_s21 }
   0x8   : > { %s272_s26 = ssub.s32 %s5763_s22, %s5867_s24  ;;  %p285_p0 = scmp.ne.s32.totalorder %s5759_s21, %s5755_s20 }
   0x9   : > { %p273_p1 = scmp.eq.s32.totalorder %s272_s26, 0  ;;  %p286_p2 = scmp.eq.s32.totalorder %s5863_s9, 1 }
   0xa   : > { %p291_p3 = scmp.ne.s32.totalorder %s5755_s20, %s5751_s19  ;;  %p292_p4 = scmp.eq.s32.totalorder %s5026_s23, 1 }
   0xb   : > { %s5878_s27 = scalar_select %p273_p1, %s5759_s21, %s275_s25  }
   0xc   : > { %p5880_p5 = por %p286_p2, %p285_p0  ;;  %p5884_p6 = por %p292_p4, %p291_p3 }
   0xd   : > { %p5029_p7 = scmp.ge.s32.totalorder %s5763_s22, 1  ;;  %p346_p8 = scmp.lt.s32.totalorder %s5763_s22, 3 }
   0xf   : > { %p347_p9 = pnand %p5029_p7, %p346_p8 }
  0x10   : > { %s5031_s30 = sshll.u32 (!%p347_p9), %s5863_s9, 4  ;;  %s5771_s16 = smov (!%p347_p9), 125  }
  0x11   : > { %350 = sbr.rel (%p347_p9) target bundleno = 1252 (0x4e4), region = 60  ;;  %p392_p10 = scmp.lt.s32.totalorder (!%p347_p9), %s5031_s30, 31 }
  0x12   : > { %s5772_s17 = smov (!%p347_p9), 15   ;;  %s5240_s23 = sshll.u32 (!%p347_p9), %s5863_s9, 10 }
  0x13   : > { %s7864_s13 = scalar_lea.hbm (!%p347_p9), %s7923_s11, %s5240_s23 }
  0x16   : > { %s7959_s30 = smov (!%p392_p10, %s5031_s30), 31  ;;  %v5765_v30 = vmov 683565275   ;;  %v5766_v32 = vmov 2475754826  }
  0x17   : > { %s5032_s12 = sshll.u32 %s7959_s30, 3  ;;  %v5767_v34 = vmov 2131351028   ;;  %v5768_v36 = vmov 2102212464   ;;  %s388_s30 = sand.u32 1, %s5755_s20  }
  0x18   : > { %s5899_s15 = scalar_lea.vmem %s7912_s0, %s5032_s12  ;;  %v5769_v38 = vmov 920167782   ;;  %v5770_v46 = vmov 1326507024   ;;  %s7781_s14 = scalar_lea.vmem %s7922_s10, %s5032_s12 }
  0x19   : > { %v5902_v1 = vld [vmem:[%s5899_s15 + $0x10] sm:$0xff]  ;;  %v5905_v2 = vld [vmem:[%s5899_s15 + $0x18] sm:$0xff]  ;;  %v5910_v5 = vld [vmem:[%s5899_s15] sm:$0xff]  ;;  %s7872_s9 = scalar_lea.sflag [#allocation4], %s388_s30  ;;  %s5776_s12 = smov [#allocation3]  }
  0x1a   : > { %v629_v3 = vand.u32 2147483647, %v5902_v1  ;;  %v632_v4 = vand.u32 2139095040, %v5902_v1  ;;  %v733_v6 = vand.u32 2147483647, %v5905_v2  ;;  %v736_v7 = vand.u32 2139095040, %v5905_v2 }
  0x1b   : > { %v424_v12 = vand.u32 2139095040, %v5910_v5  ;;  %vm631_vm13 = vcmp.lt.s32.totalorder %v5902_v1, 0 }
  0x1c   : > { %v633_v8 = vshrl.u32 %v632_v4, 23  ;;  %v636_v9 = vand.u32 8388607, %v629_v3  ;;  %v737_v10 = vshrl.u32 %v736_v7, 23  ;;  %v740_v11 = vand.u32 8388607, %v733_v6 }
  0x1d   : > { %v425_v15 = vshrl.u32 %v424_v12, 23  ;;  %vm6022_vm14 = vcmp.le.f32.partialorder %v629_v3, 0.7853982 }
  0x1e   : > { %v5043_v13 = vadd.s32 4294967169, %v633_v8  ;;  %v5047_v14 = vadd.s32 4294967169, %v737_v10  ;;  %v637_v17 = vor.u32 8388608, %v636_v9  ;;  %v741_v18 = vor.u32 8388608, %v740_v11 }
  0x1f   : > { %v5035_v20 = vadd.s32 4294967169, %v425_v15 }
  0x20   : > { %v639_v16 = vadd.s32 1, %v5043_v13  ;;  %v743_v19 = vadd.s32 1, %v5047_v14  ;;  %v5919_v25 = vshll.u32 %v637_v17, 8  ;;  %v5921_v27 = vshll.u32 %v741_v18, 8 }
  0x21   : > { %v5923_v28 = vadd.s32 1, %v5035_v20 }
  0x22   : > { %vm640_vm0 = vcmp.gt.s32.totalorder %v639_v16, 0  ;;  %vm744_vm1 = vcmp.gt.s32.totalorder %v743_v19, 0 }
  0x23   : > { %v641_v21 = vsel %vm640_vm0, %v639_v16, 0  ;;  %v745_v24 = vsel %vm744_vm1, %v743_v19, 0  ;;  %vm432_vm6 = vcmp.gt.s32.totalorder %v5923_v28, 0 }
  0x24   : > { %v642_v22 = vshrl.u32 %v641_v21, 5  ;;  %v643_v23 = vand.u32 31, %v641_v21  ;;  %v747_v26 = vand.u32 31, %v745_v24  ;;  %v5930_v40 = vshrl.u32 %v745_v24, 5 }
  0x26   : > { %v644_v29 = vsub.s32 32, %v643_v23  ;;  %v646_v31 = vshll.u32 %v5765_v30, %v643_v23  ;;  %v649_v33 = vshll.u32 %v5766_v32, %v643_v23  ;;  %v652_v35 = vshll.u32 %v5767_v34, %v643_v23 }
  0x27   : > { %v655_v37 = vshll.u32 %v5768_v36, %v643_v23  ;;  %v658_v39 = vshll.u32 %v5769_v38, %v643_v23  ;;  %vm661_vm2 = vcmp.lt.s32.totalorder %v642_v22, 1  ;;  %vm662_vm3 = vcmp.lt.s32.totalorder %v642_v22, 2 }
  0x28   : > { %v645_v41 = vshrl.u32 %v5765_v30, %v644_v29  ;;  %v647_v42 = vshrl.u32 %v5766_v32, %v644_v29  ;;  %v650_v43 = vshrl.u32 %v5767_v34, %v644_v29  ;;  %v653_v44 = vshrl.u32 %v5768_v36, %v644_v29 }
  0x29   : > { %v656_v45 = vshrl.u32 %v5769_v38, %v644_v29  ;;  %v659_v47 = vshrl.u32 %v5770_v46, %v644_v29  ;;  %vm664_vm4 = vcmp.lt.s32.totalorder %v642_v22, 4  ;;  %v748_v51 = vsub.s32 32, %v747_v26 }
  0x2a   : > { %v648_v48 = vor.u32 %v647_v42, %v646_v31  ;;  %v651_v49 = vor.u32 %v650_v43, %v649_v33  ;;  %v654_v50 = vor.u32 %v653_v44, %v652_v35  ;;  %vm663_vm5 = vcmp.lt.s32.totalorder %v642_v22, 3 }
  0x2b   : > { %v657_v52 = vor.u32 %v656_v45, %v655_v37  ;;  %v660_v53 = vor.u32 %v659_v47, %v658_v39  ;;  %v750_v54 = vshll.u32 %v5765_v30, %v747_v26  ;;  %v753_v62 = vshll.u32 %v5766_v32, %v747_v26 }
  0x2c   : > { %v665_v55 = vsel %vm661_vm2, %v645_v41, %v648_v48  ;;  %v666_v56 = vsel %vm664_vm4, %v654_v50, 2102212464  ;;  %v669_v57 = vsel %vm661_vm2, %v648_v48, %v651_v49  ;;  %v673_v58 = vsel %vm661_vm2, %v651_v49, %v654_v50 }
  0x2d   : > { %v667_v59 = vsel %vm663_vm5, %v651_v49, %v666_v56  ;;  %v670_v60 = vsel %vm664_vm4, %v657_v52, 920167782  ;;  %v674_v61 = vsel %vm664_vm4, %v660_v53, 1326507024  ;;  %v749_v4 = vshrl.u32 %v5765_v30, %v748_v51  ;;  %v5989_v56 = vld [vmem:[%s5899_s15 + $0x8] sm:$0xff] }
  0x2e   : > { %v671_v63 = vsel %vm663_vm5, %v654_v50, %v670_v60  ;;  %v675_v0 = vsel %vm663_vm5, %v657_v52, %v674_v61  ;;  %v751_v7 = vshrl.u32 %v5766_v32, %v748_v51  ;;  %v668_v8 = vsel %vm662_vm3, %v665_v55, %v667_v59 }
  0x2f   : > { %v672_v9 = vsel %vm662_vm3, %v669_v57, %v671_v63  ;;  %v676_v10 = vsel %vm662_vm3, %v673_v58, %v675_v0  ;;  %v754_v11 = vshrl.u32 %v5767_v34, %v748_v51  ;;  %v756_v18 = vshll.u32 %v5767_v34, %v747_v26 }
  0x30   : > { %v5951_v12 = vmul.u32.u64.low %v5919_v25, %v676_v10  ;;  %v5952_v13 = vmul.u32.u64.high %v5919_v25, %v676_v10, %v5951_v12  ;;  %v5955_v14 = vmul.u32.u64.low %v5919_v25, %v672_v9  ;;  %v5956_v15 = vmul.u32.u64.high %v5919_v25, %v672_v9, %v5955_v14 }
  0x31   : > { %v752_v16 = vor.u32 %v751_v7, %v750_v54  ;;  %v755_v17 = vor.u32 %v754_v11, %v753_v62  ;;  %v757_v19 = vshrl.u32 %v5768_v36, %v748_v51  ;;  %v759_v20 = vshll.u32 %v5768_v36, %v747_v26 }
  0x32   : > { %v760_v21 = vshrl.u32 %v5769_v38, %v748_v51  ;;  %v762_v22 = vshll.u32 %v5769_v38, %v747_v26  ;;  %v763_v23 = vshrl.u32 %v5770_v46, %v748_v51  ;;  %v684_v24 = vmul.u32 %v5919_v25, %v668_v8 }
  0x33   : > { %v758_v29 = vor.u32 %v757_v19, %v756_v18  ;;  %vm765_vm7 = vcmp.lt.s32.totalorder %v5930_v40, 1  ;;  %vm766_vm8 = vcmp.lt.s32.totalorder %v5930_v40, 2  ;;  %vm686_vm9 = vc.u32 %v5952_v13, %v5955_v14 }
  0x34   : > { %v687_v31 = vadd.s32 1, %v5956_v15  ;;  %v761_v33 = vor.u32 %v760_v21, %v759_v20  ;;  %vm767_vm10 = vcmp.lt.s32.totalorder %v5930_v40, 3  ;;  %v764_v35 = vor.u32 %v763_v23, %v762_v22 }
  0x35   : > { %vm768_vm11 = vcmp.lt.s32.totalorder %v5930_v40, 4  ;;  %v769_v26 = vsel %vm765_vm7, %v749_v4, %v752_v16  ;;  %v773_v37 = vsel %vm765_vm7, %v752_v16, %v755_v17  ;;  %v777_v42 = vsel %vm765_vm7, %v755_v17, %v758_v29 }
  0x36   : > { %v688_v25 = vsel %vm686_vm9, %v687_v31, %v5956_v15  ;;  %v770_v39 = vsel %vm768_vm11, %v758_v29, 2102212464  ;;  %v774_v41 = vsel %vm768_vm11, %v761_v33, 920167782  ;;  %v778_v47 = vsel %vm768_vm11, %v764_v35, 1326507024 }
  0x37   : > { %v689_v43 = vadd.s32 %v688_v25, %v684_v24  ;;  %v771_v44 = vsel %vm767_vm10, %v755_v17, %v770_v39  ;;  %v775_v45 = vsel %vm767_vm10, %v758_v29, %v774_v41  ;;  %v779_v50 = vsel %vm767_vm10, %v761_v33, %v778_v47 }
  0x38   : > { %v772_v48 = vsel %vm766_vm8, %v769_v26, %v771_v44  ;;  %v776_v49 = vsel %vm766_vm8, %v773_v37, %v775_v45  ;;  %v433_v51 = vsel %vm432_vm6, %v5923_v28, 0  ;;  %v780_v53 = vsel %vm766_vm8, %v777_v42, %v779_v50 }
  0x39   : > { %v690_v52 = vadd.s32 536870912, %v689_v43  ;;  %v5984_v54 = vmul.u32.u64.low %v5921_v27, %v776_v49  ;;  %v5985_v55 = vmul.u32.u64.high %v5921_v27, %v776_v49, %v5984_v54  ;;  %v421_v59 = vand.u32 2147483647, %v5910_v5 }
  0x3a   : > { %v5992_v57 = vmul.u32.u64.low %v5921_v27, %v780_v53  ;;  %v5993_v58 = vmul.u32.u64.high %v5921_v27, %v780_v53, %v5992_v57  ;;  %v435_v61 = vand.u32 31, %v433_v51  ;;  %v788_v28 = vmul.u32 %v5921_v27, %v772_v48 }
  0x3b   : > { %v691_v60 = vshrl.u32 %v690_v52, 30  ;;  %v528_v40 = vand.u32 2139095040, %v5989_v56  ;;  %v791_v63 = vadd.s32 1, %v5985_v55  ;;  %v428_v0 = vand.u32 8388607, %v421_v59 }
  0x3c   : > { %vm790_vm12 = vc.u32 %v5993_v58, %v5984_v54  ;;  %v525_v4 = vand.u32 2147483647, %v5989_v56  ;;  %v436_v9 = vsub.s32 32, %v435_v61  ;;  %v6006_v16 = vshrl.u32 %v433_v51, 5 }
  0x3d   : > { %v692_v62 = vshll.u32 %v691_v60, 30  ;;  %v792_v8 = vsel %vm790_vm12, %v791_v63, %v5985_v55  ;;  %v529_v11 = vshrl.u32 %v528_v40, 23  ;;  %v429_v15 = vor.u32 8388608, %v428_v0 }
  0x3e   : > { %v793_v10 = vadd.s32 %v792_v8, %v788_v28  ;;  %v6010_v17 = vand.u32 8388607, %v525_v4  ;;  %v685_v18 = vadd.s32 %v5955_v14, %v5952_v13  ;;  %v444_v20 = vshll.u32 %v5767_v34, %v435_v61 }
  0x3f   : > { %v693_v7 = vsub.s32 %v689_v43, %v692_v62  ;;  %v445_v21 = vshrl.u32 %v5768_v36, %v436_v9  ;;  %v438_v23 = vshll.u32 %v5765_v30, %v435_v61  ;;  %v439_v24 = vshrl.u32 %v5766_v32, %v436_v9 }
  0x40   : > { %v794_v12 = vadd.s32 536870912, %v793_v10  ;;  %v5039_v29 = vadd.s32 4294967169, %v529_v11  ;;  %v441_v13 = vshll.u32 %v5766_v32, %v435_v61  ;;  %v442_v14 = vshrl.u32 %v5767_v34, %v436_v9 }
  0x41   : > { %v695_v27 = vsub.s32 0, %v693_v7  ;;  %v447_v35 = vshll.u32 %v5768_v36, %v435_v61  ;;  %v448_v37 = vshrl.u32 %v5769_v38, %v436_v9  ;;  %vm453_vm15 = vcmp.lt.s32.totalorder %v6006_v16, 1 }
  0x42   : > { %v6016_v22 = vshrl.u32 %v794_v12, 30  ;;  %vm456_vm0 = vcmp.lt.s32.totalorder %v6006_v16, 4  ;;  %v715_v3 = vsub.s32 4, %v691_v60  ;;  %v437_v39 = vshrl.u32 %v5765_v30, %v436_v9 }
  0x43   : > { %v5044_v19 = vmin.u32 %v695_v27, %v693_v7  ;;  %v446_v41 = vor.u32 %v445_v21, %v444_v20  ;;  %v440_v43 = vor.u32 %v439_v24, %v438_v23  ;;  %v450_v44 = vshll.u32 %v5769_v38, %v435_v61 }
  0x44   : > { %v796_v26 = vshll.u32 %v6016_v22, 30  ;;  %v451_v45 = vshrl.u32 %v5770_v46, %v436_v9  ;;  %v443_v47 = vor.u32 %v442_v14, %v441_v13  ;;  %v449_v48 = vor.u32 %v448_v37, %v447_v35 }
  0x45   : > { %v697_v33 = vclz %v5044_v19  ;;  %v458_v49 = vsel %vm456_vm0, %v446_v41, 2102212464  ;;  %vm454_vm2 = vcmp.lt.s32.totalorder %v6006_v16, 2  ;;  %vm455_vm3 = vcmp.lt.s32.totalorder %v6006_v16, 3 }
  0x46   : > { %v6034_v42 = vsub.s32 %v793_v10, %v796_v26  ;;  %v716_v57 = vsel %vm631_vm13, %v715_v3, %v691_v60  ;;  %v452_v28 = vor.u32 %v451_v45, %v450_v44  ;;  %v457_v40 = vsel %vm453_vm15, %v437_v39, %v440_v43 }
  0x47   : > { %v5045_v25 = vadd.s32 4294967294, %v697_v33  ;;  %v459_v62 = vsel %vm455_vm3, %v443_v47, %v458_v49  ;;  %v461_v8 = vsel %vm453_vm15, %v440_v43, %v443_v47  ;;  %v718_v60 = vsel %vm6022_vm14, 0, %v716_v57 }
  0x48   : > { %v799_v51 = vsub.s32 0, %v6034_v42  ;;  %v789_v9 = vadd.s32 %v5984_v54, %v5993_v58  ;;  %v469_v11 = vshll.u32 %v429_v15, 8  ;;  %v465_v19 = vsel %vm453_vm15, %v443_v47, %v446_v41 }
  0x49   : > { %vm5046_vm1 = vcmp.lt.s32.totalorder %v5045_v25, 0  ;;  %vm735_vm4 = vcmp.lt.s32.totalorder %v5905_v2, 0  ;;  %v460_v21 = vsel %vm454_vm2, %v457_v40, %v459_v62  ;;  %v466_v54 = vsel %vm456_vm0, %v452_v28, 1326507024 }
  0x4a   : > { %v700_v50 = vsel %vm5046_vm1, 0, %v5045_v25  ;;  %v5048_v61 = vmin.u32 %v799_v51, %v6034_v42  ;;  %v467_v24 = vsel %vm455_vm3, %v449_v48, %v466_v54  ;;  %v535_v33 = vadd.s32 1, %v5039_v29 }
  0x4b   : > { %v701_v52 = vsub.s32 32, %v700_v50  ;;  %v702_v53 = vshll.u32 %v693_v7, %v700_v50  ;;  %v705_v55 = vsub.s32 4294967266, %v700_v50  ;;  %v462_v7 = vsel %vm456_vm0, %v449_v48, 920167782 }
  0x4c   : > { %v801_v10 = vclz %v5048_v61  ;;  %v468_v13 = vsel %vm454_vm2, %v465_v19, %v467_v24  ;;  %vm536_vm6 = vcmp.gt.s32.totalorder %v535_v33, 0  ;;  %v819_v29 = vsub.s32 4, %v6016_v22 }
  0x4d   : > { %v703_v63 = vshrl.u32 %v685_v18, %v701_v52  ;;  %v706_v0 = vadd.s32 127, %v705_v55  ;;  %v463_v18 = vsel %vm455_vm3, %v446_v41, %v462_v7  ;;  %v476_v45 = vmul.u32 %v469_v11, %v460_v21 }
  0x4e   : > { %v5049_v20 = vadd.s32 4294967294, %v801_v10  ;;  %v464_v23 = vsel %vm454_vm2, %v461_v8, %v463_v18  ;;  %v6077_v25 = vmul.u32.u64.low %v469_v11, %v468_v13  ;;  %v6078_v3 = vmul.u32.u64.high %v469_v11, %v468_v13, %v6077_v25 }
  0x4f   : > { %v704_v27 = vor.u32 %v703_v63, %v702_v53  ;;  %v707_v12 = vshll.u32 %v706_v0, 23  ;;  %v6073_v14 = vmul.u32.u64.low %v469_v11, %v464_v23  ;;  %v6074_v35 = vmul.u32.u64.high %v469_v11, %v464_v23, %v6073_v14 }
  0x50   : > { %vm5050_vm5 = vcmp.lt.s32.totalorder %v5049_v20, 0  ;;  %v537_v16 = vsel %vm536_vm6, %v535_v33, 0  ;;  %vm6084_vm7 = vcmp.le.f32.partialorder %v733_v6, 0.7853982  ;;  %v533_v51 = vor.u32 8388608, %v6010_v17 }
  0x51   : > { %v708_v58 = vor.u32 4788187, %v707_v12  ;;  %v711_v15 = vcvt.s32.f32 %v704_v27  ;;  %v804_v37 = vsel %vm5050_vm5, 0, %v5049_v20  ;;  %v479_v50 = vadd.s32 1, %v6074_v35 }
  0x52   : > { %v805_v39 = vsub.s32 32, %v804_v37  ;;  %v806_v41 = vshll.u32 %v6034_v42, %v804_v37  ;;  %v809_v43 = vsub.s32 4294967266, %v804_v37  ;;  %v722_v52 = vadd.s32 3, %v718_v60 }
  0x53   : > { %v709_v26 = vand.u32 2147483647, %v708_v58  ;;  %vm478_vm8 = vc.u32 %v6078_v3, %v6073_v14  ;;  %v539_v53 = vand.u32 31, %v537_v16  ;;  %v6092_v61 = vand.u32 3, %v718_v60 }
  0x54   : > { %v807_v48 = vshrl.u32 %v789_v9, %v805_v39  ;;  %v810_v49 = vadd.s32 127, %v809_v43  ;;  %v480_v6 = vsel %vm478_vm8, %v479_v50, %v6074_v35  ;;  %v820_v40 = vsel %vm735_vm4, %v819_v29, %v6016_v22 }
  0x55   : > { %v712_v44 = vmul.f32 %v711_v15, %v709_v26  ;;  %v481_v17 = vadd.s32 %v480_v6, %v476_v45  ;;  %v540_v62 = vsub.s32 32, %v539_v53  ;;  %v6103_v7 = vshrl.u32 %v537_v16, 5 }
  0x56   : > { %v808_v55 = vor.u32 %v807_v48, %v806_v41  ;;  %v811_v57 = vshll.u32 %v810_v49, 23  ;;  %v542_v9 = vshll.u32 %v5765_v30, %v539_v53  ;;  %v545_v10 = vshll.u32 %v5766_v32, %v539_v53 }
  0x57   : > { %v713_v42 = vxor.u32 2147483648, %v712_v44  ;;  %v482_v60 = vadd.s32 536870912, %v481_v17  ;;  %v543_v22 = vshrl.u32 %v5766_v32, %v540_v62  ;;  %v546_v27 = vshrl.u32 %v5767_v34, %v540_v62 }
  0x58   : > { %v812_v0 = vor.u32 4788187, %v811_v57  ;;  %v815_v8 = vcvt.s32.f32 %v808_v55  ;;  %v548_v31 = vshll.u32 %v5767_v34, %v539_v53  ;;  %v549_v18 = vshrl.u32 %v5768_v36, %v540_v62 }
  0x59   : > { %v714_v28 = vsel %vm631_vm13, %v713_v42, %v712_v44  ;;  %v6109_v12 = vshrl.u32 %v482_v60, 30  ;;  %v551_v19 = vshll.u32 %v5768_v36, %v539_v53  ;;  %v6114_v20 = vand.u32 3, %v722_v52 }
  0x5a   : > { %v717_v63 = vsel %vm6022_vm14, %v5902_v1, %v714_v28  ;;  %v813_v11 = vand.u32 2147483647, %v812_v0  ;;  %v552_v23 = vshrl.u32 %v5769_v38, %v540_v62  ;;  %v554_v54 = vshll.u32 %v5769_v38, %v539_v53 }
  0x5b   : > { %5624 = vcosq.f32 %v717_v63  ;;  %v822_v58 = vsel %vm6084_vm7, 0, %v820_v40  ;;  %v484_v15 = vshll.u32 %v6109_v12, 30  ;;  %v555_v24 = vshrl.u32 %v5770_v46, %v540_v62 }
  0x5c   : > { %5626 = vsinq.f32 %v717_v63  ;;  %v816_v21 = vmul.f32 %v815_v8, %v813_v11  ;;  %vm557_vm9 = vcmp.lt.s32.totalorder %v6103_v7, 1  ;;  %v544_v13 = vor.u32 %v543_v22, %v542_v9 }
  0x5d   : > { %v547_v35 = vor.u32 %v546_v27, %v545_v10  ;;  %v553_v26 = vor.u32 %v552_v23, %v551_v19  ;;  %v6123_v37 = vsub.s32 %v481_v17, %v484_v15  ;;  %v541_v25 = vshrl.u32 %v5765_v30, %v540_v62 }
  0x5e   : > { %v817_v33 = vxor.u32 2147483648, %v816_v21  ;;  %v550_v39 = vor.u32 %v549_v18, %v548_v31  ;;  %vm560_vm10 = vcmp.lt.s32.totalorder %v6103_v7, 4  ;;  %v826_v43 = vadd.s32 3, %v822_v58 }
  0x5f   : > { %v556_v44 = vor.u32 %v555_v24, %v554_v54  ;;  %vm559_vm11 = vcmp.lt.s32.totalorder %v6103_v7, 3  ;;  %v487_v45 = vsub.s32 0, %v6123_v37  ;;  %vm558_vm12 = vcmp.lt.s32.totalorder %v6103_v7, 2 }
  0x60   : > { %v818_v41 = vsel %vm735_vm4, %v817_v33, %v816_v21  ;;  %v562_v16 = vsel %vm560_vm10, %v550_v39, 2102212464  ;;  %vm2386_vm13 = vcmp.eq.s32.totalorder %v6092_v61, 0  ;;  %vm2389_vm14 = vcmp.eq.s32.totalorder %v6092_v61, 2  ;;  %v6191_v33 = vld [vmem:[%s5899_s15 + $0x20] sm:$0xff] }
  0x61   : > { %v821_v29 = vsel %vm6084_vm7, %v5905_v2, %v818_v41  ;;  %v565_v48 = vsel %vm557_vm9, %v544_v13, %v547_v35  ;;  %v566_v49 = vsel %vm560_vm10, %v553_v26, 920167782  ;;  %v573_v47 = vshll.u32 %v533_v51, 8 }
  0x62   : > { %5628 = vcosq.f32 %v821_v29  ;;  %v5036_v50 = vmin.u32 %v487_v45, %v6123_v37  ;;  %v561_v42 = vsel %vm557_vm9, %v541_v25, %v544_v13  ;;  %v567_v52 = vsel %vm559_vm11, %v550_v39, %v566_v49 }
  0x63   : > { %5630 = vsinq.f32 %v821_v29  ;;  %v563_v53 = vsel %vm559_vm11, %v547_v35, %v562_v16  ;;  %v568_v55 = vsel %vm558_vm12, %v565_v48, %v567_v52  ;;  %v569_v57 = vsel %vm557_vm9, %v547_v35, %v550_v39 }
  0x64   : > { %v570_v51 = vsel %vm560_vm10, %v556_v44, 1326507024  ;;  %vm724_vm15 = vcmp.lt.s32.totalorder %v6114_v20, 2  ;;  %vm725_vm0 = vcmp.eq.s32.totalorder %v6114_v20, 0  ;;  %vm2385_vm1 = vcmp.lt.s32.totalorder %v6092_v61, 2 }
  0x65   : > { %v6159_v6 = vand.u32 3, %v822_v58  ;;  %v489_v28 = vclz %v5036_v50  ;;  %vm721_vm2 = vweird.f32 %v5902_v1  ;;  %vm728_vm3 = vcmp.eq.s32.totalorder %v6114_v20, 2 }
  0x66   : > { %vm423_vm4 = vcmp.lt.s32.totalorder %v5910_v5, 0  ;;  %v571_v17 = vsel %vm559_vm11, %v553_v26, %v570_v51  ;;  %v6166_v62 = vmul.u32.u64.low %v573_v47, %v568_v55  ;;  %v6167_v63 = vmul.u32.u64.high %v573_v47, %v568_v55, %v6166_v62 }
  0x67   : > { %v5037_v60 = vadd.s32 4294967294, %v489_v28  ;;  %v564_v9 = vsel %vm558_vm12, %v561_v42, %v563_v53  ;;  %v572_v10 = vsel %vm558_vm12, %v569_v57, %v571_v17  ;;  %v827_v22 = vand.u32 3, %v826_v43 }
  0x68   : > { %v5625_v40 = vpop.eup %5624  ;;  %v6174_v27 = vmul.u32.u64.low %v573_v47, %v572_v10  ;;  %v6175_v31 = vmul.u32.u64.high %v573_v47, %v572_v10, %v6174_v27  ;;  %vm2488_vm5 = vcmp.lt.s32.totalorder %v6159_v6, 2  ;;  %vm2489_vm6 = vcmp.eq.s32.totalorder %v6159_v6, 0 }
  0x69   : > { %v5627_v0 = vpop.eup %5626  ;;  %v729_v8 = vxor.u32 2147483648, %v5625_v40  ;;  %vm2492_vm7 = vcmp.eq.s32.totalorder %v6159_v6, 2  ;;  %v477_v18 = vadd.s32 %v6073_v14, %v6078_v3  ;;  %vm5038_vm8 = vcmp.lt.s32.totalorder %v5037_v60, 0 }
  0x6a   : > { %v726_v11 = vxor.u32 2147483648, %v5627_v0  ;;  %vm825_vm9 = vweird.f32 %v5905_v2  ;;  %v492_v7 = vsel %vm5038_vm8, 0, %v5037_v60  ;;  %v507_v19 = vsub.s32 4, %v6109_v12 }
  0x6b   : > { %v580_v21 = vmul.u32 %v573_v47, %v564_v9  ;;  %v583_v23 = vadd.s32 1, %v6167_v63  ;;  %v730_v58 = vsel %vm728_vm3, %v729_v8, %v5627_v0  ;;  %v493_v15 = vsub.s32 32, %v492_v7 }
  0x6c   : > { %v727_v54 = vsel %vm725_vm0, %v5625_v40, %v726_v11  ;;  %v494_v24 = vshll.u32 %v6123_v37, %v492_v7  ;;  %vm828_vm10 = vcmp.lt.s32.totalorder %v827_v22, 2  ;;  %vm829_vm11 = vcmp.eq.s32.totalorder %v827_v22, 0 }
  0x6d   : > { %vm832_vm12 = vcmp.eq.s32.totalorder %v827_v22, 2  ;;  %v497_v14 = vsub.s32 4294967266, %v492_v7  ;;  %v2388_v3 = vsel %vm2386_vm13, %v5625_v40, %v726_v11  ;;  %v2391_v13 = vsel %vm2389_vm14, %v729_v8, %v5627_v0 }
  0x6e   : > { %v495_v35 = vshrl.u32 %v477_v18, %v493_v15  ;;  %vm582_vm0 = vc.u32 %v6175_v31, %v6166_v62  ;;  %v731_v26 = vsel %vm724_vm15, %v727_v54, %v730_v58  ;;  %v840_v39 = vand.u32 2139095040, %v6191_v33 }
  0x6f   : > { %v498_v37 = vadd.s32 127, %v497_v14  ;;  %v584_v25 = vsel %vm582_vm0, %v583_v23, %v6167_v63  ;;  %v5629_v41 = vpop.eup %5628  ;;  %v508_v44 = vsel %vm423_vm4, %v507_v19, %v6109_v12  ;;  %v837_v45 = vand.u32 2147483647, %v6191_v33 }
  0x70   : > { %v496_v43 = vor.u32 %v495_v35, %v494_v24  ;;  %v585_v29 = vadd.s32 %v584_v25, %v580_v21  ;;  %v5631_v16 = vpop.eup %5630  ;;  %v833_v48 = vxor.u32 2147483648, %v5629_v41  ;;  %v2392_v20 = vsel %vm2385_vm1, %v2388_v3, %v2391_v13 }
  0x71   : > { %v499_v49 = vshll.u32 %v498_v37, 23  ;;  %v841_v47 = vshrl.u32 %v840_v39, 23  ;;  %v732_v50 = vsel %vm721_vm2, nan, %v731_v26  ;;  %v830_v42 = vxor.u32 2147483648, %v5631_v16 }
  0x72   : > { %v503_v52 = vcvt.s32.f32 %v496_v43  ;;  %v586_v53 = vadd.s32 536870912, %v585_v29  ;;  %v834_v55 = vsel %vm832_vm12, %v833_v48, %v5631_v16  ;;  %v2494_v12 = vsel %vm2492_vm7, %v833_v48, %v5631_v16 }
  0x73   : > { %v500_v57 = vor.u32 4788187, %v499_v49  ;;  %v5051_v51 = vadd.s32 4294967169, %v841_v47  ;;  %v831_v28 = vsel %vm829_vm11, %v5629_v41, %v830_v42  ;;  %v2491_v61 = vsel %vm2489_vm6, %v5629_v41, %v830_v42 }
  0x74   : > { %v6217_v40 = vshrl.u32 %v586_v53, 30  ;;  %v844_v17 = vand.u32 8388607, %v837_v45  ;;  %v835_v63 = vsel %vm828_vm10, %v831_v28, %v834_v55  ;;  %v2495_v0 = vsel %vm2488_vm5, %v2491_v61, %v2494_v12 }
  0x75   : > { %v501_v8 = vand.u32 2147483647, %v500_v57  ;;  %v847_v60 = vadd.s32 1, %v5051_v51  ;;  %v836_v9 = vsel %vm825_vm9, nan, %v835_v63  ;;  %v2393_v10 = vsel %vm721_vm2, nan, %v2392_v20 }
  0x76   : > { %v2496_v11 = vsel %vm825_vm9, nan, %v2495_v0  ;;  %v588_v27 = vshll.u32 %v6217_v40, 30  ;;  %v5527_v18 = vpack.i.bf16 %v836_v9, %v732_v50  ;;  %vm422_vm13 = vcmp.le.f32.partialorder %v421_v59, 0.7853982 }
  0x77   : > { %v504_v22 = vmul.f32 %v503_v52, %v501_v8  ;;  %vm848_vm14 = vcmp.gt.s32.totalorder %v847_v60, 0  ;;  %v6233_v6 = vsel %vm422_vm13, 0, %v508_v44  ;;  %v5532_v21 = vpack.i.bf16 %v2496_v11, %v2393_v10 }
  0x78   : > { %v6235_v7 = vsub.s32 %v585_v29, %v588_v27  ;;  %v849_v19 = vsel %vm848_vm14, %v847_v60, 0  ;;  %5528 = vrot.lane.b32.xlu1 %v5527_v18, %s5771_s16  ;;  %v845_v2 = vor.u32 8388608, %v844_v17  ;;  %v514_v24 = vadd.s32 3, %v6233_v6  ;;  %v6272_v60 = vld [vmem:[%s5899_s15 + $0x28] sm:$0xff] }
  0x79   : > { %v505_v1 = vxor.u32 2147483648, %v504_v22  ;;  %v851_v23 = vand.u32 31, %v849_v19  ;;  %v581_v14 = vadd.s32 %v6166_v62, %v6175_v31  ;;  %v611_v13 = vsub.s32 4, %v6217_v40 }
  0x7a   : > { %v591_v54 = vsub.s32 0, %v6235_v7  ;;  %v6250_v37 = vshll.u32 %v845_v2, 8  ;;  %vm527_vm15 = vcmp.lt.s32.totalorder %v5989_v56, 0  ;;  %v850_v39 = vshrl.u32 %v849_v19, 5 }
  0x7b   : > { %v506_v58 = vsel %vm423_vm4, %v505_v1, %v504_v22  ;;  %v852_v59 = vsub.s32 32, %v851_v23  ;;  %v854_v35 = vshll.u32 %v5765_v30, %v851_v23  ;;  %v857_v26 = vshll.u32 %v5766_v32, %v851_v23 }
  0x7c   : > { %v509_v15 = vsel %vm422_vm13, %v5910_v5, %v506_v58  ;;  %v5040_v3 = vmin.u32 %v591_v54, %v6235_v7  ;;  %5533 = vrot.lane.b32.xlu1 %v5532_v21, %s5772_s17  ;;  %v860_v43 = vshll.u32 %v5767_v34, %v851_v23  ;;  %v863_v16 = vshll.u32 %v5768_v36, %v851_v23 }
  0x7d   : > { %5632 = vcosq.f32 %v509_v15  ;;  %v853_v62 = vshrl.u32 %v5765_v30, %v852_v59  ;;  %v855_v31 = vshrl.u32 %v5766_v32, %v852_v59  ;;  %v858_v41 = vshrl.u32 %v5767_v34, %v852_v59 }
  0x7e   : > { %v593_v25 = vclz %v5040_v3  ;;  %5634 = vsinq.f32 %v509_v15  ;;  %v861_v29 = vshrl.u32 %v5768_v36, %v852_v59  ;;  %v864_v48 = vshrl.u32 %v5769_v38, %v852_v59 }
  0x7f   : > { %v856_v20 = vor.u32 %v855_v31, %v854_v35  ;;  %v859_v49 = vor.u32 %v858_v41, %v857_v26  ;;  %v866_v47 = vshll.u32 %v5769_v38, %v851_v23  ;;  %v867_v50 = vshrl.u32 %v5770_v46, %v852_v59 }
  0x80   : > { %v5041_v44 = vadd.s32 4294967294, %v593_v25  ;;  %vm6264_vm1 = vcmp.le.f32.partialorder %v525_v4, 0.7853982  ;;  %v862_v52 = vor.u32 %v861_v29, %v860_v43  ;;  %v865_v53 = vor.u32 %v864_v48, %v863_v16 }
  0x81   : > { %vm869_vm3 = vcmp.lt.s32.totalorder %v850_v39, 1  ;;  %v868_v12 = vor.u32 %v867_v50, %v866_v47  ;;  %vm870_vm4 = vcmp.lt.s32.totalorder %v850_v39, 2  ;;  %vm871_vm5 = vcmp.lt.s32.totalorder %v850_v39, 3 }
  0x82   : > { %vm5042_vm2 = vcmp.lt.s32.totalorder %v5041_v44, 0  ;;  %vm872_vm6 = vcmp.lt.s32.totalorder %v850_v39, 4  ;;  %v873_v61 = vsel %vm869_vm3, %v853_v62, %v856_v20  ;;  %v877_v17 = vsel %vm869_vm3, %v856_v20, %v859_v49 }
  0x83   : > { %v596_v55 = vsel %vm5042_vm2, 0, %v5041_v44  ;;  %v874_v4 = vsel %vm872_vm6, %v862_v52, 2102212464  ;;  %v878_v63 = vsel %vm872_vm6, %v865_v53, 920167782  ;;  %v612_v11 = vsel %vm527_vm15, %v611_v13, %v6217_v40 }
  0x84   : > { %v597_v57 = vsub.s32 32, %v596_v55  ;;  %v598_v51 = vshll.u32 %v6235_v7, %v596_v55  ;;  %v601_v28 = vsub.s32 4294967266, %v596_v55  ;;  %v875_v9 = vsel %vm871_vm5, %v859_v49, %v874_v4 }
  0x85   : > { %v879_v10 = vsel %vm871_vm5, %v862_v52, %v878_v63  ;;  %v881_v18 = vsel %vm869_vm3, %v859_v49, %v862_v52  ;;  %v882_v22 = vsel %vm872_vm6, %v868_v12, 1326507024  ;;  %v876_v1 = vsel %vm870_vm4, %v873_v61, %v875_v9  ;;  %v6314_v12 = vld [vmem:[%s5899_s15 + $0x30] sm:$0xff] }
  0x86   : > { %v599_v0 = vshrl.u32 %v581_v14, %v597_v57  ;;  %v602_v8 = vadd.s32 127, %v601_v28  ;;  %v880_v27 = vsel %vm870_vm4, %v877_v17, %v879_v10  ;;  %v883_v21 = vsel %vm871_vm5, %v865_v53, %v882_v22 }
  0x87   : > { %v884_v2 = vsel %vm870_vm4, %v881_v18, %v883_v21  ;;  %v6285_v23 = vmul.u32.u64.low %v6250_v37, %v880_v27  ;;  %v6286_v54 = vmul.u32.u64.high %v6250_v37, %v880_v27, %v6285_v23  ;;  %v944_v58 = vand.u32 2139095040, %v6272_v60 }
  0x88   : > { %v600_v7 = vor.u32 %v599_v0, %v598_v51  ;;  %v603_v19 = vshll.u32 %v602_v8, 23  ;;  %v6290_v15 = vmul.u32.u64.low %v6250_v37, %v884_v2  ;;  %v6291_v14 = vmul.u32.u64.high %v6250_v37, %v884_v2, %v6290_v15 }
  0x89   : > { %v515_v13 = vand.u32 3, %v514_v24  ;;  %v614_v35 = vsel %vm6264_vm1, 0, %v612_v11  ;;  %v945_v26 = vshrl.u32 %v944_v58, 23  ;;  %v941_v62 = vand.u32 2147483647, %v6272_v60 }
  0x8a   : > { %v604_v40 = vor.u32 4788187, %v603_v19  ;;  %v607_v59 = vcvt.s32.f32 %v600_v7  ;;  %v5633_v3 = vpop.eup %5632  ;;  %v6297_v31 = vand.u32 3, %v6233_v6  ;;  %v892_v41 = vmul.u32 %v6250_v37, %v876_v1 }
  0x8b   : > { %v5635_v25 = vpop.eup %5634  ;;  %v895_v43 = vadd.s32 1, %v6286_v54  ;;  %v5055_v44 = vadd.s32 4294967169, %v945_v26  ;;  %v521_v29 = vxor.u32 2147483648, %v5633_v3  ;;  %v618_v48 = vadd.s32 3, %v614_v35 }
  0x8c   : > { %v605_v39 = vand.u32 2147483647, %v604_v40  ;;  %vm516_vm7 = vcmp.lt.s32.totalorder %v515_v13, 2  ;;  %v518_v24 = vxor.u32 2147483648, %v5635_v25  ;;  %vm520_vm8 = vcmp.eq.s32.totalorder %v515_v13, 2 }
  0x8d   : > { %vm894_vm9 = vc.u32 %v6291_v14, %v6285_v23  ;;  %vm517_vm10 = vcmp.eq.s32.totalorder %v515_v13, 0  ;;  %v948_v6 = vand.u32 8388607, %v941_v62  ;;  %vm2180_vm11 = vcmp.eq.s32.totalorder %v6297_v31, 0 }
  0x8e   : > { %v608_v16 = vmul.f32 %v607_v59, %v605_v39  ;;  %v896_v49 = vsel %vm894_vm9, %v895_v43, %v6286_v54  ;;  %vm2183_vm12 = vcmp.eq.s32.totalorder %v6297_v31, 2  ;;  %v951_v47 = vadd.s32 1, %v5055_v44 }
  0x8f   : > { %v897_v37 = vadd.s32 %v896_v49, %v892_v41  ;;  %v522_v50 = vsel %vm520_vm8, %v521_v29, %v5635_v25  ;;  %v6309_v53 = vand.u32 3, %v618_v48  ;;  %v6311_v55 = vand.u32 3, %v614_v35 }
  0x90   : > { %v609_v20 = vxor.u32 2147483648, %v608_v16  ;;  %v519_v57 = vsel %vm517_vm10, %v5633_v3, %v518_v24  ;;  %vm952_vm0 = vcmp.gt.s32.totalorder %v951_v47, 0  ;;  %v949_v61 = vor.u32 8388608, %v948_v6 }
  0x91   : > { %v898_v28 = vadd.s32 536870912, %v897_v37  ;;  %v953_v4 = vsel %vm952_vm0, %v951_v47, 0  ;;  %v1045_v17 = vand.u32 2147483647, %v6314_v12  ;;  %vm2179_vm13 = vcmp.lt.s32.totalorder %v6297_v31, 2 }
  0x92   : > { %v610_v52 = vsel %vm527_vm15, %v609_v20, %v608_v16  ;;  %v955_v0 = vand.u32 31, %v953_v4  ;;  %v1048_v8 = vand.u32 2139095040, %v6314_v12  ;;  %v523_v9 = vsel %vm516_vm7, %v519_v57, %v522_v50 }
  0x93   : > { %v613_v51 = vsel %vm6264_vm1, %v5989_v56, %v610_v52  ;;  %v6321_v63 = vshrl.u32 %v898_v28, 30  ;;  %v2182_v42 = vsel %vm2180_vm11, %v5633_v3, %v518_v24  ;;  %v2185_v10 = vsel %vm2183_vm12, %v521_v29, %v5635_v25 }
  0x94   : > { %5636 = vcosq.f32 %v613_v51  ;;  %v6330_v11 = vadd.s32 %v6285_v23, %v6291_v14  ;;  %vm513_vm14 = vweird.f32 %v5910_v5  ;;  %v954_v18 = vshrl.u32 %v953_v4, 5 }
  0x95   : > { %5638 = vsinq.f32 %v613_v51  ;;  %v900_v27 = vshll.u32 %v6321_v63, 30  ;;  %v956_v22 = vsub.s32 32, %v955_v0  ;;  %v958_v7 = vshll.u32 %v5765_v30, %v955_v0 }
  0x96   : > { %v961_v19 = vshll.u32 %v5766_v32, %v955_v0  ;;  %v964_v1 = vshll.u32 %v5767_v34, %v955_v0  ;;  %v967_v21 = vshll.u32 %v5768_v36, %v955_v0  ;;  %v6338_v2 = vshll.u32 %v949_v61, 8 }
  0x97   : > { %vm624_vm15 = vcmp.eq.s32.totalorder %v6309_v53, 2  ;;  %vm2286_vm1 = vcmp.eq.s32.totalorder %v6311_v55, 2  ;;  %v6342_v23 = vsub.s32 %v897_v37, %v900_v27  ;;  %v959_v54 = vshrl.u32 %v5766_v32, %v956_v22 }
  0x98   : > { %v970_v58 = vshll.u32 %v5769_v38, %v955_v0  ;;  %v1049_v40 = vshrl.u32 %v1048_v8, 23  ;;  %vm621_vm2 = vcmp.eq.s32.totalorder %v6309_v53, 0  ;;  %vm2283_vm3 = vcmp.eq.s32.totalorder %v6311_v55, 0 }
  0x99   : > { %v957_v59 = vshrl.u32 %v5765_v30, %v956_v22  ;;  %v962_v15 = vshrl.u32 %v5767_v34, %v956_v22  ;;  %v965_v14 = vshrl.u32 %v5768_v36, %v956_v22  ;;  %v968_v3 = vshrl.u32 %v5769_v38, %v956_v22 }
  0x9a   : > { %vm620_vm4 = vcmp.lt.s32.totalorder %v6309_v53, 2  ;;  %vm2282_vm5 = vcmp.lt.s32.totalorder %v6311_v55, 2  ;;  %v903_v13 = vsub.s32 0, %v6342_v23  ;;  %v960_v35 = vor.u32 %v959_v54, %v958_v7 }
  0x9b   : > { %v971_v26 = vshrl.u32 %v5770_v46, %v956_v22  ;;  %vm973_vm6 = vcmp.lt.s32.totalorder %v954_v18, 1  ;;  %vm617_vm7 = vweird.f32 %v5989_v56  ;;  %v963_v25 = vor.u32 %v962_v15, %v961_v19 }
  0x9c   : > { %v966_v39 = vor.u32 %v965_v14, %v964_v1  ;;  %v969_v41 = vor.u32 %v968_v3, %v967_v21  ;;  %vm974_vm8 = vcmp.lt.s32.totalorder %v954_v18, 2  ;;  %v5052_v43 = vmin.u32 %v903_v13, %v6342_v23 }
  0x9d   : > { %v972_v44 = vor.u32 %v971_v26, %v970_v58  ;;  %vm975_vm9 = vcmp.lt.s32.totalorder %v954_v18, 3  ;;  %vm976_vm10 = vcmp.lt.s32.totalorder %v954_v18, 4  ;;  %v977_v29 = vsel %vm973_vm6, %v957_v59, %v960_v35 }
  0x9e   : > { %v978_v16 = vsel %vm976_vm10, %v966_v39, 2102212464  ;;  %v981_v48 = vsel %vm973_vm6, %v960_v35, %v963_v25  ;;  %v982_v24 = vsel %vm976_vm10, %v969_v41, 920167782  ;;  %v905_v20 = vclz %v5052_v43 }
  0x9f   : > { %v979_v49 = vsel %vm975_vm9, %v963_v25, %v978_v16  ;;  %v983_v6 = vsel %vm975_vm9, %v966_v39, %v982_v24  ;;  %v985_v37 = vsel %vm973_vm6, %v963_v25, %v966_v39  ;;  %v2186_v47 = vsel %vm2179_vm13, %v2182_v42, %v2185_v10 }
  0xa0   : > { %v980_v50 = vsel %vm974_vm8, %v977_v29, %v979_v49  ;;  %v984_v52 = vsel %vm974_vm8, %v981_v48, %v983_v6  ;;  %v986_v57 = vsel %vm976_vm10, %v972_v44, 1326507024  ;;  %v5053_v28 = vadd.s32 4294967294, %v905_v20  ;;  %v6408_v29 = vld [vmem:[%s5899_s15 + $0x38] sm:$0xff] }
  0xa1   : > { %v5637_v51 = vpop.eup %5636  ;;  %v987_v61 = vsel %vm975_vm9, %v969_v41, %v986_v57  ;;  %v6369_v4 = vmul.u32.u64.low %v6338_v2, %v984_v52  ;;  %v6370_v0 = vmul.u32.u64.high %v6338_v2, %v984_v52, %v6369_v4  ;;  %v524_v27 = vsel %vm513_vm14, nan, %v523_v9 }
  0xa2   : > { %v5639_v8 = vpop.eup %5638  ;;  %v625_v31 = vxor.u32 2147483648, %v5637_v51  ;;  %v988_v42 = vsel %vm974_vm8, %v985_v37, %v987_v61  ;;  %v5059_v10 = vadd.s32 4294967169, %v1049_v40  ;;  %vm5054_vm11 = vcmp.lt.s32.totalorder %v5053_v28, 0 }
  0xa3   : > { %v622_v22 = vxor.u32 2147483648, %v5639_v8  ;;  %v6377_v7 = vmul.u32.u64.low %v6338_v2, %v988_v42  ;;  %v6378_v19 = vmul.u32.u64.high %v6338_v2, %v988_v42, %v6377_v7  ;;  %v908_v54 = vsel %vm5054_vm11, 0, %v5053_v28 }
  0xa4   : > { %v626_v1 = vsel %vm624_vm15, %v625_v31, %v5639_v8  ;;  %v2288_v21 = vsel %vm2286_vm1, %v625_v31, %v5639_v8  ;;  %v996_v58 = vmul.u32 %v6338_v2, %v980_v50  ;;  %v909_v40 = vsub.s32 32, %v908_v54 }
  0xa5   : > { %v623_v9 = vsel %vm621_vm2, %v5637_v51, %v622_v22  ;;  %v2285_v18 = vsel %vm2283_vm3, %v5637_v51, %v622_v22  ;;  %v910_v59 = vshll.u32 %v6342_v23, %v908_v54  ;;  %v913_v3 = vsub.s32 4294967266, %v908_v54 }
  0xa6   : > { %v627_v15 = vsel %vm620_vm4, %v623_v9, %v626_v1  ;;  %v2289_v14 = vsel %vm2282_vm5, %v2285_v18, %v2288_v21  ;;  %v999_v13 = vadd.s32 1, %v6370_v0  ;;  %v2187_v35 = vsel %vm513_vm14, nan, %v2186_v47 }
  0xa7   : > { %v628_v2 = vsel %vm617_vm7, nan, %v627_v15  ;;  %v2290_v26 = vsel %vm617_vm7, nan, %v2289_v14  ;;  %v911_v23 = vshrl.u32 %v6330_v11, %v909_v40  ;;  %v914_v25 = vadd.s32 127, %v913_v3 }
  0xa8   : > { %v5517_v53 = vpack.i.bf16 %v628_v2, %v524_v27  ;;  %vm998_vm12 = vc.u32 %v6378_v19, %v6369_v4  ;;  %v923_v39 = vsub.s32 4, %v6321_v63  ;;  %v5522_v43 = vpack.i.bf16 %v2290_v26, %v2187_v35 }
  0xa9   : > { %v912_v55 = vor.u32 %v911_v23, %v910_v59  ;;  %v1000_v41 = vsel %vm998_vm12, %v999_v13, %v6370_v0  ;;  %v915_v5 = vshll.u32 %v914_v25, 23  ;;  %v1055_v56 = vadd.s32 1, %v5059_v10 }
  0xaa   : > { %5518 = vrot.lane.b32.xlu0 %v5517_v53, %s5771_s16  ;;  %v1001_v44 = vadd.s32 %v1000_v41, %v996_v58  ;;  %v1052_v11 = vand.u32 8388607, %v1045_v17  ;;  %vm839_vm13 = vcmp.lt.s32.totalorder %v6191_v33, 0  ;;  %v1152_v49 = vand.u32 2139095040, %v6408_v29 }
  0xab   : > { %v916_v16 = vor.u32 4788187, %v915_v5  ;;  %v919_v48 = vcvt.s32.f32 %v912_v55  ;;  %vm1056_vm0 = vcmp.gt.s32.totalorder %v1055_v56, 0  ;;  %v924_v37 = vsel %vm839_vm13, %v923_v39, %v6321_v63 }
  0xac   : > { %v1002_v24 = vadd.s32 536870912, %v1001_v44  ;;  %v1057_v20 = vsel %vm1056_vm0, %v1055_v56, 0  ;;  %vm6420_vm14 = vcmp.le.f32.partialorder %v837_v45, 0.7853982  ;;  %vm943_vm15 = vcmp.lt.s32.totalorder %v6272_v60, 0 }
  0xad   : > { %v917_v6 = vand.u32 2147483647, %v916_v16  ;;  %v1059_v50 = vand.u32 31, %v1057_v20  ;;  %vm6427_vm1 = vcmp.le.f32.partialorder %v941_v62, 0.7853982  ;;  %v1053_v61 = vor.u32 8388608, %v1052_v11 }
  0xae   : > { %5523 = vrot.lane.b32.xlu0 %v5522_v43, %s5772_s17  ;;  %v1003_v47 = vshrl.u32 %v1002_v24, 30  ;;  %v6433_v0 = vsel %vm6420_vm14, 0, %v924_v37  ;;  %v1149_v8 = vand.u32 2147483647, %v6408_v29  ;;  %v1153_v27 = vshrl.u32 %v1152_v49, 23 }
  0xaf   : > { %v920_v57 = vmul.f32 %v919_v48, %v917_v6  ;;  %v1060_v63 = vsub.s32 32, %v1059_v50  ;;  %v1062_v10 = vshll.u32 %v5765_v30, %v1059_v50  ;;  %v1065_v62 = vshll.u32 %v5766_v32, %v1059_v50 }
  0xb0   : > { %v1004_v28 = vshll.u32 %v1003_v47, 30  ;;  %v1027_v45 = vsub.s32 4, %v1003_v47  ;;  %v1068_v1 = vshll.u32 %v5767_v34, %v1059_v50  ;;  %v1058_v9 = vshrl.u32 %v1057_v20, 5 }
  0xb1   : > { %v921_v31 = vxor.u32 2147483648, %v920_v57  ;;  %v1063_v22 = vshrl.u32 %v5766_v32, %v1060_v63  ;;  %v1066_v7 = vshrl.u32 %v5767_v34, %v1060_v63  ;;  %v1069_v21 = vshrl.u32 %v5768_v36, %v1060_v63 }
  0xb2   : > { %v1005_v42 = vsub.s32 %v1001_v44, %v1004_v28  ;;  %v6444_v18 = vshll.u32 %v1053_v61, 8  ;;  %v997_v40 = vadd.s32 %v6369_v4, %v6378_v19  ;;  %v930_v59 = vadd.s32 3, %v6433_v0 }
  0xb3   : > { %v922_v54 = vsel %vm839_vm13, %v921_v31, %v920_v57  ;;  %v1071_v15 = vshll.u32 %v5768_v36, %v1059_v50  ;;  %v5063_v14 = vadd.s32 4294967169, %v1153_v27  ;;  %v1028_v2 = vsel %vm943_vm15, %v1027_v45, %v1003_v47 }
  0xb4   : > { %v1007_v58 = vsub.s32 0, %v1005_v42  ;;  %v925_v3 = vsel %vm6420_vm14, %v6191_v33, %v922_v54  ;;  %v1061_v35 = vshrl.u32 %v5765_v30, %v1060_v63  ;;  %v1064_v26 = vor.u32 %v1063_v22, %v1062_v10 }
  0xb5   : > { %v1067_v23 = vor.u32 %v1066_v7, %v1065_v62  ;;  %v1070_v53 = vor.u32 %v1069_v21, %v1068_v1  ;;  %v1072_v4 = vshrl.u32 %v5769_v38, %v1060_v63  ;;  %v1074_v25 = vshll.u32 %v5769_v38, %v1059_v50 }
  0xb6   : > { %v5056_v13 = vmin.u32 %v1007_v58, %v1005_v42  ;;  %v1075_v55 = vshrl.u32 %v5770_v46, %v1060_v63  ;;  %vm1077_vm2 = vcmp.lt.s32.totalorder %v1058_v9, 1  ;;  %5640 = vcosq.f32 %v925_v3 }
  0xb7   : > { %v1030_v39 = vsel %vm6427_vm1, 0, %v1028_v2  ;;  %v1073_v41 = vor.u32 %v1072_v4, %v1071_v15  ;;  %v1156_v43 = vand.u32 8388607, %v1149_v8  ;;  %vm1078_vm3 = vcmp.lt.s32.totalorder %v1058_v9, 2 }
  0xb8   : > { %v1009_v19 = vclz %v5056_v13  ;;  %v1076_v44 = vor.u32 %v1075_v55, %v1074_v25  ;;  %vm1079_vm4 = vcmp.lt.s32.totalorder %v1058_v9, 3  ;;  %vm1080_vm5 = vcmp.lt.s32.totalorder %v1058_v9, 4 }
  0xb9   : > { %v1081_v56 = vsel %vm1077_vm2, %v1061_v35, %v1064_v26  ;;  %v1085_v11 = vsel %vm1077_vm2, %v1064_v26, %v1067_v23  ;;  %v1089_v16 = vsel %vm1077_vm2, %v1067_v23, %v1070_v53  ;;  %v1082_v48 = vsel %vm1080_vm5, %v1070_v53, 2102212464 }
  0xba   : > { %v5057_v5 = vadd.s32 4294967294, %v1009_v19  ;;  %v1086_v24 = vsel %vm1080_vm5, %v1073_v41, 920167782  ;;  %v1159_v20 = vadd.s32 1, %v5063_v14  ;;  %v1083_v6 = vsel %vm1079_vm4, %v1067_v23, %v1082_v48 }
  0xbb   : > { %v1087_v37 = vsel %vm1079_vm4, %v1070_v53, %v1086_v24  ;;  %v1090_v47 = vsel %vm1080_vm5, %v1076_v44, 1326507024  ;;  %5642 = vsinq.f32 %v925_v3  ;;  %v1084_v28 = vsel %vm1078_vm3, %v1081_v56, %v1083_v6 }
  0xbc   : > { %vm5058_vm6 = vcmp.lt.s32.totalorder %v5057_v5, 0  ;;  %v1088_v61 = vsel %vm1078_vm3, %v1085_v11, %v1087_v37  ;;  %v1091_v63 = vsel %vm1079_vm4, %v1073_v41, %v1090_v47  ;;  %vm1160_vm7 = vcmp.gt.s32.totalorder %v1159_v20, 0 }
  0xbd   : > { %v1012_v49 = vsel %vm5058_vm6, 0, %v5057_v5  ;;  %v1092_v31 = vsel %vm1078_vm3, %v1089_v16, %v1091_v63  ;;  %v1161_v10 = vsel %vm1160_vm7, %v1159_v20, 0  ;;  %v6479_v54 = vand.u32 3, %v6433_v0  ;;  %v6491_v0 = vld [vmem:[%s5899_s15 + $0x40] sm:$0xff] }
  0xbe   : > { %v1013_v50 = vsub.s32 32, %v1012_v49  ;;  %v1014_v52 = vshll.u32 %v1005_v42, %v1012_v49  ;;  %v1017_v57 = vsub.s32 4294967266, %v1012_v49  ;;  %v1163_v58 = vand.u32 31, %v1161_v10 }
  0xbf   : > { %v6470_v62 = vmul.u32.u64.low %v6444_v18, %v1092_v31  ;;  %v6471_v22 = vmul.u32.u64.high %v6444_v18, %v1092_v31, %v6470_v62  ;;  %v6474_v7 = vmul.u32.u64.low %v6444_v18, %v1088_v61  ;;  %v6475_v42 = vmul.u32.u64.high %v6444_v18, %v1088_v61, %v6474_v7 }
  0xc0   : > { %v1015_v45 = vshrl.u32 %v997_v40, %v1013_v50  ;;  %v1018_v27 = vadd.s32 127, %v1017_v57  ;;  %v6481_v40 = vand.u32 3, %v930_v59  ;;  %v1034_v9 = vadd.s32 3, %v1030_v39 }
  0xc1   : > { %v1100_v3 = vmul.u32 %v6444_v18, %v1084_v28  ;;  %vm1102_vm8 = vc.u32 %v6471_v22, %v6474_v7  ;;  %v1103_v13 = vadd.s32 1, %v6475_v42  ;;  %v1157_v2 = vor.u32 8388608, %v1156_v43 }
  0xc2   : > { %v1016_v1 = vor.u32 %v1015_v45, %v1014_v52  ;;  %v1019_v21 = vshll.u32 %v1018_v27, 23  ;;  %v1164_v35 = vsub.s32 32, %v1163_v58  ;;  %vm2595_vm9 = vcmp.eq.s32.totalorder %v6479_v54, 2 }
  0xc3   : > { %v6487_v26 = vpop.eup %5640  ;;  %v6493_v59 = vand.u32 3, %v1030_v39  ;;  %vm936_vm10 = vcmp.eq.s32.totalorder %v6481_v40, 2  ;;  %v6496_v53 = vand.u32 3, %v1034_v9  ;;  %v1104_v18 = vsel %vm1102_vm8, %v1103_v13, %v6475_v42 }
  0xc4   : > { %v1020_v15 = vor.u32 4788187, %v1019_v21  ;;  %v1023_v14 = vcvt.s32.f32 %v1016_v1  ;;  %v1253_v4 = vand.u32 2147483647, %v6491_v0  ;;  %v1105_v25 = vadd.s32 %v1104_v18, %v1100_v3 }
  0xc5   : > { %v6500_v55 = vshrl.u32 %v1161_v10, 5  ;;  %v1166_v41 = vshll.u32 %v5765_v30, %v1163_v58  ;;  %v1167_v43 = vshrl.u32 %v5766_v32, %v1164_v35  ;;  %v1169_v5 = vshll.u32 %v5766_v32, %v1163_v58 }
  0xc6   : > { %v1021_v23 = vand.u32 2147483647, %v1020_v15  ;;  %v6505_v39 = vshll.u32 %v1157_v2, 8  ;;  %v1256_v44 = vand.u32 2139095040, %v6491_v0  ;;  %vm2592_vm11 = vcmp.eq.s32.totalorder %v6479_v54, 0 }
  0xc7   : > { %vm933_vm12 = vcmp.eq.s32.totalorder %v6481_v40, 0  ;;  %v1106_v11 = vadd.s32 536870912, %v1105_v25  ;;  %v1170_v16 = vshrl.u32 %v5767_v34, %v1164_v35  ;;  %v1172_v48 = vshll.u32 %v5767_v34, %v1163_v58 }
  0xc8   : > { %v1024_v19 = vmul.f32 %v1023_v14, %v1021_v23  ;;  %v5643_v24 = vpop.eup %5642  ;;  %v937_v20 = vxor.u32 2147483648, %v6487_v26  ;;  %v1173_v49 = vshrl.u32 %v5768_v36, %v1164_v35  ;;  %v1175_v6 = vshll.u32 %v5768_v36, %v1163_v58 }
  0xc9   : > { %v1176_v37 = vshrl.u32 %v5769_v38, %v1164_v35  ;;  %v6518_v50 = vshrl.u32 %v1106_v11, 30  ;;  %v1168_v52 = vor.u32 %v1167_v43, %v1166_v41  ;;  %v1178_v57 = vshll.u32 %v5769_v38, %v1163_v58 }
  0xca   : > { %v1025_v56 = vxor.u32 2147483648, %v1024_v19  ;;  %vm2591_vm0 = vcmp.lt.s32.totalorder %v6479_v54, 2  ;;  %vm932_vm13 = vcmp.lt.s32.totalorder %v6481_v40, 2  ;;  %v1171_v61 = vor.u32 %v1170_v16, %v1169_v5 }
  0xcb   : > { %v1177_v63 = vor.u32 %v1176_v37, %v1175_v6  ;;  %v1179_v45 = vshrl.u32 %v5770_v46, %v1164_v35  ;;  %v1108_v27 = vshll.u32 %v6518_v50, 30  ;;  %v1174_v31 = vor.u32 %v1173_v49, %v1172_v48 }
  0xcc   : > { %v1026_v47 = vsel %vm943_vm15, %v1025_v56, %v1024_v19  ;;  %vm1181_vm14 = vcmp.lt.s32.totalorder %v6500_v55, 1  ;;  %v1165_v10 = vshrl.u32 %v5765_v30, %v1164_v35  ;;  %vm1183_vm15 = vcmp.lt.s32.totalorder %v6500_v55, 3 }
  0xcd   : > { %v1029_v28 = vsel %vm6427_vm1, %v6272_v60, %v1026_v47  ;;  %v1180_v62 = vor.u32 %v1179_v45, %v1178_v57  ;;  %vm929_vm1 = vweird.f32 %v6191_v33  ;;  %v934_v51 = vxor.u32 2147483648, %v5643_v24 }
  0xce   : > { %5644 = vcosq.f32 %v1029_v28  ;;  %v6532_v42 = vsub.s32 %v1105_v25, %v1108_v27  ;;  %vm1182_vm2 = vcmp.lt.s32.totalorder %v6500_v55, 2  ;;  %vm1184_vm3 = vcmp.lt.s32.totalorder %v6500_v55, 4 }
  0xcf   : > { %5646 = vsinq.f32 %v1029_v28  ;;  %v2597_v1 = vsel %vm2595_vm9, %v937_v20, %v5643_v24  ;;  %vm1047_vm4 = vcmp.lt.s32.totalorder %v6314_v12, 0  ;;  %v1186_v21 = vsel %vm1184_vm3, %v1174_v31, 2102212464 }
  0xd0   : > { %v1189_v58 = vsel %vm1181_vm14, %v1168_v52, %v1171_v61  ;;  %v1190_v9 = vsel %vm1184_vm3, %v1177_v63, 920167782  ;;  %v938_v15 = vsel %vm936_vm10, %v937_v20, %v5643_v24  ;;  %v1111_v14 = vsub.s32 0, %v6532_v42 }
  0xd1   : > { %v1191_v3 = vsel %vm1183_vm15, %v1174_v31, %v1190_v9  ;;  %v1193_v13 = vsel %vm1181_vm14, %v1171_v61, %v1174_v31  ;;  %v1185_v2 = vsel %vm1181_vm14, %v1165_v10, %v1168_v52  ;;  %v1187_v35 = vsel %vm1183_vm15, %v1171_v61, %v1186_v21 }
  0xd2   : > { %v1192_v23 = vsel %vm1182_vm2, %v1189_v58, %v1191_v3  ;;  %v1194_v18 = vsel %vm1184_vm3, %v1180_v62, 1326507024  ;;  %vm2695_vm5 = vcmp.eq.s32.totalorder %v6493_v59, 0  ;;  %vm6557_vm6 = vcmp.le.f32.partialorder %v1045_v17, 0.7853982 }
  0xd3   : > { %v5060_v25 = vmin.u32 %v1111_v14, %v6532_v42  ;;  %v1195_v41 = vsel %vm1183_vm15, %v1177_v63, %v1194_v18  ;;  %v6565_v43 = vmul.u32.u64.low %v6505_v39, %v1192_v23  ;;  %v6566_v5 = vmul.u32.u64.high %v6505_v39, %v1192_v23, %v6565_v43 }
  0xd4   : > { %v2594_v56 = vsel %vm2592_vm11, %v6487_v26, %v934_v51  ;;  %vm2694_vm7 = vcmp.lt.s32.totalorder %v6493_v59, 2  ;;  %v935_v17 = vsel %vm933_vm12, %v6487_v26, %v934_v51  ;;  %v1131_v11 = vsub.s32 4, %v6518_v50 }
  0xd5   : > { %v1196_v16 = vsel %vm1182_vm2, %v1193_v13, %v1195_v41  ;;  %vm1033_vm8 = vweird.f32 %v6272_v60  ;;  %v1113_v48 = vclz %v5060_v25  ;;  %v1188_v24 = vsel %vm1182_vm2, %v1185_v2, %v1187_v35 }
  0xd6   : > { %v6583_v20 = vmul.u32.u64.low %v6505_v39, %v1196_v16  ;;  %v6584_v49 = vmul.u32.u64.high %v6505_v39, %v1196_v16, %v6583_v20  ;;  %vm2698_vm9 = vcmp.eq.s32.totalorder %v6493_v59, 2  ;;  %vm1036_vm10 = vcmp.lt.s32.totalorder %v6496_v53, 2  ;;  %v6636_v59 = vld [vmem:[%s5899_s15 + $0x48] sm:$0xff] }
  0xd7   : > { %vm1037_vm11 = vcmp.eq.s32.totalorder %v6496_v53, 0  ;;  %v1257_v26 = vshrl.u32 %v1256_v44, 23  ;;  %v2598_v6 = vsel %vm2591_vm0, %v2594_v56, %v2597_v1  ;;  %v939_v55 = vsel %vm932_vm13, %v935_v17, %v938_v15 }
  0xd8   : > { %v5061_v37 = vadd.s32 4294967294, %v1113_v48  ;;  %v1207_v47 = vadd.s32 1, %v6566_v5  ;;  %vm1040_vm12 = vcmp.eq.s32.totalorder %v6496_v53, 2  ;;  %v1204_v52 = vmul.u32 %v6505_v39, %v1188_v24 }
  0xd9   : > { %v5067_v57 = vadd.s32 4294967169, %v1257_v26  ;;  %v6600_v28 = vand.u32 8388607, %v1253_v4  ;;  %v1101_v44 = vadd.s32 %v6474_v7, %v6471_v22  ;;  %v1132_v54 = vsel %vm1047_vm4, %v1131_v11, %v6518_v50 }
  0xda   : > { %vm5062_vm14 = vcmp.lt.s32.totalorder %v5061_v37, 0  ;;  %vm1206_vm0 = vc.u32 %v6584_v49, %v6565_v43  ;;  %v2599_v39 = vsel %vm929_vm1, nan, %v2598_v6  ;;  %v940_v61 = vsel %vm929_vm1, nan, %v939_v55 }
  0xdb   : > { %v5645_v40 = vpop.eup %5644  ;;  %v1116_v63 = vsel %vm5062_vm14, 0, %v5061_v37  ;;  %v1208_v45 = vsel %vm1206_vm0, %v1207_v47, %v6566_v5  ;;  %v6617_v62 = vsel %vm6557_vm6, 0, %v1132_v54  ;;  %v1263_v1 = vadd.s32 1, %v5067_v57 }
  0xdc   : > { %v5647_v27 = vpop.eup %5646  ;;  %v1041_v22 = vxor.u32 2147483648, %v5645_v40  ;;  %v1117_v7 = vsub.s32 32, %v1116_v63  ;;  %v1118_v31 = vshll.u32 %v6532_v42, %v1116_v63  ;;  %v1121_v10 = vsub.s32 4294967266, %v1116_v63 }
  0xdd   : > { %v1038_v50 = vxor.u32 2147483648, %v5647_v27  ;;  %v1209_v51 = vadd.s32 %v1208_v45, %v1204_v52  ;;  %vm1264_vm13 = vcmp.gt.s32.totalorder %v1263_v1, 0  ;;  %vm1151_vm15 = vcmp.lt.s32.totalorder %v6408_v29, 0 }
  0xde   : > { %v2700_v33 = vsel %vm2698_vm9, %v1041_v22, %v5647_v27  ;;  %v1042_v21 = vsel %vm1040_vm12, %v1041_v22, %v5647_v27  ;;  %v1119_v58 = vshrl.u32 %v1101_v44, %v1117_v7  ;;  %v1122_v9 = vadd.s32 127, %v1121_v10 }
  0xdf   : > { %v2697_v15 = vsel %vm2695_vm5, %v5645_v40, %v1038_v50  ;;  %v1039_v42 = vsel %vm1037_vm11, %v5645_v40, %v1038_v50  ;;  %v1210_v14 = vadd.s32 536870912, %v1209_v51  ;;  %v1265_v41 = vsel %vm1264_vm13, %v1263_v1, 0 }
  0xe0   : > { %v2701_v3 = vsel %vm2694_vm7, %v2697_v15, %v2700_v33  ;;  %v1043_v13 = vsel %vm1036_vm10, %v1039_v42, %v1042_v21  ;;  %v1120_v2 = vor.u32 %v1119_v58, %v1118_v31  ;;  %v1123_v35 = vshll.u32 %v1122_v9, 23 }
  0xe1   : > { %v2702_v23 = vsel %vm1033_vm8, nan, %v2701_v3  ;;  %v1044_v18 = vsel %vm1033_vm8, nan, %v1043_v13  ;;  %v1211_v25 = vshrl.u32 %v1210_v14, 30  ;;  %v1267_v48 = vand.u32 31, %v1265_v41 }
  0xe2   : > { %v5542_v5 = vpack.i.bf16 %v2702_v23, %v2599_v39  ;;  %v5537_v56 = vpack.i.bf16 %v1044_v18, %v940_v61  ;;  %v1124_v17 = vor.u32 4788187, %v1123_v35  ;;  %v1127_v11 = vcvt.s32.f32 %v1120_v2 }
  0xe3   : > { %v1212_v16 = vshll.u32 %v1211_v25, 30  ;;  %v6644_v60 = vadd.s32 3, %v6617_v62  ;;  %v1261_v20 = vor.u32 8388608, %v6600_v28  ;;  %v1268_v26 = vsub.s32 32, %v1267_v48 }
  0xe4   : > { %5543 = vrot.lane.b32.xlu1 %v5542_v5, %s5772_s17  ;;  %5538 = vrot.lane.b32.xlu0 %v5537_v56, %s5771_s16  ;;  %v1125_v53 = vand.u32 2147483647, %v1124_v17  ;;  %v1235_v55 = vsub.s32 4, %v1211_v25  ;;  %v1357_v37 = vand.u32 2147483647, %v6636_v59  ;;  %v1360_v47 = vand.u32 2139095040, %v6636_v59 }
  0xe5   : > { %v6641_v24 = vsub.s32 %v1209_v51, %v1212_v16  ;;  %v1270_v57 = vshll.u32 %v5765_v30, %v1267_v48  ;;  %v1273_v44 = vshll.u32 %v5766_v32, %v1267_v48  ;;  %v1276_v54 = vshll.u32 %v5767_v34, %v1267_v48 }
  0xe6   : > { %v1128_v6 = vmul.f32 %v1127_v11, %v1125_v53  ;;  %v1271_v39 = vshrl.u32 %v5766_v32, %v1268_v26  ;;  %v1274_v28 = vshrl.u32 %v5767_v34, %v1268_v26  ;;  %v1277_v61 = vshrl.u32 %v5768_v36, %v1268_v26 }
  0xe7   : > { %v1215_v52 = vsub.s32 0, %v6641_v24  ;;  %vm6658_vm1 = vcmp.le.f32.partialorder %v1149_v8, 0.7853982  ;;  %v1205_v45 = vadd.s32 %v6565_v43, %v6584_v49  ;;  %v1266_v22 = vshrl.u32 %v1265_v41, 5 }
  0xe8   : > { %v1129_v40 = vxor.u32 2147483648, %v1128_v6  ;;  %v6665_v7 = vshll.u32 %v1261_v20, 8  ;;  %v1236_v10 = vsel %vm1151_vm15, %v1235_v55, %v1211_v25  ;;  %v1361_v50 = vshrl.u32 %v1360_v47, 23 }
  0xe9   : > { %v5064_v27 = vmin.u32 %v1215_v52, %v6641_v24  ;;  %v6673_v8 = vand.u32 8388607, %v1357_v37  ;;  %v1269_v51 = vshrl.u32 %v5765_v30, %v1268_v26  ;;  %v1279_v1 = vshll.u32 %v5768_v36, %v1267_v48 }
  0xea   : > { %v1130_v31 = vsel %vm1047_vm4, %v1129_v40, %v1128_v6  ;;  %v1272_v33 = vor.u32 %v1271_v39, %v1270_v57  ;;  %v1275_v21 = vor.u32 %v1274_v28, %v1273_v44  ;;  %v1278_v58 = vor.u32 %v1277_v61, %v1276_v54 }
  0xeb   : > { %v1133_v43 = vsel %vm6557_vm6, %v6314_v12, %v1130_v31  ;;  %v1217_v49 = vclz %v5064_v27  ;;  %v1280_v15 = vshrl.u32 %v5769_v38, %v1268_v26  ;;  %v1282_v42 = vshll.u32 %v5769_v38, %v1267_v48  ;;  %v6711_v31 = vld [vmem:[%s5899_s15 + $0x50] sm:$0xff] }
  0xec   : > { %5648 = vcosq.f32 %v1133_v43  ;;  %v1283_v14 = vshrl.u32 %v5770_v46, %v1268_v26  ;;  %vm1285_vm2 = vcmp.lt.s32.totalorder %v1266_v22, 1  ;;  %vm1286_vm3 = vcmp.lt.s32.totalorder %v1266_v22, 2 }
  0xed   : > { %5650 = vsinq.f32 %v1133_v43  ;;  %v5065_v9 = vadd.s32 4294967294, %v1217_v49  ;;  %vm1287_vm4 = vcmp.lt.s32.totalorder %v1266_v22, 3  ;;  %v1281_v19 = vor.u32 %v1280_v15, %v1279_v1 }
  0xee   : > { %vm1288_vm6 = vcmp.lt.s32.totalorder %v1266_v22, 4  ;;  %v1289_v3 = vsel %vm1285_vm2, %v1269_v51, %v1272_v33  ;;  %v1284_v2 = vor.u32 %v1283_v14, %v1282_v42  ;;  %v1293_v23 = vsel %vm1285_vm2, %v1272_v33, %v1275_v21 }
  0xef   : > { %vm5066_vm5 = vcmp.lt.s32.totalorder %v5065_v9, 0  ;;  %v1290_v35 = vsel %vm1288_vm6, %v1278_v58, 2102212464  ;;  %v1238_v56 = vsel %vm6658_vm1, 0, %v1236_v10  ;;  %v1294_v17 = vsel %vm1288_vm6, %v1281_v19, 920167782 }
  0xf0   : > { %v1220_v13 = vsel %vm5066_vm5, 0, %v5065_v9  ;;  %v1291_v5 = vsel %vm1287_vm4, %v1275_v21, %v1290_v35  ;;  %v1297_v11 = vsel %vm1285_vm2, %v1275_v21, %v1278_v58  ;;  %v1298_v16 = vsel %vm1288_vm6, %v1284_v2, 1326507024 }
  0xf1   : > { %v1221_v18 = vsub.s32 32, %v1220_v13  ;;  %v1222_v25 = vshll.u32 %v6641_v24, %v1220_v13  ;;  %v1225_v41 = vsub.s32 4294967266, %v1220_v13  ;;  %v1295_v20 = vsel %vm1287_vm4, %v1278_v58, %v1294_v17 }
  0xf2   : > { %v1299_v26 = vsel %vm1287_vm4, %v1281_v19, %v1298_v16  ;;  %v1292_v6 = vsel %vm1286_vm3, %v1289_v3, %v1291_v5  ;;  %v1296_v24 = vsel %vm1286_vm3, %v1293_v23, %v1295_v20  ;;  %v5071_v47 = vadd.s32 4294967169, %v1361_v50 }
  0xf3   : > { %v1223_v48 = vshrl.u32 %v1205_v45, %v1221_v18  ;;  %v1226_v53 = vadd.s32 127, %v1225_v41  ;;  %v1300_v55 = vsel %vm1286_vm3, %v1297_v11, %v1299_v26  ;;  %v6705_v27 = vand.u32 3, %v6617_v62 }
  0xf4   : > { %v6696_v44 = vmul.u32.u64.low %v6665_v7, %v1300_v55  ;;  %v6697_v54 = vmul.u32.u64.high %v6665_v7, %v1300_v55, %v6696_v44  ;;  %v6700_v40 = vmul.u32.u64.low %v6665_v7, %v1296_v24  ;;  %v6701_v39 = vmul.u32.u64.high %v6665_v7, %v1296_v24, %v6700_v40 }
  0xf5   : > { %v1224_v52 = vor.u32 %v1223_v48, %v1222_v25  ;;  %v1227_v57 = vshll.u32 %v1226_v53, 23  ;;  %v1367_v28 = vadd.s32 1, %v5071_v47  ;;  %v6708_v22 = vand.u32 3, %v6644_v60 }
  0xf6   : > { %v1242_v10 = vadd.s32 3, %v1238_v56  ;;  %v1308_v50 = vmul.u32 %v6665_v7, %v1292_v6  ;;  %vm1310_vm8 = vc.u32 %v6697_v54, %v6700_v40  ;;  %v1365_v51 = vor.u32 8388608, %v6673_v8 }
  0xf7   : > { %v1228_v61 = vor.u32 4788187, %v1227_v57  ;;  %v1231_v45 = vcvt.s32.f32 %v1224_v52  ;;  %vm1368_vm7 = vcmp.gt.s32.totalorder %v1367_v28, 0  ;;  %v1311_v21 = vadd.s32 1, %v6701_v39 }
  0xf8   : > { %v1369_v1 = vsel %vm1368_vm7, %v1367_v28, 0  ;;  %v1464_v58 = vand.u32 2139095040, %v6711_v31  ;;  %vm2798_vm9 = vcmp.eq.s32.totalorder %v6705_v27, 0  ;;  %vm2801_vm10 = vcmp.eq.s32.totalorder %v6705_v27, 2 }
  0xf9   : > { %v5649_v43 = vpop.eup %5648  ;;  %v1229_v49 = vand.u32 2147483647, %v1228_v61  ;;  %v1371_v60 = vand.u32 31, %v1369_v1  ;;  %vm1141_vm11 = vcmp.eq.s32.totalorder %v6708_v22, 0  ;;  %v6722_v7 = vand.u32 3, %v1238_v56 }
  0xfa   : > { %v5651_v33 = vpop.eup %5650  ;;  %v1145_v62 = vxor.u32 2147483648, %v5649_v43  ;;  %vm1144_vm12 = vcmp.eq.s32.totalorder %v6708_v22, 2  ;;  %v1312_v8 = vsel %vm1310_vm8, %v1311_v21, %v6701_v39  ;;  %v6726_v14 = vand.u32 3, %v1242_v10 }
  0xfb   : > { %v1232_v9 = vmul.f32 %v1231_v45, %v1229_v49  ;;  %v1372_v15 = vsub.s32 32, %v1371_v60  ;;  %v1313_v19 = vadd.s32 %v1312_v8, %v1308_v50  ;;  %v6728_v3 = vshll.u32 %v1365_v51, 8 }
  0xfc   : > { %v1142_v13 = vxor.u32 2147483648, %v5651_v33  ;;  %vm2797_vm14 = vcmp.lt.s32.totalorder %v6705_v27, 2  ;;  %v2803_v2 = vsel %vm2801_vm10, %v1145_v62, %v5651_v33  ;;  %v1370_v35 = vshrl.u32 %v1369_v1, 5 }
  0xfd   : > { %v1233_v42 = vxor.u32 2147483648, %v1232_v9  ;;  %v1465_v23 = vshrl.u32 %v1464_v58, 23  ;;  %vm1140_vm0 = vcmp.lt.s32.totalorder %v6708_v22, 2  ;;  %v1146_v25 = vsel %vm1144_vm12, %v1145_v62, %v5651_v33 }
  0xfe   : > { %v1314_v41 = vadd.s32 536870912, %v1313_v19  ;;  %v1374_v5 = vshll.u32 %v5765_v30, %v1371_v60  ;;  %v1375_v17 = vshrl.u32 %v5766_v32, %v1372_v15  ;;  %v1377_v11 = vshll.u32 %v5766_v32, %v1371_v60 }
  0xff   : > { %v1234_v18 = vsel %vm1151_vm15, %v1233_v42, %v1232_v9  ;;  %v1378_v16 = vshrl.u32 %v5767_v34, %v1372_v15  ;;  %v1380_v53 = vshll.u32 %v5767_v34, %v1371_v60  ;;  %v1381_v20 = vshrl.u32 %v5768_v36, %v1372_v15 }
 0x100   : > { %v1237_v56 = vsel %vm6658_vm1, %v6408_v29, %v1234_v18  ;;  %v6741_v48 = vshrl.u32 %v1314_v41, 30  ;;  %v2800_v26 = vsel %vm2798_vm9, %v5649_v43, %v1142_v13  ;;  %v1373_v63 = vshrl.u32 %v5765_v30, %v1372_v15 }
 0x101   : > { %5652 = vcosq.f32 %v1237_v56  ;;  %v1383_v6 = vshll.u32 %v5768_v36, %v1371_v60  ;;  %vm1137_vm13 = vweird.f32 %v6314_v12  ;;  %v1376_v55 = vor.u32 %v1375_v17, %v1374_v5 }
 0x102   : > { %5654 = vsinq.f32 %v1237_v56  ;;  %v1316_v24 = vshll.u32 %v6741_v48, 30  ;;  %v1379_v47 = vor.u32 %v1378_v16, %v1377_v11  ;;  %v1384_v52 = vshrl.u32 %v5769_v38, %v1372_v15 }
 0x103   : > { %v1382_v57 = vor.u32 %v1381_v20, %v1380_v53  ;;  %v1386_v44 = vshll.u32 %v5769_v38, %v1371_v60  ;;  %v1387_v39 = vshrl.u32 %v5770_v46, %v1372_v15  ;;  %vm1389_vm15 = vcmp.lt.s32.totalorder %v1370_v35, 1 }
 0x104   : > { %v1143_v28 = vsel %vm1141_vm11, %v5649_v43, %v1142_v13  ;;  %v6756_v61 = vsub.s32 %v1313_v19, %v1316_v24  ;;  %v1385_v45 = vor.u32 %v1384_v52, %v1383_v6  ;;  %vm1391_vm1 = vcmp.lt.s32.totalorder %v1370_v35, 3 }
 0x105   : > { %v1388_v10 = vor.u32 %v1387_v39, %v1386_v44  ;;  %vm1390_vm2 = vcmp.lt.s32.totalorder %v1370_v35, 2  ;;  %vm1392_vm3 = vcmp.lt.s32.totalorder %v1370_v35, 4  ;;  %v1393_v50 = vsel %vm1389_vm15, %v1373_v63, %v1376_v55 }
 0x106   : > { %vm2901_vm4 = vcmp.eq.s32.totalorder %v6722_v7, 0  ;;  %v1319_v49 = vsub.s32 0, %v6756_v61  ;;  %v1394_v51 = vsel %vm1392_vm3, %v1382_v57, 2102212464  ;;  %v1397_v1 = vsel %vm1389_vm15, %v1376_v55, %v1379_v47 }
 0x107   : > { %v1398_v33 = vsel %vm1392_vm3, %v1385_v45, 920167782  ;;  %vm2900_vm5 = vcmp.lt.s32.totalorder %v6722_v7, 2  ;;  %v1395_v43 = vsel %vm1391_vm1, %v1379_v47, %v1394_v51  ;;  %v1401_v21 = vsel %vm1389_vm15, %v1379_v47, %v1382_v57 }
 0x108   : > { %v1399_v62 = vsel %vm1391_vm1, %v1382_v57, %v1398_v33  ;;  %v1402_v60 = vsel %vm1392_vm3, %v1388_v10, 1326507024  ;;  %vm1241_vm6 = vweird.f32 %v6408_v29  ;;  %v2804_v58 = vsel %vm2797_vm14, %v2800_v26, %v2803_v2 }
 0x109   : > { %v5068_v9 = vmin.u32 %v1319_v49, %v6756_v61  ;;  %v1400_v8 = vsel %vm1390_vm2, %v1397_v1, %v1399_v62  ;;  %v1403_v15 = vsel %vm1391_vm1, %v1385_v45, %v1402_v60  ;;  %v1147_v42 = vsel %vm1140_vm0, %v1143_v28, %v1146_v25 }
 0x10a   : > { %v1404_v19 = vsel %vm1390_vm2, %v1401_v21, %v1403_v15  ;;  %v6776_v13 = vmul.u32.u64.low %v6728_v3, %v1400_v8  ;;  %v6777_v18 = vmul.u32.u64.high %v6728_v3, %v1400_v8, %v6776_v13  ;;  %v1396_v27 = vsel %vm1390_vm2, %v1393_v50, %v1395_v43 }
 0x10b   : > { %v1321_v41 = vclz %v5068_v9  ;;  %v6782_v2 = vmul.u32.u64.low %v6728_v3, %v1404_v19  ;;  %v6783_v5 = vmul.u32.u64.high %v6728_v3, %v1404_v19, %v6782_v2  ;;  %vm2904_vm7 = vcmp.eq.s32.totalorder %v6722_v7, 2 }
 0x10c   : > { %vm1244_vm8 = vcmp.lt.s32.totalorder %v6726_v14, 2  ;;  %vm1245_vm9 = vcmp.eq.s32.totalorder %v6726_v14, 0  ;;  %v5075_v22 = vadd.s32 4294967169, %v1465_v23  ;;  %vm1248_vm10 = vcmp.eq.s32.totalorder %v6726_v14, 2 }
 0x10d   : > { %v1309_v25 = vadd.s32 %v6700_v40, %v6697_v54  ;;  %v5069_v56 = vadd.s32 4294967294, %v1321_v41  ;;  %v1461_v35 = vand.u32 2147483647, %v6711_v31  ;;  %v2805_v11 = vsel %vm1137_vm13, nan, %v2804_v58  ;;  %v6843_v41 = vld [vmem:[%s5899_s15 + $0x58] sm:$0xff] }
 0x10e   : > { %v5653_v17 = vpop.eup %5652  ;;  %v1148_v16 = vsel %vm1137_vm13, nan, %v1147_v42  ;;  %v1412_v53 = vmul.u32 %v6728_v3, %v1396_v27  ;;  %v1415_v20 = vadd.s32 1, %v6777_v18  ;;  %v1339_v63 = vsub.s32 4, %v6741_v48 }
 0x10f   : > { %v5655_v23 = vpop.eup %5654  ;;  %v1249_v26 = vxor.u32 2147483648, %v5653_v17  ;;  %vm5070_vm11 = vcmp.lt.s32.totalorder %v5069_v56, 0  ;;  %vm1414_vm12 = vc.u32 %v6783_v5, %v6776_v13  ;;  %v1471_v24 = vadd.s32 1, %v5075_v22 }
 0x110   : > { %v1246_v54 = vxor.u32 2147483648, %v5655_v23  ;;  %v1324_v40 = vsel %vm5070_vm11, 0, %v5069_v56  ;;  %v1416_v6 = vsel %vm1414_vm12, %v1415_v20, %v6777_v18  ;;  %vm1255_vm14 = vcmp.lt.s32.totalorder %v6491_v0, 0 }
 0x111   : > { %v2906_v12 = vsel %vm2904_vm7, %v1249_v26, %v5655_v23  ;;  %v1250_v3 = vsel %vm1248_vm10, %v1249_v26, %v5655_v23  ;;  %v1325_v55 = vsub.s32 32, %v1324_v40  ;;  %v1326_v47 = vshll.u32 %v6756_v61, %v1324_v40 }
 0x112   : > { %v2903_v52 = vsel %vm2901_vm4, %v5653_v17, %v1246_v54  ;;  %v1247_v57 = vsel %vm1245_vm9, %v5653_v17, %v1246_v54  ;;  %v1329_v44 = vsub.s32 4294967266, %v1324_v40  ;;  %v1417_v39 = vadd.s32 %v1416_v6, %v1412_v53 }
 0x113   : > { %v2907_v28 = vsel %vm2900_vm5, %v2903_v52, %v2906_v12  ;;  %v1251_v45 = vsel %vm1244_vm8, %v1247_v57, %v1250_v3  ;;  %v1327_v10 = vshrl.u32 %v1309_v25, %v1325_v55  ;;  %v1468_v7 = vand.u32 8388607, %v1461_v35 }
 0x114   : > { %v2908_v61 = vsel %vm1241_vm6, nan, %v2907_v28  ;;  %v1252_v50 = vsel %vm1241_vm6, nan, %v1251_v45  ;;  %v1330_v49 = vadd.s32 127, %v1329_v44  ;;  %v1418_v51 = vadd.s32 536870912, %v1417_v39 }
 0x115   : > { %v5552_v1 = vpack.i.bf16 %v2908_v61, %v2805_v11  ;;  %v5547_v33 = vpack.i.bf16 %v1252_v50, %v1148_v16  ;;  %v1328_v43 = vor.u32 %v1327_v10, %v1326_v47  ;;  %v1340_v14 = vsel %vm1255_vm14, %v1339_v63, %v6741_v48 }
 0x116   : > { %v1331_v62 = vshll.u32 %v1330_v49, 23  ;;  %v6825_v21 = vshrl.u32 %v1418_v51, 30  ;;  %vm1472_vm0 = vcmp.gt.s32.totalorder %v1471_v24, 0  ;;  %vm6831_vm13 = vcmp.le.f32.partialorder %v1253_v4, 0.7853982 }
 0x117   : > { %5553 = vrot.lane.b32.xlu1 %v5552_v1, %s5772_s17  ;;  %5548 = vrot.lane.b32.xlu0 %v5547_v33, %s5771_s16  ;;  %v1473_v29 = vsel %vm1472_vm0, %v1471_v24, 0  ;;  %v1335_v9 = vcvt.s32.f32 %v1328_v43  ;;  %v6838_v48 = vsel %vm6831_vm13, 0, %v1340_v14  ;;  %v1469_v15 = vor.u32 8388608, %v1468_v7 }
 0x118   : > { %v1332_v58 = vor.u32 4788187, %v1331_v62  ;;  %v1420_v8 = vshll.u32 %v6825_v21, 30  ;;  %v1475_v42 = vand.u32 31, %v1473_v29  ;;  %v1565_v4 = vand.u32 2147483647, %v6843_v41 }
 0x119   : > { %v1413_v22 = vadd.s32 %v6776_v13, %v6783_v5  ;;  %v6850_v56 = vadd.s32 3, %v6838_v48  ;;  %v1474_v17 = vshrl.u32 %v1473_v29, 5  ;;  %v6854_v53 = vshll.u32 %v1469_v15, 8 }
 0x11a   : > { %v1333_v19 = vand.u32 2147483647, %v1332_v58  ;;  %v6840_v18 = vsub.s32 %v1417_v39, %v1420_v8  ;;  %v1476_v27 = vsub.s32 32, %v1475_v42  ;;  %v1478_v11 = vshll.u32 %v5765_v30, %v1475_v42 }
 0x11b   : > { %v1481_v26 = vshll.u32 %v5766_v32, %v1475_v42  ;;  %v1443_v13 = vsub.s32 4, %v6825_v21  ;;  %v1484_v5 = vshll.u32 %v5767_v34, %v1475_v42  ;;  %v1568_v54 = vand.u32 2139095040, %v6843_v41 }
 0x11c   : > { %v1336_v2 = vmul.f32 %v1335_v9, %v1333_v19  ;;  %v1423_v25 = vsub.s32 0, %v6840_v18  ;;  %v1479_v16 = vshrl.u32 %v5766_v32, %v1476_v27  ;;  %v1482_v63 = vshrl.u32 %v5767_v34, %v1476_v27 }
 0x11d   : > { %v6864_v40 = vand.u32 8388607, %v1565_v4  ;;  %vm1359_vm15 = vcmp.lt.s32.totalorder %v6636_v59, 0  ;;  %v1485_v12 = vshrl.u32 %v5768_v36, %v1476_v27  ;;  %v1487_v3 = vshll.u32 %v5768_v36, %v1475_v42 }
 0x11e   : > { %v1337_v20 = vxor.u32 2147483648, %v1336_v2  ;;  %v5072_v23 = vmin.u32 %v1423_v25, %v6840_v18  ;;  %v1477_v47 = vshrl.u32 %v5765_v30, %v1476_v27  ;;  %v1480_v52 = vor.u32 %v1479_v16, %v1478_v11 }
 0x11f   : > { %vm1493_vm1 = vcmp.lt.s32.totalorder %v1474_v17, 1  ;;  %v1483_v44 = vor.u32 %v1482_v63, %v1481_v26  ;;  %v1488_v39 = vshrl.u32 %v5769_v38, %v1476_v27  ;;  %vm6878_vm2 = vcmp.le.f32.partialorder %v1357_v37, 0.7853982 }
 0x120   : > { %v1338_v6 = vsel %vm1255_vm14, %v1337_v20, %v1336_v2  ;;  %v1425_v24 = vclz %v5072_v23  ;;  %v1486_v45 = vor.u32 %v1485_v12, %v1484_v5  ;;  %v1490_v10 = vshll.u32 %v5769_v38, %v1475_v42 }
 0x121   : > { %v1341_v55 = vsel %vm6831_vm13, %v6491_v0, %v1338_v6  ;;  %v1491_v61 = vshrl.u32 %v5770_v46, %v1476_v27  ;;  %v1489_v50 = vor.u32 %v1488_v39, %v1487_v3  ;;  %vm1494_vm4 = vcmp.lt.s32.totalorder %v1474_v17, 2 }
 0x122   : > { %5656 = vcosq.f32 %v1341_v55  ;;  %v5073_v57 = vadd.s32 4294967294, %v1425_v24  ;;  %vm1496_vm5 = vcmp.lt.s32.totalorder %v1474_v17, 4  ;;  %vm1495_vm6 = vcmp.lt.s32.totalorder %v1474_v17, 3 }
 0x123   : > { %5658 = vsinq.f32 %v1341_v55  ;;  %v1492_v51 = vor.u32 %v1491_v61, %v1490_v10  ;;  %v1498_v1 = vsel %vm1496_vm5, %v1486_v45, 2102212464  ;;  %v1497_v7 = vsel %vm1493_vm1, %v1477_v47, %v1480_v52 }
 0x124   : > { %vm5074_vm3 = vcmp.lt.s32.totalorder %v5073_v57, 0  ;;  %v1499_v62 = vsel %vm1495_vm6, %v1483_v44, %v1498_v1  ;;  %v1501_v14 = vsel %vm1493_vm1, %v1480_v52, %v1483_v44  ;;  %v1502_v29 = vsel %vm1496_vm5, %v1489_v50, 920167782 }
 0x125   : > { %v1428_v49 = vsel %vm5074_vm3, 0, %v5073_v57  ;;  %v1505_v60 = vsel %vm1493_vm1, %v1483_v44, %v1486_v45  ;;  %v1503_v8 = vsel %vm1495_vm6, %v1486_v45, %v1502_v29  ;;  %v1506_v15 = vsel %vm1496_vm5, %v1492_v51, 1326507024  ;;  %v6930_v45 = vld [vmem:[%s5899_s15 + $0x60] sm:$0xff] }
 0x126   : > { %v1429_v33 = vsub.s32 32, %v1428_v49  ;;  %v1430_v37 = vshll.u32 %v6840_v18, %v1428_v49  ;;  %v1433_v43 = vsub.s32 4294967266, %v1428_v49  ;;  %v1444_v42 = vsel %vm1359_vm15, %v1443_v13, %v6825_v21 }
 0x127   : > { %v1504_v19 = vsel %vm1494_vm4, %v1501_v14, %v1503_v8  ;;  %v1507_v18 = vsel %vm1495_vm6, %v1489_v50, %v1506_v15  ;;  %v1569_v27 = vshrl.u32 %v1568_v54, 23  ;;  %v1500_v11 = vsel %vm1494_vm4, %v1497_v7, %v1499_v62 }
 0x128   : > { %v1431_v58 = vshrl.u32 %v1413_v22, %v1429_v33  ;;  %v1434_v9 = vadd.s32 127, %v1433_v43  ;;  %v1508_v22 = vsel %vm1494_vm4, %v1505_v60, %v1507_v18  ;;  %v1446_v13 = vsel %vm6878_vm2, 0, %v1444_v42 }
 0x129   : > { %v6901_v16 = vmul.u32.u64.low %v6854_v53, %v1508_v22  ;;  %v6902_v20 = vmul.u32.u64.high %v6854_v53, %v1508_v22, %v6901_v16  ;;  %v6905_v23 = vmul.u32.u64.low %v6854_v53, %v1504_v19  ;;  %v6906_v26 = vmul.u32.u64.high %v6854_v53, %v1504_v19, %v6905_v23 }
 0x12a   : > { %v1432_v2 = vor.u32 %v1431_v58, %v1430_v37  ;;  %v1435_v25 = vshll.u32 %v1434_v9, 23  ;;  %v5079_v5 = vadd.s32 4294967169, %v1569_v27  ;;  %v6912_v6 = vand.u32 3, %v6838_v48 }
 0x12b   : > { %v1516_v17 = vmul.u32 %v6854_v53, %v1500_v11  ;;  %v6918_v3 = vand.u32 3, %v6850_v56  ;;  %v1450_v55 = vadd.s32 3, %v1446_v13  ;;  %vm1518_vm7 = vc.u32 %v6902_v20, %v6905_v23 }
 0x12c   : > { %v1436_v21 = vor.u32 4788187, %v1435_v25  ;;  %v1439_v63 = vcvt.s32.f32 %v1432_v2  ;;  %v1575_v24 = vadd.s32 1, %v5079_v5  ;;  %v1519_v47 = vadd.s32 1, %v6906_v26 }
 0x12d   : > { %v1573_v48 = vor.u32 8388608, %v6864_v40  ;;  %vm3004_vm9 = vcmp.eq.s32.totalorder %v6912_v6, 0  ;;  %vm3007_vm10 = vcmp.eq.s32.totalorder %v6912_v6, 2  ;;  %v6932_v10 = vand.u32 3, %v1446_v13 }
 0x12e   : > { %v1437_v54 = vand.u32 2147483647, %v1436_v21  ;;  %vm1576_vm8 = vcmp.gt.s32.totalorder %v1575_v24, 0  ;;  %v1520_v53 = vsel %vm1518_vm7, %v1519_v47, %v6906_v26  ;;  %vm1349_vm11 = vcmp.eq.s32.totalorder %v6918_v3, 0 }
 0x12f   : > { %v6915_v12 = vpop.eup %5656  ;;  %v1577_v44 = vsel %vm1576_vm8, %v1575_v24, 0  ;;  %v1521_v56 = vadd.s32 %v1520_v53, %v1516_v17  ;;  %vm1352_vm12 = vcmp.eq.s32.totalorder %v6918_v3, 2  ;;  %v6936_v61 = vand.u32 3, %v1450_v55 }
 0x130   : > { %v6923_v52 = vpop.eup %5658  ;;  %v1440_v57 = vmul.f32 %v1439_v63, %v1437_v54  ;;  %v1579_v40 = vand.u32 31, %v1577_v44  ;;  %v1353_v50 = vxor.u32 2147483648, %v6915_v12  ;;  %v6941_v1 = vshll.u32 %v1573_v48, 8 }
 0x131   : > { %v1522_v51 = vadd.s32 536870912, %v1521_v56  ;;  %v1350_v33 = vxor.u32 2147483648, %v6923_v52  ;;  %vm3003_vm14 = vcmp.lt.s32.totalorder %v6912_v6, 2  ;;  %v1672_v7 = vand.u32 2139095040, %v6930_v45 }
 0x132   : > { %v1441_v39 = vxor.u32 2147483648, %v1440_v57  ;;  %v1580_v43 = vsub.s32 32, %v1579_v40  ;;  %vm1348_vm0 = vcmp.lt.s32.totalorder %v6918_v3, 2  ;;  %v1582_v14 = vshll.u32 %v5765_v30, %v1579_v40 }
 0x133   : > { %v6950_v62 = vshrl.u32 %v1522_v51, 30  ;;  %v1585_v29 = vshll.u32 %v5766_v32, %v1579_v40  ;;  %v1578_v60 = vshrl.u32 %v1577_v44, 5  ;;  %v3009_v9 = vsel %vm3007_vm10, %v1353_v50, %v6923_v52 }
 0x134   : > { %v1442_v49 = vsel %vm1359_vm15, %v1441_v39, %v1440_v57  ;;  %v1583_v58 = vshrl.u32 %v5766_v32, %v1580_v43  ;;  %v1586_v28 = vshrl.u32 %v5767_v34, %v1580_v43  ;;  %v1588_v15 = vshll.u32 %v5767_v34, %v1579_v40 }
 0x135   : > { %v1445_v37 = vsel %vm6878_vm2, %v6636_v59, %v1442_v49  ;;  %v1524_v8 = vshll.u32 %v6950_v62, 30  ;;  %v1589_v42 = vshrl.u32 %v5768_v36, %v1580_v43  ;;  %vm1345_vm13 = vweird.f32 %v6491_v0 }
 0x136   : > { %5660 = vcosq.f32 %v1445_v37  ;;  %v1584_v19 = vor.u32 %v1583_v58, %v1582_v14  ;;  %v1587_v18 = vor.u32 %v1586_v28, %v1585_v29  ;;  %v1591_v27 = vshll.u32 %v5768_v36, %v1579_v40 }
 0x137   : > { %5662 = vsinq.f32 %v1445_v37  ;;  %v1592_v2 = vshrl.u32 %v5769_v38, %v1580_v43  ;;  %v1354_v25 = vsel %vm1352_vm12, %v1353_v50, %v6923_v52  ;;  %v6968_v11 = vsub.s32 %v1521_v56, %v1524_v8 }
 0x138   : > { %v1590_v22 = vor.u32 %v1589_v42, %v1588_v15  ;;  %v1594_v16 = vshll.u32 %v5769_v38, %v1579_v40  ;;  %vm3110_vm15 = vcmp.eq.s32.totalorder %v6932_v10, 2  ;;  %v1581_v26 = vshrl.u32 %v5765_v30, %v1580_v43 }
 0x139   : > { %v1593_v21 = vor.u32 %v1592_v2, %v1591_v27  ;;  %v1595_v63 = vshrl.u32 %v5770_v46, %v1580_v43  ;;  %vm1597_vm1 = vcmp.lt.s32.totalorder %v1578_v60, 1  ;;  %v3006_v13 = vsel %vm3004_vm9, %v6915_v12, %v1350_v33 }
 0x13a   : > { %vm3107_vm2 = vcmp.eq.s32.totalorder %v6932_v10, 0  ;;  %v1527_v5 = vsub.s32 0, %v6968_v11  ;;  %vm1599_vm3 = vcmp.lt.s32.totalorder %v1578_v60, 3  ;;  %vm1600_vm4 = vcmp.lt.s32.totalorder %v1578_v60, 4 }
 0x13b   : > { %vm3106_vm5 = vcmp.lt.s32.totalorder %v6932_v10, 2  ;;  %vm1452_vm6 = vcmp.lt.s32.totalorder %v6936_v61, 2  ;;  %v1596_v54 = vor.u32 %v1595_v63, %v1594_v16  ;;  %vm1598_vm7 = vcmp.lt.s32.totalorder %v1578_v60, 2  ;;  %v7034_v63 = vld [vmem:[%s5899_s15 + $0x68] sm:$0xff] }
 0x13c   : > { %v1602_v17 = vsel %vm1600_vm4, %v1590_v22, 2102212464  ;;  %v1605_v24 = vsel %vm1597_vm1, %v1584_v19, %v1587_v18  ;;  %vm1449_vm8 = vweird.f32 %v6636_v59  ;;  %v1351_v55 = vsel %vm1349_vm11, %v6915_v12, %v1350_v33 }
 0x13d   : > { %v5076_v47 = vmin.u32 %v1527_v5, %v6968_v11  ;;  %v1606_v52 = vsel %vm1600_vm4, %v1593_v21, 920167782  ;;  %v1609_v57 = vsel %vm1597_vm1, %v1587_v18, %v1590_v22  ;;  %v1601_v48 = vsel %vm1597_vm1, %v1581_v26, %v1584_v19 }
 0x13e   : > { %v1603_v53 = vsel %vm1599_vm3, %v1587_v18, %v1602_v17  ;;  %v1607_v44 = vsel %vm1599_vm3, %v1590_v22, %v1606_v52  ;;  %v1610_v39 = vsel %vm1600_vm4, %v1596_v54, 1326507024  ;;  %v3010_v56 = vsel %vm3003_vm14, %v3006_v13, %v3009_v9 }
 0x13f   : > { %v1529_v40 = vclz %v5076_v47  ;;  %v1608_v50 = vsel %vm1598_vm7, %v1605_v24, %v1607_v44  ;;  %v1611_v12 = vsel %vm1599_vm3, %v1593_v21, %v1610_v39  ;;  %v1355_v49 = vsel %vm1348_vm0, %v1351_v55, %v1354_v25 }
 0x140   : > { %v1612_v51 = vsel %vm1598_vm7, %v1609_v57, %v1611_v12  ;;  %v6999_v33 = vmul.u32.u64.low %v6941_v1, %v1608_v50  ;;  %v7000_v37 = vmul.u32.u64.high %v6941_v1, %v1608_v50, %v6999_v33  ;;  %v1604_v14 = vsel %vm1598_vm7, %v1601_v48, %v1603_v53 }
 0x141   : > { %v5077_v43 = vadd.s32 4294967294, %v1529_v40  ;;  %v7005_v6 = vmul.u32.u64.low %v6941_v1, %v1612_v51  ;;  %v7006_v29 = vmul.u32.u64.high %v6941_v1, %v1612_v51, %v7005_v6  ;;  %vm1453_vm9 = vcmp.eq.s32.totalorder %v6936_v61, 0 }
 0x142   : > { %vm1456_vm10 = vcmp.eq.s32.totalorder %v6936_v61, 2  ;;  %v1517_v3 = vadd.s32 %v6905_v23, %v6902_v20  ;;  %v1673_v28 = vshrl.u32 %v1672_v7, 23  ;;  %v3011_v60 = vsel %vm1345_vm13, nan, %v3010_v56 }
 0x143   : > { %v5661_v58 = vpop.eup %5660  ;;  %v1356_v15 = vsel %vm1345_vm13, nan, %v1355_v49  ;;  %vm5078_vm11 = vcmp.lt.s32.totalorder %v5077_v43, 0  ;;  %v1620_v18 = vmul.u32 %v6941_v1, %v1604_v14  ;;  %v1623_v27 = vadd.s32 1, %v7000_v37 }
 0x144   : > { %v5663_v9 = vpop.eup %5662  ;;  %v1457_v8 = vxor.u32 2147483648, %v5661_v58  ;;  %v1532_v19 = vsel %vm5078_vm11, 0, %v5077_v43  ;;  %v5083_v16 = vadd.s32 4294967169, %v1673_v28  ;;  %vm1622_vm12 = vc.u32 %v7006_v29, %v6999_v33 }
 0x145   : > { %v1454_v42 = vxor.u32 2147483648, %v5663_v9  ;;  %v1533_v7 = vsub.s32 32, %v1532_v19  ;;  %v1534_v2 = vshll.u32 %v6968_v11, %v1532_v19  ;;  %v1537_v22 = vsub.s32 4294967266, %v1532_v19 }
 0x146   : > { %v3112_v20 = vsel %vm3110_vm15, %v1457_v8, %v5663_v9  ;;  %v1458_v23 = vsel %vm1456_vm10, %v1457_v8, %v5663_v9  ;;  %v1624_v54 = vsel %vm1622_vm12, %v1623_v27, %v7000_v37  ;;  %v1669_v47 = vand.u32 2147483647, %v6930_v45 }
 0x147   : > { %v3109_v25 = vsel %vm3107_vm2, %v5661_v58, %v1454_v42  ;;  %v1455_v0 = vsel %vm1453_vm9, %v5661_v58, %v1454_v42  ;;  %v1535_v21 = vshrl.u32 %v1517_v3, %v1533_v7  ;;  %v1538_v5 = vadd.s32 127, %v1537_v22 }
 0x148   : > { %v3113_v1 = vsel %vm3106_vm5, %v3109_v25, %v3112_v20  ;;  %v1459_v26 = vsel %vm1452_vm6, %v1455_v0, %v1458_v23  ;;  %v1625_v61 = vadd.s32 %v1624_v54, %v1620_v18  ;;  %v1776_v52 = vand.u32 2139095040, %v7034_v63 }
 0x149   : > { %v3114_v11 = vsel %vm1449_vm8, nan, %v3113_v1  ;;  %v1460_v13 = vsel %vm1449_vm8, nan, %v1459_v26  ;;  %v1536_v24 = vor.u32 %v1535_v21, %v1534_v2  ;;  %v1539_v55 = vshll.u32 %v1538_v5, 23 }
 0x14a   : > { %v5562_v10 = vpack.i.bf16 %v3114_v11, %v3011_v60  ;;  %v5557_v17 = vpack.i.bf16 %v1460_v13, %v1356_v15  ;;  %v1547_v57 = vsub.s32 4, %v6950_v62  ;;  %v1626_v59 = vadd.s32 536870912, %v1625_v61 }
 0x14b   : > { %v1679_v48 = vadd.s32 1, %v5083_v16  ;;  %v1540_v53 = vor.u32 4788187, %v1539_v55  ;;  %v1543_v44 = vcvt.s32.f32 %v1536_v24  ;;  %vm1463_vm14 = vcmp.lt.s32.totalorder %v6711_v31, 0 }
 0x14c   : > { %5563 = vrot.lane.b32.xlu1 %v5562_v10, %s5772_s17  ;;  %5558 = vrot.lane.b32.xlu0 %v5557_v17, %s5771_s16  ;;  %v7047_v39 = vshrl.u32 %v1626_v59, 30  ;;  %v1676_v40 = vand.u32 8388607, %v1669_v47  ;;  %v1777_v12 = vshrl.u32 %v1776_v52, 23  ;;  %v1548_v49 = vsel %vm1463_vm14, %v1547_v57, %v6950_v62 }
 0x14d   : > { %vm1680_vm0 = vcmp.gt.s32.totalorder %v1679_v48, 0  ;;  %v1541_v56 = vand.u32 2147483647, %v1540_v53  ;;  %vm7057_vm13 = vcmp.le.f32.partialorder %v1461_v35, 0.7853982  ;;  %v1621_v7 = vadd.s32 %v6999_v33, %v7006_v29 }
 0x14e   : > { %v1681_v50 = vsel %vm1680_vm0, %v1679_v48, 0  ;;  %v1628_v51 = vshll.u32 %v7047_v39, 30  ;;  %v1773_v3 = vand.u32 2147483647, %v7034_v63  ;;  %v7066_v9 = vsel %vm7057_vm13, 0, %v1548_v49 }
 0x14f   : > { %v1683_v37 = vand.u32 31, %v1681_v50  ;;  %v1544_v43 = vmul.f32 %v1543_v44, %v1541_v56  ;;  %v1677_v62 = vor.u32 8388608, %v1676_v40  ;;  %v5087_v8 = vadd.s32 4294967169, %v1777_v12 }
 0x150   : > { %v7061_v6 = vsub.s32 %v1625_v61, %v1628_v51  ;;  %v1554_v25 = vadd.s32 3, %v7066_v9  ;;  %v1651_v0 = vsub.s32 4, %v7047_v39  ;;  %v1682_v22 = vshrl.u32 %v1681_v50, 5 }
 0x151   : > { %v1684_v58 = vsub.s32 32, %v1683_v37  ;;  %v1545_v28 = vxor.u32 2147483648, %v1544_v43  ;;  %v1686_v15 = vshll.u32 %v5765_v30, %v1683_v37  ;;  %v1689_v35 = vshll.u32 %v5766_v32, %v1683_v37 }
 0x152   : > { %v1631_v60 = vsub.s32 0, %v7061_v6  ;;  %v1692_v42 = vshll.u32 %v5767_v34, %v1683_v37  ;;  %v7085_v16 = vshll.u32 %v1677_v62, 8  ;;  %v7089_v1 = vand.u32 8388607, %v1773_v3 }
 0x153   : > { %v1546_v19 = vsel %vm1463_vm14, %v1545_v28, %v1544_v43  ;;  %v1687_v18 = vshrl.u32 %v5766_v32, %v1684_v58  ;;  %v1690_v27 = vshrl.u32 %v5767_v34, %v1684_v58  ;;  %v1693_v20 = vshrl.u32 %v5768_v36, %v1684_v58 }
 0x154   : > { %v1549_v23 = vsel %vm7057_vm13, %v6711_v31, %v1546_v19  ;;  %v5080_v2 = vmin.u32 %v1631_v60, %v7061_v6  ;;  %vm1567_vm15 = vcmp.lt.s32.totalorder %v6843_v41, 0  ;;  %v1685_v21 = vshrl.u32 %v5765_v30, %v1684_v58 }
 0x155   : > { %5664 = vcosq.f32 %v1549_v23  ;;  %v1783_v33 = vadd.s32 1, %v5087_v8  ;;  %v1688_v29 = vor.u32 %v1687_v18, %v1686_v15  ;;  %v1691_v11 = vor.u32 %v1690_v27, %v1689_v35 }
 0x156   : > { %v1633_v26 = vclz %v5080_v2  ;;  %v1694_v13 = vor.u32 %v1693_v20, %v1692_v42  ;;  %v1695_v5 = vshll.u32 %v5768_v36, %v1683_v37  ;;  %v1696_v10 = vshrl.u32 %v5769_v38, %v1684_v58 }
 0x157   : > { %v1698_v17 = vshll.u32 %v5769_v38, %v1683_v37  ;;  %v1699_v24 = vshrl.u32 %v5770_v46, %v1684_v58  ;;  %5666 = vsinq.f32 %v1549_v23  ;;  %vm1701_vm1 = vcmp.lt.s32.totalorder %v1682_v22, 1 }
 0x158   : > { %v5081_v54 = vadd.s32 4294967294, %v1633_v26  ;;  %vm1702_vm2 = vcmp.lt.s32.totalorder %v1682_v22, 2  ;;  %vm1703_vm3 = vcmp.lt.s32.totalorder %v1682_v22, 3  ;;  %v1697_v61 = vor.u32 %v1696_v10, %v1695_v5 }
 0x159   : > { %v1700_v55 = vor.u32 %v1699_v24, %v1698_v17  ;;  %vm1704_vm5 = vcmp.lt.s32.totalorder %v1682_v22, 4  ;;  %v1705_v57 = vsel %vm1701_vm1, %v1685_v21, %v1688_v29  ;;  %v1709_v48 = vsel %vm1701_vm1, %v1688_v29, %v1691_v11 }
 0x15a   : > { %vm5082_vm4 = vcmp.lt.s32.totalorder %v5081_v54, 0  ;;  %v1706_v59 = vsel %vm1704_vm5, %v1694_v13, 2102212464  ;;  %v1713_v40 = vsel %vm1701_vm1, %v1691_v11, %v1694_v13  ;;  %v1710_v12 = vsel %vm1704_vm5, %v1697_v61, 920167782 }
 0x15b   : > { %v1636_v52 = vsel %vm5082_vm4, 0, %v5081_v54  ;;  %v1707_v50 = vsel %vm1703_vm3, %v1691_v11, %v1706_v59  ;;  %v1714_v49 = vsel %vm1704_vm5, %v1700_v55, 1326507024  ;;  %vm1784_vm6 = vcmp.gt.s32.totalorder %v1783_v33, 0 }
 0x15c   : > { %v1637_v53 = vsub.s32 32, %v1636_v52  ;;  %v1638_v44 = vshll.u32 %v7061_v6, %v1636_v52  ;;  %v1641_v56 = vsub.s32 4294967266, %v1636_v52  ;;  %v1711_v43 = vsel %vm1703_vm3, %v1694_v13, %v1710_v12 }
 0x15d   : > { %v1715_v14 = vsel %vm1703_vm3, %v1697_v61, %v1714_v49  ;;  %v1652_v58 = vsel %vm1567_vm15, %v1651_v0, %v7047_v39  ;;  %v1712_v28 = vsel %vm1702_vm2, %v1709_v48, %v1711_v43  ;;  %v1785_v62 = vsel %vm1784_vm6, %v1783_v33, 0 }
 0x15e   : > { %v1639_v51 = vshrl.u32 %v1621_v7, %v1637_v53  ;;  %v1642_v37 = vadd.s32 127, %v1641_v56  ;;  %v1716_v6 = vsel %vm1702_vm2, %v1713_v40, %v1715_v14  ;;  %v1708_v42 = vsel %vm1702_vm2, %v1705_v57, %v1707_v50 }
 0x15f   : > { %v7107_v15 = vmul.u32.u64.low %v7085_v16, %v1716_v6  ;;  %v7108_v35 = vmul.u32.u64.high %v7085_v16, %v1716_v6, %v7107_v15  ;;  %v7112_v19 = vmul.u32.u64.low %v7085_v16, %v1712_v28  ;;  %v7113_v18 = vmul.u32.u64.high %v7085_v16, %v1712_v28, %v7112_v19 }
 0x160   : > { %v1640_v8 = vor.u32 %v1639_v51, %v1638_v44  ;;  %v1643_v60 = vshll.u32 %v1642_v37, 23  ;;  %v1787_v39 = vand.u32 31, %v1785_v62  ;;  %v7117_v23 = vand.u32 3, %v7066_v9 }
 0x161   : > { %v1781_v7 = vor.u32 8388608, %v7089_v1  ;;  %vm7124_vm7 = vcmp.le.f32.partialorder %v1565_v4, 0.7853982  ;;  %v7128_v22 = vand.u32 3, %v1554_v25  ;;  %v1724_v9 = vmul.u32 %v7085_v16, %v1708_v42  ;;  %v7136_v1 = vld [vmem:[%s5899_s15 + $0x70] sm:$0xff] }
 0x162   : > { %v1644_v27 = vor.u32 4788187, %v1643_v60  ;;  %v1647_v20 = vcvt.s32.f32 %v1640_v8  ;;  %v7120_v2 = vpop.eup %5664  ;;  %v1788_v26 = vsub.s32 32, %v1787_v39  ;;  %v1654_v33 = vsel %vm7124_vm7, 0, %v1652_v58 }
 0x163   : > { %vm1726_vm8 = vc.u32 %v7108_v35, %v7112_v19  ;;  %v1727_v29 = vadd.s32 1, %v7113_v18  ;;  %v1790_v4 = vshll.u32 %v5765_v30, %v1787_v39  ;;  %v1793_v11 = vshll.u32 %v5766_v32, %v1787_v39 }
 0x164   : > { %v1645_v21 = vand.u32 2147483647, %v1644_v27  ;;  %v1877_v25 = vand.u32 2147483647, %v7136_v1  ;;  %v7142_v13 = vpop.eup %5666  ;;  %vm3210_vm9 = vcmp.eq.s32.totalorder %v7117_v23, 0  ;;  %vm3213_vm10 = vcmp.eq.s32.totalorder %v7117_v23, 2 }
 0x165   : > { %v7146_v16 = vand.u32 3, %v1654_v33  ;;  %v1791_v54 = vshrl.u32 %v5766_v32, %v1788_v26  ;;  %v7149_v10 = vshll.u32 %v1781_v7, 8  ;;  %v1658_v17 = vadd.s32 3, %v1654_v33 }
 0x166   : > { %v1648_v5 = vmul.f32 %v1647_v20, %v1645_v21  ;;  %v1728_v24 = vsel %vm1726_vm8, %v1727_v29, %v7113_v18  ;;  %v1786_v61 = vshrl.u32 %v1785_v62, 5  ;;  %v1794_v55 = vshrl.u32 %v5767_v34, %v1788_v26 }
 0x167   : > { %v1561_v52 = vxor.u32 2147483648, %v7120_v2  ;;  %v1729_v59 = vadd.s32 %v1728_v24, %v1724_v9  ;;  %v1789_v48 = vshrl.u32 %v5765_v30, %v1788_v26  ;;  %v1792_v53 = vor.u32 %v1791_v54, %v1790_v4 }
 0x168   : > { %v1649_v57 = vxor.u32 2147483648, %v1648_v5  ;;  %v1795_v44 = vor.u32 %v1794_v55, %v1793_v11  ;;  %v1796_v56 = vshll.u32 %v5767_v34, %v1787_v39  ;;  %v1797_v40 = vshrl.u32 %v5768_v36, %v1788_v26 }
 0x169   : > { %vm3209_vm11 = vcmp.lt.s32.totalorder %v7117_v23, 2  ;;  %vm1557_vm12 = vcmp.eq.s32.totalorder %v7128_v22, 0  ;;  %vm1560_vm14 = vcmp.eq.s32.totalorder %v7128_v22, 2  ;;  %v1730_v12 = vadd.s32 536870912, %v1729_v59 }
 0x16a   : > { %v1650_v50 = vsel %vm1567_vm15, %v1649_v57, %v1648_v5  ;;  %v1799_v49 = vshll.u32 %v5768_v36, %v1787_v39  ;;  %v1800_v51 = vshrl.u32 %v5769_v38, %v1788_v26  ;;  %v1798_v43 = vor.u32 %v1797_v40, %v1796_v56 }
 0x16b   : > { %v1653_v37 = vsel %vm7124_vm7, %v6843_v41, %v1650_v50  ;;  %v1802_v14 = vshll.u32 %v5769_v38, %v1787_v39  ;;  %v1803_v58 = vshrl.u32 %v5770_v46, %v1788_v26  ;;  %v7169_v28 = vshrl.u32 %v1730_v12, 30 }
 0x16c   : > { %5668 = vcosq.f32 %v1653_v37  ;;  %v1801_v6 = vor.u32 %v1800_v51, %v1799_v49  ;;  %vm1805_vm0 = vcmp.lt.s32.totalorder %v1786_v61, 1  ;;  %v1558_v62 = vxor.u32 2147483648, %v7142_v13 }
 0x16d   : > { %5670 = vsinq.f32 %v1653_v37  ;;  %vm1556_vm13 = vcmp.lt.s32.totalorder %v7128_v22, 2  ;;  %v1804_v8 = vor.u32 %v1803_v58, %v1802_v14  ;;  %vm1807_vm15 = vcmp.lt.s32.totalorder %v1786_v61, 3 }
 0x16e   : > { %vm1553_vm1 = vweird.f32 %v6711_v31  ;;  %v1732_v60 = vshll.u32 %v7169_v28, 30  ;;  %vm1806_vm2 = vcmp.lt.s32.totalorder %v1786_v61, 2  ;;  %vm1808_vm3 = vcmp.lt.s32.totalorder %v1786_v61, 4 }
 0x16f   : > { %v1880_v15 = vand.u32 2139095040, %v7136_v1  ;;  %v1809_v42 = vsel %vm1805_vm0, %v1789_v48, %v1792_v53  ;;  %v1810_v18 = vsel %vm1808_vm3, %v1798_v43, 2102212464  ;;  %v1813_v39 = vsel %vm1805_vm0, %v1792_v53, %v1795_v44 }
 0x170   : > { %v1814_v27 = vsel %vm1808_vm3, %v1801_v6, 920167782  ;;  %v7178_v20 = vsub.s32 %v1729_v59, %v1732_v60  ;;  %v1811_v7 = vsel %vm1807_vm15, %v1795_v44, %v1810_v18  ;;  %v1817_v26 = vsel %vm1805_vm0, %v1795_v44, %v1798_v43 }
 0x171   : > { %v1815_v0 = vsel %vm1807_vm15, %v1798_v43, %v1814_v27  ;;  %v3212_v21 = vsel %vm3210_vm9, %v7120_v2, %v1558_v62  ;;  %v3215_v33 = vsel %vm3213_vm10, %v1561_v52, %v7142_v13  ;;  %v1818_v29 = vsel %vm1808_vm3, %v1804_v8, 1326507024 }
 0x172   : > { %v1816_v9 = vsel %vm1806_vm2, %v1813_v39, %v1815_v0  ;;  %v1735_v4 = vsub.s32 0, %v7178_v20  ;;  %v1819_v11 = vsel %vm1807_vm15, %v1801_v6, %v1818_v29  ;;  %vm3312_vm4 = vcmp.lt.s32.totalorder %v7146_v16, 2 }
 0x173   : > { %v7193_v5 = vmul.u32.u64.low %v7149_v10, %v1816_v9  ;;  %v7194_v54 = vmul.u32.u64.high %v7149_v10, %v1816_v9, %v7193_v5  ;;  %vm3313_vm5 = vcmp.eq.s32.totalorder %v7146_v16, 0  ;;  %v1659_v24 = vand.u32 3, %v1658_v17 }
 0x174   : > { %v1812_v55 = vsel %vm1806_vm2, %v1809_v42, %v1811_v7  ;;  %v1820_v57 = vsel %vm1806_vm2, %v1817_v26, %v1819_v11  ;;  %vm1657_vm6 = vweird.f32 %v6843_v41  ;;  %v5084_v59 = vmin.u32 %v1735_v4, %v7178_v20 }
 0x175   : > { %v7204_v48 = vmul.u32.u64.low %v7149_v10, %v1820_v57  ;;  %v7205_v53 = vmul.u32.u64.high %v7149_v10, %v1820_v57, %v7204_v48  ;;  %v1881_v44 = vshrl.u32 %v1880_v15, 23  ;;  %v3216_v56 = vsel %vm3209_vm11, %v3212_v21, %v3215_v33 }
 0x176   : > { %vm3316_vm7 = vcmp.eq.s32.totalorder %v7146_v16, 2  ;;  %v1559_v17 = vsel %vm1557_vm12, %v7120_v2, %v1558_v62  ;;  %v1562_v61 = vsel %vm1560_vm14, %v1561_v52, %v7142_v13  ;;  %vm1671_vm8 = vcmp.lt.s32.totalorder %v6930_v45, 0 }
 0x177   : > { %v1737_v40 = vclz %v5084_v59  ;;  %v1828_v50 = vmul.u32 %v7149_v10, %v1812_v55  ;;  %v1831_v12 = vadd.s32 1, %v7194_v54  ;;  %v5091_v49 = vadd.s32 4294967169, %v1881_v44 }
 0x178   : > { %vm1660_vm9 = vcmp.lt.s32.totalorder %v1659_v24, 2  ;;  %vm1661_vm10 = vcmp.eq.s32.totalorder %v1659_v24, 0  ;;  %vm1664_vm11 = vcmp.eq.s32.totalorder %v1659_v24, 2  ;;  %v7221_v23 = vand.u32 8388607, %v1877_v25 }
 0x179   : > { %v1563_v2 = vsel %vm1556_vm13, %v1559_v17, %v1562_v61  ;;  %vm7227_vm12 = vcmp.le.f32.partialorder %v1669_v47, 0.7853982  ;;  %v5085_v10 = vadd.s32 4294967294, %v1737_v40  ;;  %vm1830_vm14 = vc.u32 %v7205_v53, %v7193_v5  ;;  %v5669_v51 = vpop.eup %5668 }
 0x17a   : > { %v1887_v52 = vadd.s32 1, %v5091_v49  ;;  %v3217_v37 = vsel %vm1553_vm1, nan, %v3216_v56  ;;  %v1725_v43 = vadd.s32 %v7112_v19, %v7108_v35  ;;  %v1755_v22 = vsub.s32 4, %v7169_v28  ;;  %v5671_v47 = vpop.eup %5670 }
 0x17b   : > { %v1832_v14 = vsel %vm1830_vm14, %v1831_v12, %v7194_v54  ;;  %v1665_v58 = vxor.u32 2147483648, %v5669_v51  ;;  %vm5086_vm0 = vcmp.lt.s32.totalorder %v5085_v10, 0  ;;  %v1662_v62 = vxor.u32 2147483648, %v5671_v47 }
 0x17c   : > { %v1833_v6 = vadd.s32 %v1832_v14, %v1828_v50  ;;  %vm1888_vm13 = vcmp.gt.s32.totalorder %v1887_v52, 0  ;;  %v1564_v8 = vsel %vm1553_vm1, nan, %v1563_v2  ;;  %v1740_v60 = vsel %vm5086_vm0, 0, %v5085_v10 }
 0x17d   : > { %v1889_v15 = vsel %vm1888_vm13, %v1887_v52, 0  ;;  %v3318_v42 = vsel %vm3316_vm7, %v1665_v58, %v5671_v47  ;;  %v1666_v35 = vsel %vm1664_vm11, %v1665_v58, %v5671_v47  ;;  %v1741_v19 = vsub.s32 32, %v1740_v60 }
 0x17e   : > { %v1742_v18 = vshll.u32 %v7178_v20, %v1740_v60  ;;  %v3315_v39 = vsel %vm3313_vm5, %v5669_v51, %v1662_v62  ;;  %v1663_v27 = vsel %vm1661_vm10, %v5669_v51, %v1662_v62  ;;  %v1745_v7 = vsub.s32 4294967266, %v1740_v60 }
 0x17f   : > { %v1834_v0 = vadd.s32 536870912, %v1833_v6  ;;  %v3319_v31 = vsel %vm3312_vm4, %v3315_v39, %v3318_v42  ;;  %v1667_v26 = vsel %vm1660_vm9, %v1663_v27, %v1666_v35  ;;  %v1743_v21 = vshrl.u32 %v1725_v43, %v1741_v19 }
 0x180   : > { %v1756_v33 = vsel %vm1671_vm8, %v1755_v22, %v7169_v28  ;;  %v3320_v20 = vsel %vm1657_vm6, nan, %v3319_v31  ;;  %v1668_v9 = vsel %vm1657_vm6, nan, %v1667_v26  ;;  %v1746_v29 = vadd.s32 127, %v1745_v7 }
 0x181   : > { %v7258_v4 = vshrl.u32 %v1834_v0, 30  ;;  %v5572_v11 = vpack.i.bf16 %v3320_v20, %v3217_v37  ;;  %v5567_v54 = vpack.i.bf16 %v1668_v9, %v1564_v8  ;;  %v1744_v16 = vor.u32 %v1743_v21, %v1742_v18 }
 0x182   : > { %v1891_v55 = vand.u32 31, %v1889_v15  ;;  %v1747_v24 = vshll.u32 %v1746_v29, 23  ;;  %v7262_v57 = vsel %vm7227_vm12, 0, %v1756_v33  ;;  %v1829_v56 = vadd.s32 %v7193_v5, %v7205_v53  ;;  %v7304_v29 = vld [vmem:[%s5899_s15 + $0x78] sm:$0xff] }
 0x183   : > { %v1836_v28 = vshll.u32 %v7258_v4, 30  ;;  %5573 = vrot.lane.b32.xlu1 %v5572_v11, %s5772_s17  ;;  %5568 = vrot.lane.b32.xlu0 %v5567_v54, %s5771_s16  ;;  %v1751_v48 = vcvt.s32.f32 %v1744_v16  ;;  %v7272_v17 = vadd.s32 3, %v7262_v57  ;;  %v1885_v61 = vor.u32 8388608, %v7221_v23 }
 0x184   : > { %v1892_v41 = vsub.s32 32, %v1891_v55  ;;  %v1748_v59 = vor.u32 4788187, %v1747_v24  ;;  %v1890_v12 = vshrl.u32 %v1889_v15, 5  ;;  %v1894_v49 = vshll.u32 %v5765_v30, %v1891_v55 }
 0x185   : > { %v7267_v44 = vsub.s32 %v1833_v6, %v1836_v28  ;;  %v1897_v10 = vshll.u32 %v5766_v32, %v1891_v55  ;;  %v1903_v51 = vshll.u32 %v5768_v36, %v1891_v55  ;;  %v1900_v37 = vshll.u32 %v5767_v34, %v1891_v55 }
 0x186   : > { %v1749_v40 = vand.u32 2147483647, %v1748_v59  ;;  %v1895_v2 = vshrl.u32 %v5766_v32, %v1892_v41  ;;  %v1898_v52 = vshrl.u32 %v5767_v34, %v1892_v41  ;;  %v1901_v23 = vshrl.u32 %v5768_v36, %v1892_v41 }
 0x187   : > { %v1839_v50 = vsub.s32 0, %v7267_v44  ;;  %v1859_v43 = vsub.s32 4, %v7258_v4  ;;  %v1893_v22 = vshrl.u32 %v5765_v30, %v1892_v41  ;;  %v1904_v14 = vshrl.u32 %v5769_v38, %v1892_v41 }
 0x188   : > { %v1752_v5 = vmul.f32 %v1751_v48, %v1749_v40  ;;  %v7287_v47 = vshll.u32 %v1885_v61, 8  ;;  %v1906_v62 = vshll.u32 %v5769_v38, %v1891_v55  ;;  %v1907_v8 = vshrl.u32 %v5770_v46, %v1892_v41 }
 0x189   : > { %v5088_v53 = vmin.u32 %v1839_v50, %v7267_v44  ;;  %v1896_v60 = vor.u32 %v1895_v2, %v1894_v49  ;;  %v1899_v15 = vor.u32 %v1898_v52, %v1897_v10  ;;  %v1905_v42 = vor.u32 %v1904_v14, %v1903_v51  ;;  %v5613_v50 = vld [vmem:[%s7914_s2 + $0x10] ss:$0 sps:$4 sm:$0x33]  }
 0x18a   : > { %v1753_v58 = vxor.u32 2147483648, %v1752_v5  ;;  %vm1909_vm15 = vcmp.lt.s32.totalorder %v1890_v12, 1  ;;  %vm1775_vm1 = vcmp.lt.s32.totalorder %v7034_v63, 0  ;;  %v1902_v18 = vor.u32 %v1901_v23, %v1900_v37 }
 0x18b   : > { %v1841_v6 = vclz %v5088_v53  ;;  %v1908_v39 = vor.u32 %v1907_v8, %v1906_v62  ;;  %vm1910_vm2 = vcmp.lt.s32.totalorder %v1890_v12, 2  ;;  %vm1911_vm3 = vcmp.lt.s32.totalorder %v1890_v12, 3 }
 0x18c   : > { %v1754_v35 = vsel %vm1671_vm8, %v1753_v58, %v1752_v5  ;;  %vm1912_vm4 = vcmp.lt.s32.totalorder %v1890_v12, 4  ;;  %v1913_v7 = vsel %vm1909_vm15, %v1893_v22, %v1896_v60  ;;  %v1917_v21 = vsel %vm1909_vm15, %v1896_v60, %v1899_v15  ;;  %v5614_v5 = vld [vmem:[%s7914_s2 + $0x8] sm:$0xff]  }
 0x18d   : > { %v5089_v19 = vadd.s32 4294967294, %v1841_v6  ;;  %v1757_v27 = vsel %vm7227_vm12, %v6930_v45, %v1754_v35  ;;  %v1914_v0 = vsel %vm1912_vm4, %v1902_v18, 2102212464  ;;  %v1918_v33 = vsel %vm1912_vm4, %v1905_v42, 920167782 }
 0x18e   : > { %5672 = vcosq.f32 %v1757_v27  ;;  %v1915_v26 = vsel %vm1911_vm3, %v1899_v15, %v1914_v0  ;;  %v1919_v54 = vsel %vm1911_vm3, %v1902_v18, %v1918_v33  ;;  %v1921_v16 = vsel %vm1909_vm15, %v1899_v15, %v1902_v18  ;;  %v5615_v15 = vld [vmem:[%s7914_s2] sm:$0xff]  }
 0x18f   : > { %vm5090_vm5 = vcmp.lt.s32.totalorder %v5089_v19, 0  ;;  %5674 = vsinq.f32 %v1757_v27  ;;  %v1916_v11 = vsel %vm1910_vm2, %v1913_v7, %v1915_v26  ;;  %v1922_v55 = vsel %vm1912_vm4, %v1908_v39, 1326507024 }
 0x190   : > { %v1844_v31 = vsel %vm5090_vm5, 0, %v5089_v19  ;;  %v1920_v41 = vsel %vm1910_vm2, %v1917_v21, %v1919_v54  ;;  %v1923_v59 = vsel %vm1911_vm3, %v1905_v42, %v1922_v55  ;;  %v1984_v40 = vand.u32 2139095040, %v7304_v29 }
 0x191   : > { %v1845_v13 = vsub.s32 32, %v1844_v31  ;;  %v1846_v20 = vshll.u32 %v7267_v44, %v1844_v31  ;;  %v1849_v9 = vsub.s32 4294967266, %v1844_v31  ;;  %v1924_v48 = vsel %vm1910_vm2, %v1921_v16, %v1923_v59 }
 0x192   : > { %v7314_v44 = vmul.u32.u64.low %v7287_v47, %v1920_v41  ;;  %v7315_v61 = vmul.u32.u64.high %v7287_v47, %v1920_v41, %v7314_v44  ;;  %v7323_v2 = vmul.u32.u64.low %v7287_v47, %v1924_v48  ;;  %v7324_v10 = vmul.u32.u64.high %v7287_v47, %v1924_v48, %v7323_v2 }
 0x193   : > { %v1847_v24 = vshrl.u32 %v1829_v56, %v1845_v13  ;;  %v1850_v28 = vadd.s32 127, %v1849_v9  ;;  %v1860_v12 = vsel %vm1775_vm1, %v1859_v43, %v7258_v4  ;;  %v1981_v52 = vand.u32 2147483647, %v7304_v29 }
 0x194   : > { %v1985_v51 = vshrl.u32 %v1984_v40, 23  ;;  %v1932_v23 = vmul.u32 %v7287_v47, %v1916_v11  ;;  %v5773_v22 = vmov 0   ;;  %vm3938_vm6 = vcmask 1041408  }
 0x195   : > { %v1848_v49 = vor.u32 %v1847_v24, %v1846_v20  ;;  %v1851_v56 = vshll.u32 %v1850_v28, 23  ;;  %5597 = vset.pattern.permute.xlu1 %v5773_v22  ;;  %vm7337_vm7 = vcmp.le.f32.partialorder %v1773_v3, 0.7853982  ;;  %v1935_v4 = vadd.s32 1, %v7315_v61  ;;  %5399 = vmatprep.subr.msk.bf16.mxu0 %vm3938_vm6, %v5613_v50 }
 0x196   : > { %v5095_v43 = vadd.s32 4294967169, %v1985_v51  ;;  %v3940_v58 = vsel %vm3938_vm6, %v5613_v50, 0  ;;  %5400 = vmatprep.subr.msk.bf16.mxu1 %vm3938_vm6, %v5613_v50  ;;  %v1862_v47 = vsel %vm7337_vm7, 0, %v1860_v12  ;;  %vm1934_vm8 = vc.u32 %v7324_v10, %v7314_v44 }
 0x197   : > { %v1852_v53 = vor.u32 4788187, %v1851_v56  ;;  %v1855_v37 = vcvt.s32.f32 %v1848_v49  ;;  %5324 = vmatpush3.bf16.msra.mxu0 %v3940_v58  ;;  %5396 = vmatpush3.bf16.msra.mxu1 %v3940_v58  ;;  %v7347_v3 = vand.u32 3, %v7262_v57  ;;  %v1936_v62 = vsel %vm1934_vm8, %v1935_v4, %v7315_v61 }
 0x198   : > { %v1988_v8 = vand.u32 8388607, %v1981_v52  ;;  %v1991_v60 = vadd.s32 1, %v5095_v43  ;;  %5325 = vmatprep.subr.bf16.mxu0 %v5614_v5  ;;  %5394 = vmatprep.subr.bf16.mxu1 %v5614_v5  ;;  %v7356_v35 = vand.u32 3, %v7272_v17  ;;  %v1937_v19 = vadd.s32 %v1936_v62, %v1932_v23  ;;  %v7422_v43 = vpop.permute.xlu0 %5518 }
 0x199   : > { %v1853_v6 = vand.u32 2147483647, %v1852_v53  ;;  %v1866_v57 = vadd.s32 3, %v1862_v47  ;;  %vm3416_vm10 = vcmp.eq.s32.totalorder %v7347_v3, 0  ;;  %vm3419_vm11 = vcmp.eq.s32.totalorder %v7347_v3, 2 }
 0x19a   : > { %vm1992_vm9 = vcmp.gt.s32.totalorder %v1991_v60, 0  ;;  %v1938_v27 = vadd.s32 536870912, %v1937_v19  ;;  %v1989_v31 = vor.u32 8388608, %v1988_v8  ;;  %v5774_v17 = vmov 2  }
 0x19b   : > { %v1856_v42 = vmul.f32 %v1855_v37, %v1853_v6  ;;  %v7358_v18 = vpop.eup %5672  ;;  %v1993_v7 = vsel %vm1992_vm9, %v1991_v60, 0  ;;  %5326 = vmatpush3.bf16.msra.mxu0 %v5614_v5  ;;  %5397 = vmatpush3.bf16.msra.mxu1 %v5614_v5  ;;  %vm1765_vm12 = vcmp.eq.s32.totalorder %v7356_v35, 0  ;;  %vm3415_vm14 = vcmp.lt.s32.totalorder %v7347_v3, 2  ;;  %v7415_v37 = vpop.permute.xlu1 %5528 }
 0x19c   : > { %v7360_v0 = vpop.eup %5674  ;;  %v1995_v26 = vand.u32 31, %v1993_v7  ;;  %5327 = vmatprep.subr.bf16.mxu0 %v5615_v15  ;;  %5599 = vset.pattern.permute.xlu0 %v5774_v17  ;;  %v1769_v21 = vxor.u32 2147483648, %v7358_v18  ;;  %v7369_v13 = vshrl.u32 %v1938_v27, 30  ;;  %v7375_v9 = vand.u32 3, %v1862_v47 }
 0x19d   : > { %v1857_v39 = vxor.u32 2147483648, %v1856_v42  ;;  %5395 = vmatprep.subr.bf16.mxu1 %v5615_v15  ;;  %vm1768_vm0 = vcmp.eq.s32.totalorder %v7356_v35, 2  ;;  %v1766_v54 = vxor.u32 2147483648, %v7360_v0  ;;  %v7379_v16 = vand.u32 3, %v1866_v57 }
 0x19e   : > { %v1996_v11 = vsub.s32 32, %v1995_v26  ;;  %v1940_v55 = vshll.u32 %v7369_v13, 30  ;;  %v7384_v24 = vadd.s32 %v7314_v44, %v7324_v10  ;;  %v7386_v28 = vshrl.u32 %v1993_v7, 5 }
 0x19f   : > { %v1858_v33 = vsel %vm1775_vm1, %v1857_v39, %v1856_v42  ;;  %5328 = vmatpush3.bf16.msra.mxu0 %v5615_v15  ;;  %5398 = vmatpush3.bf16.msra.mxu1 %v5615_v15  ;;  %v7388_v41 = vshll.u32 %v1989_v31, 8  ;;  %v3421_v59 = vsel %vm3419_vm11, %v1769_v21, %v7360_v0  ;;  %vm1764_vm13 = vcmp.lt.s32.totalorder %v7356_v35, 2  ;;  %v5534_v7 = vpop.permute.xlu1 %5533 }
 0x1a0   : > { %v1861_v20 = vsel %vm7337_vm7, %v7034_v63, %v1858_v33  ;;  %v7394_v48 = vsub.s32 %v1937_v19, %v1940_v55  ;;  %v1998_v61 = vshll.u32 %v5765_v30, %v1995_v26  ;;  %v1999_v40 = vshrl.u32 %v5766_v32, %v1996_v11 }
 0x1a1   : > { %5676 = vcosq.f32 %v1861_v20  ;;  %v1770_v44 = vsel %vm1768_vm0, %v1769_v21, %v7360_v0  ;;  %v2001_v50 = vshll.u32 %v5766_v32, %v1995_v26  ;;  %v2002_v49 = vshrl.u32 %v5767_v34, %v1996_v11 }
 0x1a2   : > { %5678 = vsinq.f32 %v1861_v20  ;;  %v2004_v56 = vshll.u32 %v5767_v34, %v1995_v26  ;;  %v3418_v2 = vsel %vm3416_vm10, %v7358_v18, %v1766_v54  ;;  %v1943_v10 = vsub.s32 0, %v7394_v48 }
 0x1a3   : > { %v2000_v12 = vor.u32 %v1999_v40, %v1998_v61  ;;  %v2005_v51 = vshrl.u32 %v5768_v36, %v1996_v11  ;;  %vm1761_vm15 = vweird.f32 %v6930_v45  ;;  %vm3522_vm1 = vcmp.eq.s32.totalorder %v7375_v9, 2 }
 0x1a4   : > { %vm1872_vm2 = vcmp.eq.s32.totalorder %v7379_v16, 2  ;;  %v2003_v32 = vor.u32 %v2002_v49, %v2001_v50  ;;  %v2007_v5 = vshll.u32 %v5768_v36, %v1995_v26  ;;  %v2008_v34 = vshrl.u32 %v5769_v38, %v1996_v11 }
 0x1a5   : > { %v2010_v53 = vshll.u32 %v5769_v38, %v1995_v26  ;;  %vm3519_vm3 = vcmp.eq.s32.totalorder %v7375_v9, 0  ;;  %vm1869_vm4 = vcmp.eq.s32.totalorder %v7379_v16, 0  ;;  %v5092_v23 = vmin.u32 %v1943_v10, %v7394_v48  ;;  %v5524_v26 = vpop.permute.xlu0 %5523 }
 0x1a6   : > { %v2006_v14 = vor.u32 %v2005_v51, %v2004_v56  ;;  %v2011_v4 = vshrl.u32 %v5770_v46, %v1996_v11  ;;  %vm2013_vm5 = vcmp.lt.s32.totalorder %v7386_v28, 1  ;;  %vm3518_vm6 = vcmp.lt.s32.totalorder %v7375_v9, 2 }
 0x1a7   : > { %vm1868_vm7 = vcmp.lt.s32.totalorder %v7379_v16, 2  ;;  %v1997_v36 = vshrl.u32 %v5765_v30, %v1996_v11  ;;  %v2009_v38 = vor.u32 %v2008_v34, %v2007_v5  ;;  %vm2015_vm8 = vcmp.lt.s32.totalorder %v7386_v28, 3  ;;  %v5544_v34 = vpop.permute.xlu1 %5543 }
 0x1a8   : > { %vm2016_vm9 = vcmp.lt.s32.totalorder %v7386_v28, 4  ;;  %vm1865_vm10 = vweird.f32 %v7034_v63  ;;  %v1945_v58 = vclz %v5092_v23  ;;  %v2012_v6 = vor.u32 %v2011_v4, %v2010_v53 }
 0x1a9   : > { %vm2014_vm11 = vcmp.lt.s32.totalorder %v7386_v28, 2  ;;  %v2018_v46 = vsel %vm2016_vm9, %v2006_v14, 2102212464  ;;  %v1767_v47 = vsel %vm1765_vm12, %v7358_v18, %v1766_v54  ;;  %v2021_v62 = vsel %vm2013_vm5, %v2000_v12, %v2003_v32 }
 0x1aa   : > { %v2022_v30 = vsel %vm2016_vm9, %v2009_v38, 920167782  ;;  %v2025_v8 = vsel %vm2013_vm5, %v2003_v32, %v2006_v14  ;;  %v3422_v60 = vsel %vm3415_vm14, %v3418_v2, %v3421_v59  ;;  %v5093_v15 = vadd.s32 4294967294, %v1945_v58 }
 0x1ab   : > { %v2023_v42 = vsel %vm2015_vm8, %v2006_v14, %v2022_v30  ;;  %v2026_v19 = vsel %vm2016_vm9, %v2012_v6, 1326507024  ;;  %v2017_v57 = vsel %vm2013_vm5, %v1997_v36, %v2000_v12  ;;  %v2019_v18 = vsel %vm2015_vm8, %v2003_v32, %v2018_v46  ;;  %v5539_v14 = vpop.permute.xlu0 %5538 }
 0x1ac   : > { %v2024_v39 = vsel %vm2014_vm11, %v2021_v62, %v2023_v42  ;;  %v2027_v27 = vsel %vm2015_vm8, %v2009_v38, %v2026_v19  ;;  %vm5094_vm12 = vcmp.lt.s32.totalorder %v5093_v15, 0  ;;  %v1771_v33 = vsel %vm1764_vm13, %v1767_v47, %v1770_v44  ;;  %v5554_v42 = vpop.permute.xlu1 %5553 }
 0x1ad   : > { %v2028_v3 = vsel %vm2014_vm11, %v2025_v8, %v2027_v27  ;;  %v7453_v0 = vmul.u32.u64.low %v7388_v41, %v2024_v39  ;;  %v7454_v31 = vmul.u32.u64.high %v7388_v41, %v2024_v39, %v7453_v0  ;;  %v1948_v20 = vsel %vm5094_vm12, 0, %v5093_v15 }
 0x1ae   : > { %v5677_v21 = vpop.eup %5676  ;;  %v7460_v11 = vmul.u32.u64.low %v7388_v41, %v2028_v3  ;;  %v7461_v54 = vmul.u32.u64.high %v7388_v41, %v2028_v3, %v7460_v11  ;;  %v1953_v61 = vsub.s32 4294967266, %v1948_v20  ;;  %v2020_v40 = vsel %vm2014_vm11, %v2017_v57, %v2019_v18 }
 0x1af   : > { %v5679_v55 = vpop.eup %5678  ;;  %v1873_v59 = vxor.u32 2147483648, %v5677_v21  ;;  %vm3861_vm14 = vcmask 146432   ;;  %v1949_v49 = vsub.s32 32, %v1948_v20  ;;  %v5536_v56 = vunpack.i.h.bf16 %v5534_v7 }
 0x1b0   : > { %v1870_v50 = vxor.u32 2147483648, %v5679_v55  ;;  %v5535_v2 = vunpack.i.l.bf16 %v5534_v7  ;;  %v3423_v35 = vsel %vm1761_vm15, nan, %v3422_v60  ;;  %v1772_v10 = vsel %vm1761_vm15, nan, %v1771_v33 }
 0x1b1   : > { %v3524_v44 = vsel %vm3522_vm1, %v1873_v59, %v5679_v55  ;;  %v1874_v12 = vsel %vm1872_vm2, %v1873_v59, %v5679_v55  ;;  %v1950_v32 = vshll.u32 %v7394_v48, %v1948_v20  ;;  %v2036_v5 = vmul.u32 %v7388_v41, %v2020_v40 }
 0x1b2   : > { %v3521_v28 = vsel %vm3519_vm3, %v5677_v21, %v1870_v50  ;;  %v1871_v51 = vsel %vm1869_vm4, %v5677_v21, %v1870_v50  ;;  %v1954_v23 = vadd.s32 127, %v1953_v61  ;;  %vm2038_vm0 = vc.u32 %v7461_v54, %v7453_v0 }
 0x1b3   : > { %v3525_v53 = vsel %vm3518_vm6, %v3521_v28, %v3524_v44  ;;  %v1875_v45 = vsel %vm1868_vm7, %v1871_v51, %v1874_v12  ;;  %v1951_v41 = vshrl.u32 %v7384_v24, %v1949_v49  ;;  %v2039_v36 = vadd.s32 1, %v7454_v31 }
 0x1b4   : > { %v3526_v4 = vsel %vm1865_vm10, nan, %v3525_v53  ;;  %v1876_v48 = vsel %vm1865_vm10, nan, %v1875_v45  ;;  %v5531_v16 = vunpack.i.h.bf16 %v7415_v37  ;;  %v5530_v58 = vunpack.i.l.bf16 %v7415_v37 }
 0x1b5   : > { %v5582_v9 = vpack.i.bf16 %v3526_v4, %v3423_v35  ;;  %v5577_v38 = vpack.i.bf16 %v1876_v48, %v1772_v10  ;;  %v2040_v6 = vsel %vm2038_vm0, %v2039_v36, %v7454_v31  ;;  %v5521_v46 = vunpack.i.h.bf16 %v7422_v43 }
 0x1b6   : > { %v5520_v47 = vunpack.i.l.bf16 %v7422_v43  ;;  %v1955_v63 = vshll.u32 %v1954_v23, 23  ;;  %v2041_v24 = vadd.s32 %v2040_v6, %v2036_v5  ;;  %v3864_v62 = vsel %vm3861_vm14, %v5530_v58, %v5535_v2  ;;  %v5549_v43 = vpop.permute.xlu0 %5548 }
 0x1b7   : > { %5583 = vrot.lane.b32.xlu1 %v5582_v9, %s5772_s17  ;;  %5578 = vrot.lane.b32.xlu0 %v5577_v38, %s5771_s16  ;;  %v3865_v30 = vsel %vm3861_vm14, %v5531_v16, %v5536_v56  ;;  %v1952_v8 = vor.u32 %v1951_v41, %v1950_v32  ;;  %v5526_v60 = vunpack.i.h.bf16 %v5524_v26  ;;  %v5525_v15 = vunpack.i.l.bf16 %v5524_v26 }
 0x1b8   : > { %v5546_v37 = vunpack.i.h.bf16 %v5544_v34  ;;  %v2042_v19 = vadd.s32 536870912, %v2041_v24  ;;  %v3879_v57 = vpack.c.bf16 %v3865_v30, %v3864_v62  ;;  %v5545_v18 = vunpack.i.l.bf16 %v5544_v34 }
 0x1b9   : > { %v5541_v39 = vunpack.i.h.bf16 %v5539_v14  ;;  %v5540_v27 = vunpack.i.l.bf16 %v5539_v14  ;;  %v3862_v7 = vsel %vm3861_vm14, %v5520_v47, %v5525_v15  ;;  %v3863_v3 = vsel %vm3861_vm14, %v5521_v46, %v5526_v60 }
 0x1ba   : > { %vm3913_vm13 = vcmask 293888   ;;  %v1956_v31 = vor.u32 4788187, %v1955_v63  ;;  %v7502_v21 = vshrl.u32 %v2042_v19, 30  ;;  %v3878_v20 = vpack.c.bf16 %v3863_v3, %v3862_v7 }
 0x1bb   : > { %v3867_v33 = vsel %vm3861_vm14, %v5541_v39, %v5546_v37  ;;  %v3866_v26 = vsel %vm3861_vm14, %v5540_v27, %v5545_v18  ;;  %v5556_v11 = vunpack.i.h.bf16 %v5554_v42  ;;  %v5555_v55 = vunpack.i.l.bf16 %v5554_v42 }
 0x1bc   : > { %v5551_v59 = vunpack.i.h.bf16 %v5549_v43  ;;  %v2044_v61 = vshll.u32 %v7502_v21, 30  ;;  %v3880_v40 = vpack.c.bf16 %v3867_v33, %v3866_v26  ;;  %5329 = vmatprep.mubr.msk.bf16.mxu0 %vm3913_vm13, %v3878_v20  ;;  %v5550_v50 = vunpack.i.l.bf16 %v5549_v43 }
 0x1bd   : > { %5330 = vmatmul.mubr.msk.bf16.vlgmr.msra.gmra.mxu0 %vm3913_vm13, %v3879_v57  ;;  %v1957_v56 = vand.u32 2147483647, %v1956_v31  ;;  %v1959_v2 = vcvt.s32.f32 %v1952_v8  ;;  %vm1879_vm15 = vcmp.lt.s32.totalorder %v7136_v1, 0  ;;  %v2037_v38 = vadd.s32 %v7453_v0, %v7461_v54 }
 0x1be   : > { %v5564_v49 = vpop.permute.xlu1 %5563  ;;  %v2045_v35 = vsub.s32 %v2041_v24, %v2044_v61  ;;  %v3869_v44 = vsel %vm3861_vm14, %v5551_v59, %v5556_v11  ;;  %5333 = vmatprep.mubr.msk.bf16.mxu0 %vm3913_vm13, %v3880_v40  ;;  %v5559_v10 = vpop.permute.xlu0 %5558  ;;  %v3868_v12 = vsel %vm3861_vm14, %v5550_v50, %v5555_v55  ;;  %vm7521_vm2 = vcmp.le.f32.partialorder %v1877_v25, 0.7853982 }
 0x1bf   : > { %v5566_v28 = vunpack.i.h.bf16 %v5564_v49  ;;  %v5565_v51 = vunpack.i.l.bf16 %v5564_v49  ;;  %v3881_v5 = vpack.c.bf16 %v3869_v44, %v3868_v12  ;;  %v5561_v34 = vunpack.i.h.bf16 %v5559_v10 }
 0x1c0   : > { %v2047_v32 = vsub.s32 0, %v2045_v35  ;;  %v5560_v53 = vunpack.i.l.bf16 %v5559_v10  ;;  %v1960_v45 = vmul.f32 %v1959_v2, %v1957_v56  ;;  %v1963_v25 = vsub.s32 4, %v7369_v13 }
 0x1c1   : > { %v3871_v4 = vsel %vm3861_vm14, %v5561_v34, %v5566_v28  ;;  %vm1983_vm3 = vcmp.lt.s32.totalorder %v7304_v29, 0  ;;  %v2067_v19 = vsub.s32 4, %v7502_v21  ;;  %vm1982_vm4 = vcmp.le.f32.partialorder %v1981_v52, 0.7853982 }
 0x1c2   : > { %v5096_v23 = vmin.u32 %v2047_v32, %v2045_v35  ;;  %v3870_v14 = vsel %vm3861_vm14, %v5560_v53, %v5565_v51  ;;  %v1961_v36 = vxor.u32 2147483648, %v1960_v45  ;;  %v1964_v37 = vsel %vm1879_vm15, %v1963_v25, %v7369_v13  ;;  %v5694_v25 = vld [vmem:[%s5899_s15 + $0x58] sm:$0xff] }
 0x1c3   : > { %v3882_v41 = vpack.c.bf16 %v3871_v4, %v3870_v14  ;;  %v1966_v18 = vsel %vm7521_vm2, 0, %v1964_v37  ;;  %v2068_v43 = vsel %vm1983_vm3, %v2067_v19, %v7502_v21  ;;  %vm1969_vm11 = vweird.f32 %v7136_v1  ;;  %v5698_v37 = vld [vmem:[%s5899_s15 + $0x68] sm:$0xff] }
 0x1c4   : > { %v2049_v48 = vclz %v5096_v23  ;;  %v1962_v6 = vsel %vm1879_vm15, %v1961_v36, %v1960_v45  ;;  %v1970_v7 = vadd.s32 3, %v1966_v18  ;;  %v2070_v13 = vsel %vm1982_vm4, 0, %v2068_v43  ;;  %v5689_v36 = vld [vmem:[%s5899_s15] sm:$0xff] }
 0x1c5   : > { %5334 = vmatmul.mubr.msk.bf16.gmra.mxu0 %vm3913_vm13, %v3881_v5  ;;  %5337 = vmatprep.mubr.msk.bf16.mxu1 %vm3913_vm13, %v3882_v41  ;;  %v1965_v0 = vsel %vm7521_vm2, %v7136_v1, %v1962_v6  ;;  %v3620_v33 = vand.u32 3, %v1966_v18  ;;  %v2074_v26 = vadd.s32 3, %v2070_v13  ;;  %v3723_v55 = vand.u32 3, %v2070_v13  ;;  %v5688_v41 = vld [vmem:[%s5899_s15 + $0x8] sm:$0xff] }
 0x1c6   : > { %v5097_v9 = vadd.s32 4294967294, %v2049_v48  ;;  %5680 = vcosq.f32 %v1965_v0  ;;  %v1971_v20 = vand.u32 3, %v1970_v7 }
 0x1c7   : > { %5682 = vsinq.f32 %v1965_v0  ;;  %vm3622_vm5 = vcmp.eq.s32.totalorder %v3620_v33, 0  ;;  %vm3625_vm6 = vcmp.eq.s32.totalorder %v3620_v33, 2  ;;  %v2075_v59 = vand.u32 3, %v2074_v26  ;;  %v5702_v26 = vld [vmem:[%s5899_s15 + $0x70] sm:$0xff] }
 0x1c8   : > { %vm5098_vm1 = vcmp.lt.s32.totalorder %v5097_v9, 0  ;;  %vm1973_vm7 = vcmp.eq.s32.totalorder %v1971_v20, 0  ;;  %vm1976_vm8 = vcmp.eq.s32.totalorder %v1971_v20, 2  ;;  %vm3621_vm9 = vcmp.lt.s32.totalorder %v3620_v33, 2  ;;  %v5701_v33 = vld [vmem:[%s5899_s15 + $0x50] sm:$0xff] }
 0x1c9   : > { %v2052_v58 = vsel %vm5098_vm1, 0, %v5097_v9  ;;  %vm1972_vm10 = vcmp.lt.s32.totalorder %v1971_v20, 2  ;;  %vm3725_vm12 = vcmp.eq.s32.totalorder %v3723_v55, 0  ;;  %vm3728_vm0 = vcmp.eq.s32.totalorder %v3723_v55, 2  ;;  %v5616_v20 = vld [vmem:[%s7916_s4 + $0x18] sm:$0xff]  }
 0x1ca   : > { %v2053_v46 = vsub.s32 32, %v2052_v58  ;;  %v2054_v47 = vshll.u32 %v2045_v35, %v2052_v58  ;;  %v2057_v63 = vsub.s32 4294967266, %v2052_v58  ;;  %vm2080_vm15 = vcmp.eq.s32.totalorder %v2075_v59, 2  ;;  %5345 = vmatprep.subr.bf16.mxu1 %v5616_v20 }
 0x1cb   : > { %vm2077_vm1 = vcmp.eq.s32.totalorder %v2075_v59, 0  ;;  %vm3724_vm2 = vcmp.lt.s32.totalorder %v3723_v55, 2  ;;  %v5775_v0 = vmov 1  }
 0x1cc   : > { %v2055_v24 = vshrl.u32 %v2037_v38, %v2053_v46  ;;  %v2058_v62 = vadd.s32 127, %v2057_v63  ;;  %v5690_v46 = vld [vmem:[%s5899_s15 + $0x10] sm:$0xff] }
 0x1ce   : > { %v2056_v54 = vor.u32 %v2055_v24, %v2054_v47  ;;  %v2059_v30 = vshll.u32 %v2058_v62, 23  ;;  %v5691_v24 = vld [vmem:[%s5899_s15 + $0x18] sm:$0xff] }
 0x1d0   : > { %v2060_v8 = vor.u32 4788187, %v2059_v30  ;;  %v2063_v60 = vcvt.s32.f32 %v2056_v54  ;;  %v5692_v54 = vld [vmem:[%s5899_s15 + $0x28] sm:$0xff]  ;;  %v5693_v30 = vld [vmem:[%s5899_s15 + $0x40] sm:$0xff] }
 0x1d2   : > { %v2061_v15 = vand.u32 2147483647, %v2060_v8  ;;  %v5695_v8 = vld [vmem:[%s5899_s15 + $0x20] sm:$0xff] }
 0x1d3   : > { %v5681_v3 = vpop.eup %5680 }
 0x1d4   : > { %v2064_v42 = vmul.f32 %v2063_v60, %v2061_v15  ;;  %v5683_v31 = vpop.eup %5682  ;;  %v1977_v52 = vxor.u32 2147483648, %v5681_v3  ;;  %v5696_v60 = vld [vmem:[%s5899_s15 + $0x30] sm:$0xff]  ;;  %v5697_v15 = vld [vmem:[%s5899_s15 + $0x38] sm:$0xff] }
 0x1d5   : > { %v1974_v11 = vxor.u32 2147483648, %v5683_v31 }
 0x1d6   : > { %v2065_v57 = vxor.u32 2147483648, %v2064_v42  ;;  %v3627_v61 = vsel %vm3625_vm6, %v1977_v52, %v5683_v31  ;;  %v1978_v50 = vsel %vm1976_vm8, %v1977_v52, %v5683_v31  ;;  %v5700_v31 = vld [vmem:[%s5899_s15 + $0x60] sm:$0xff] }
 0x1d7   : > { %v3624_v21 = vsel %vm3622_vm5, %v5681_v3, %v1974_v11  ;;  %v1975_v40 = vsel %vm1973_vm7, %v5681_v3, %v1974_v11  ;;  %v5699_v3 = vld [vmem:[%s5899_s15 + $0x48] sm:$0xff]  ;;  %v5617_v11 = vld [vmem:[%s7916_s4 + $0x10] sm:$0xff]  }
 0x1d8   : > { %v2066_v39 = vsel %vm1983_vm3, %v2065_v57, %v2064_v42  ;;  %v3628_v35 = vsel %vm3621_vm9, %v3624_v21, %v3627_v61  ;;  %v1979_v44 = vsel %vm1972_vm10, %v1975_v40, %v1978_v50  ;;  %vm2076_vm3 = vcmp.lt.s32.totalorder %v2075_v59, 2  ;;  %v5619_v59 = vld [vmem:[%s7916_s4] sm:$0xff]  }
 0x1d9   : > { %v2069_v27 = vsel %vm1982_vm4, %v7304_v29, %v2066_v39  ;;  %vm2073_vm4 = vweird.f32 %v7304_v29  ;;  %v3629_v51 = vsel %vm1969_vm11, nan, %v3628_v35  ;;  %v1980_v5 = vsel %vm1969_vm11, nan, %v1979_v44 }
 0x1da   : > { %5684 = vcosq.f32 %v2069_v27 }
 0x1db   : > { %5686 = vsinq.f32 %v2069_v27 }
 0x1e7   : > { %v5685_v49 = vpop.eup %5684 }
 0x1e8   : > { %v5687_v56 = vpop.eup %5686  ;;  %v2081_v2 = vxor.u32 2147483648, %v5685_v49 }
 0x1e9   : > { %v2078_v10 = vxor.u32 2147483648, %v5687_v56 }
 0x1ea   : > { %v3730_v12 = vsel %vm3728_vm0, %v2081_v2, %v5687_v56  ;;  %v2082_v28 = vsel %vm2080_vm15, %v2081_v2, %v5687_v56 }
 0x1eb   : > { %v3727_v32 = vsel %vm3725_vm12, %v5685_v49, %v2078_v10  ;;  %v2079_v34 = vsel %vm2077_vm1, %v5685_v49, %v2078_v10 }
 0x1ec   : > { %v3731_v53 = vsel %vm3724_vm2, %v3727_v32, %v3730_v12  ;;  %v2083_v45 = vsel %vm2076_vm3, %v2079_v34, %v2082_v28 }
 0x1ed   : > { %v3732_v23 = vsel %vm2073_vm4, nan, %v3731_v53  ;;  %v2084_v14 = vsel %vm2073_vm4, nan, %v2083_v45 }
 0x1ee   : > { %v5592_v4 = vpack.i.bf16 %v3732_v23, %v3629_v51  ;;  %v5587_v48 = vpack.i.bf16 %v2084_v14, %v1980_v5 }
 0x1f0   : > { %5593 = vrot.lane.b32.xlu1 %v5592_v4, %s5772_s17  ;;  %5588 = vrot.lane.b32.xlu0 %v5587_v48, %s5771_s16  ;;  %s5030_s17 = sshll.u32 %s388_s30, 6  ;;  %s5707_s16 = sshll.u32 %s5776_s12, 4  ;;  %s5708_s16 = int_to_ptr.vmem [resolvable:$false] %s5707_s16 }
 0x1f1   : > { %s7839_s18 = scalar_lea.vmem [#allocation3], %s5030_s17  ;;  %s5709_s17 = scalar_lea.vmem %s5708_s16, 2048 }
 0x1f2   : > { %s4939_s25 = sshll.u32 %s7839_s18, 4  ;;  %s7866_s25 = int_to_ptr.vmem [resolvable:$true] %s4939_s25 }
 0x1f3   : > { %p5710_p0 = scmp.lt.s32.totalorder %s7866_s25, %s5708_s16 }
 0x1f4   : > { %4047 = vperm.xlu1 %5597, %v5688_v41   ;;  %4257 = vperm.xlu0 %5599, %v5689_v36  }
 0x1f5   : > { %v5574_v9 = vpop.permute.xlu1 %5573  ;;  %v5569_v1 = vpop.permute.xlu0 %5568 }
 0x1f6   : > { %v5576_v38 = vunpack.i.h.bf16 %v5574_v9  ;;  %v5575_v16 = vunpack.i.l.bf16 %v5574_v9  ;;  %v5571_v58 = vunpack.i.h.bf16 %v5569_v1  ;;  %v5570_v6 = vunpack.i.l.bf16 %v5569_v1 }
 0x1f8   : > { %4052 = vperm.xlu1 %5597, %v5690_v46   ;;  %v3873_v47 = vsel %vm3861_vm14, %v5571_v58, %v5576_v38  ;;  %v3872_v63 = vsel %vm3861_vm14, %v5570_v6, %v5575_v16  ;;  %4269 = vperm.xlu0 %5599, %v5691_v24  }
 0x1f9   : > { %v3883_v62 = vpack.c.bf16 %v3873_v47, %v3872_v63 }
 0x1fb   : > { %5338 = vmatmul.mubr.msk.bf16.vlgmr.msra.gmra.mxu1 %vm3913_vm13, %v3883_v62  ;;  %v7619_v62 = vld [vmem:[%s7915_s3] ss:$0 sm:$0xff] }
 0x1fc   : > { %5598 = vset.pattern.permute.xlu1 %v5775_v0  ;;  %4277 = vperm.xlu0 %5599, %v5692_v54  }
 0x1fd   : > { %4157 = vperm.xlu1 %5598, %v5689_v36   ;;  %5346 = vmatpush3.bf16.msra.mxu1 %v5616_v20 }
 0x1fe   : > { %5347 = vmatprep.subr.bf16.mxu1 %v5617_v11 }
 0x200   : > { %4289 = vperm.xlu0 %5599, %v5693_v30  }
 0x201   : > { %4165 = vperm.xlu1 %5598, %v5690_v46   ;;  %5348 = vmatpush3.bf16.msra.mxu1 %v5617_v11 }
 0x204   : > { %4301 = vperm.xlu0 %5599, %v5694_v25  }
 0x205   : > { %4169 = vperm.xlu1 %5598, %v5691_v24  }
 0x208   : > { %5607 = vset.pattern.permute.xlu0 %v5773_v22 }
 0x209   : > { %5600 = vset.pattern.permute.xlu1 %v5774_v17  ;;  %4042 = vperm.xlu0 %5607, %v5689_v36  }
 0x20a   : > { %4261 = vperm.xlu1 %5600, %v5688_v41  }
 0x20d   : > { %4057 = vperm.xlu0 %5607, %v5691_v24  }
 0x20e   : > { %4265 = vperm.xlu1 %5600, %v5690_v46   ;;  %v4039_v46 = vld [vmem:[%s7913_s1] sm:$0x7] }
 0x211   : > { %4067 = vperm.xlu0 %5607, %v5692_v54  }
 0x212   : > { %5601 = vset.pattern.permute.xlu1 %v5773_v22 }
 0x213   : > { %4062 = vperm.xlu1 %5601, %v5695_v8  }
 0x215   : > { %4082 = vperm.xlu0 %5607, %v5693_v30  }
 0x217   : > { %4072 = vperm.xlu1 %5601, %v5696_v60  }
 0x219   : > { %4097 = vperm.xlu0 %5607, %v5694_v25  }
 0x21b   : > { %4077 = vperm.xlu1 %5601, %v5697_v15  }
 0x21d   : > { %4107 = vperm.xlu0 %5607, %v5698_v37  }
 0x21f   : > { %5602 = vset.pattern.permute.xlu1 %v5775_v0 }
 0x220   : > { %4177 = vperm.xlu1 %5602, %v5692_v54  }
 0x221   : > { %5609 = vset.pattern.permute.xlu0 %v5775_v0 }
 0x222   : > { %4161 = vperm.xlu0 %5609, %v5688_v41   ;;  %v4120_v41 = vlaneseq }
 0x224   : > { %4181 = vperm.xlu1 %5602, %v5696_v60   ;;  %v4121_v1 = vshrl.u32 %v4120_v41, 7 }
 0x226   : > { %4173 = vperm.xlu0 %5609, %v5695_v8   ;;  %v4122_v58 = vsub.s32 0, %v4121_v1  ;;  %v4222_v47 = vsub.s32 1, %v4121_v1 }
 0x228   : > { %5603 = vset.pattern.permute.xlu1 %v5774_v17 }
 0x229   : > { %v5584_v42 = vpop.permute.xlu1 %5583  ;;  %v5579_v19 = vpop.permute.xlu0 %5578  ;;  %4273 = vperm.xlu1 %5603, %v5695_v8  }
 0x22a   : > { %v5586_v57 = vunpack.i.h.bf16 %v5584_v42  ;;  %v5585_v18 = vunpack.i.l.bf16 %v5584_v42  ;;  %v5581_v39 = vunpack.i.h.bf16 %v5579_v19  ;;  %v5580_v43 = vunpack.i.l.bf16 %v5579_v19  ;;  %4185 = vperm.xlu0 %5609, %v5697_v15  }
 0x22b   : > { %v4322_v19 = vsub.s32 2, %v4121_v1 }
 0x22c   : > { %v3875_v27 = vsel %vm3861_vm14, %v5581_v39, %v5586_v57  ;;  %v3874_v7 = vsel %vm3861_vm14, %v5580_v43, %v5585_v18 }
 0x22d   : > { %v3884_v13 = vpack.c.bf16 %v3875_v27, %v3874_v7  ;;  %4281 = vperm.xlu1 %5603, %v5696_v60   ;;  %v7638_v20 = vrot.slane %v4039_v46, %v4322_v19 }
 0x22e   : > { %4193 = vperm.xlu0 %5609, %v5699_v3  }
 0x22f   : > { %5341 = vmatprep.mubr.msk.bf16.mxu1 %vm3913_vm13, %v3884_v13 }
 0x231   : > { %4285 = vperm.xlu1 %5603, %v5697_v15  }
 0x232   : > { %4205 = vperm.xlu0 %5609, %v5700_v31  }
 0x235   : > { %5604 = vset.pattern.permute.xlu1 %v5773_v22 }
 0x236   : > { %4087 = vperm.xlu1 %5604, %v5699_v3   ;;  %4217 = vperm.xlu0 %5609, %v7304_v29  }
 0x23a   : > { %4092 = vperm.xlu1 %5604, %v5701_v33   ;;  %5612 = vset.pattern.permute.xlu0 %v5774_v17 }
 0x23b   : > { %4309 = vperm.xlu0 %5612, %v5698_v37  }
 0x23e   : > { %5605 = vset.pattern.permute.xlu1 %v5775_v0 }
 0x23f   : > { %4189 = vperm.xlu1 %5605, %v5693_v30  }
 0x243   : > { %4197 = vperm.xlu1 %5605, %v5701_v33  }
 0x247   : > { %4201 = vperm.xlu1 %5605, %v5694_v25   ;;  %v7624_v25 = vrot.slane %v4039_v46, %v4222_v47 }
 0x24b   : > { %5606 = vset.pattern.permute.xlu1 %v5774_v17 }
 0x24c   : > { %4293 = vperm.xlu1 %5606, %v5699_v3  }
 0x250   : > { %4297 = vperm.xlu1 %5606, %v5701_v33  }
 0x254   : > { %5608 = vset.pattern.permute.xlu1 %v5773_v22  ;;  %v5618_v22 = vld [vmem:[%s7916_s4 + $0x8] sm:$0xff]  }
 0x255   : > { %4102 = vperm.xlu1 %5608, %v5700_v31   ;;  %5349 = vmatprep.subr.bf16.mxu1 %v5618_v22 }
 0x256   : > { %5350 = vmatpush3.bf16.msra.mxu1 %v5618_v22 }
 0x257   : > { %5351 = vmatprep.subr.bf16.mxu1 %v5619_v59 }
 0x259   : > { %4112 = vperm.xlu1 %5608, %v5702_v26  }
 0x25a   : > { %5352 = vmatpush3.bf16.msra.mxu1 %v5619_v59 }
 0x25d   : > { %4117 = vperm.xlu1 %5608, %v7304_v29  }
 0x261   : > { %5610 = vset.pattern.permute.xlu1 %v5775_v0  ;;  %v7621_v0 = vrot.slane %v4039_v46, %v4122_v58 }
 0x262   : > { %v5594_v52 = vpop.permute.xlu1 %5593  ;;  %v5589_v55 = vpop.permute.xlu0 %5588  ;;  %4209 = vperm.xlu1 %5610, %v5698_v37  }
 0x263   : > { %v5596_v21 = vunpack.i.h.bf16 %v5594_v52  ;;  %v5595_v61 = vunpack.i.l.bf16 %v5594_v52  ;;  %v5591_v40 = vunpack.i.h.bf16 %v5589_v55  ;;  %v5590_v50 = vunpack.i.l.bf16 %v5589_v55 }
 0x265   : > { %v3877_v49 = vsel %vm3861_vm14, %v5591_v40, %v5596_v21  ;;  %v3876_v56 = vsel %vm3861_vm14, %v5590_v50, %v5595_v61  ;;  %vm4419_vm14 = vcmask 523264  }
 0x266   : > { %v3885_v2 = vpack.c.bf16 %v3877_v49, %v3876_v56  ;;  %4213 = vperm.xlu1 %5610, %v5702_v26  }
 0x268   : > { %5342 = vmatmul.mubr.msk.bf16.gmra.mxu1 %vm3913_vm13, %v3885_v2  ;;  %vm4899_vm13 = vcmask 7168  }
 0x26a   : > { %5611 = vset.pattern.permute.xlu1 %v5774_v17 }
 0x26b   : > { %4305 = vperm.xlu1 %5611, %v5700_v31  }
 0x26f   : > { %4313 = vperm.xlu1 %5611, %v5702_v26   ;;  %v4048_v35 = vpop.permute.xlu1 %4047  ;;  %v7602_v44 = vpop.permute.xlu0 %4257 }
 0x270   : > { %v4125_v11 = vmul.f32 %v7621_v0, %v4048_v35  ;;  %v4324_v2 = vmul.f32 %v7638_v20, %v7602_v44 }
 0x273   : > { %4317 = vperm.xlu1 %5611, %v7304_v29   ;;  %v4053_v10 = vpop.permute.xlu1 %4052  ;;  %v4270_v12 = vpop.permute.xlu0 %4269 }
 0x274   : > { %v4126_v57 = vmul.f32 %v7621_v0, %v4053_v10  ;;  %v4327_v21 = vmul.f32 %v7638_v20, %v4270_v12 }
 0x277   : > { %v7605_v28 = vpop.permute.xlu0 %4277 }
 0x278   : > { %v4158_v51 = vpop.permute.xlu1 %4157  ;;  %v4329_v44 = vmul.f32 %v7638_v20, %v7605_v28 }
 0x279   : > { %v4224_v22 = vmul.f32 %v7624_v25, %v4158_v51 }
 0x27b   : > { %v7607_v32 = vpop.permute.xlu0 %4289 }
 0x27c   : > { %v4166_v5 = vpop.permute.xlu1 %4165 }
 0x27d   : > { %v5331_v34 = vpop.f32.mrf.mxu0  ;;  %v4226_v52 = vmul.f32 %v7624_v25, %v4166_v5 }
 0x27e   : > { %v3985_v15 = vadd.f32 %v5331_v34, %v7619_v62 }
 0x27f   : > { %v7609_v53 = vpop.permute.xlu0 %4301  ;;  %v3976_v45 = vpop.f32.mrf.mxu0 }
 0x280   : > { %v4170_v17 = vpop.permute.xlu1 %4169  ;;  %v3977_v37 = vadd.f32 %v7619_v62, %v3976_v45  ;;  %v4142_v3 = vadd.f32 %v4126_v57, %v3985_v15 }
 0x281   : > { %v5332_v23 = vpop.f32.mrf.mxu0  ;;  %v4227_v7 = vmul.f32 %v7624_v25, %v4170_v17 }
 0x282   : > { %v3988_v30 = vadd.f32 %v5332_v23, %v7619_v62  ;;  %v4242_v40 = vadd.f32 %v4226_v52, %v4142_v3 }
 0x283   : > { %v3979_v4 = vpop.f32.mrf.mxu0 }
 0x284   : > { %v4043_v14 = vpop.permute.xlu0 %4042  ;;  %v3980_v33 = vadd.f32 %v7619_v62, %v3979_v4 }
 0x285   : > { %v4262_v48 = vpop.permute.xlu1 %4261  ;;  %v5335_v29 = vpop.f32.mrf.mxu0  ;;  %v4124_v18 = vmul.f32 %v7621_v0, %v4043_v14 }
 0x286   : > { %v4141_v49 = vadd.f32 %v4125_v11, %v3980_v33  ;;  %v4325_v12 = vmul.f32 %v7638_v20, %v4262_v48 }
 0x287   : > { %v3992_v16 = vpop.f32.mrf.mxu0  ;;  %v4140_v31 = vadd.f32 %v4124_v18, %v3977_v37 }
 0x288   : > { %v4058_v36 = vpop.permute.xlu0 %4057  ;;  %v3993_v56 = vadd.f32 %v7619_v62, %v3992_v16 }
 0x289   : > { %v4266_v9 = vpop.permute.xlu1 %4265  ;;  %v5336_v24 = vpop.f32.mrf.mxu0  ;;  %v4127_v8 = vmul.f32 %v7621_v0, %v4058_v36  ;;  %v4240_v50 = vadd.f32 %v4224_v22, %v4140_v31 }
 0x28a   : > { %v4326_v51 = vmul.f32 %v7638_v20, %v4266_v9  ;;  %v4004_v48 = vadd.f32 %v5336_v24, %v7619_v62 }
 0x28b   : > { %v3995_v42 = vpop.f32.mrf.mxu0  ;;  %v4143_v39 = vadd.f32 %v4127_v8, %v3988_v30  ;;  %v4340_v4 = vadd.f32 %v4324_v2, %v4240_v50 }
 0x28c   : > { %v4068_v38 = vpop.permute.xlu0 %4067  ;;  %v3996_v27 = vadd.f32 %v7619_v62, %v3995_v42  ;;  %v4342_v14 = vadd.f32 %v4326_v51, %v4242_v40 }
 0x28d   : > { %v4129_v26 = vmul.f32 %v7621_v0, %v4068_v38  ;;  %v4243_v55 = vadd.f32 %v4227_v7, %v4143_v39  ;;  %v4001_v38 = vadd.f32 %v5335_v29, %v7619_v62  ;;  %v4356_v8 = vmax.f32 %v4340_v4, 0.0 }
 0x28e   : > { %v4063_v6 = vpop.permute.xlu1 %4062  ;;  %v4358_v30 = vmax.f32 %v4342_v14, 0.0 }
 0x28f   : > { %v4145_v61 = vadd.f32 %v4129_v26, %v3996_v27  ;;  %v4128_v5 = vmul.f32 %v7621_v0, %v4063_v6  ;;  %v4343_v45 = vadd.f32 %v4327_v21, %v4243_v55 }
 0x290   : > { %v7614_v63 = vpop.permute.xlu0 %4082 }
 0x291   : > { %v4144_v36 = vadd.f32 %v4128_v5, %v3993_v56  ;;  %v4359_v16 = vmax.f32 %v4343_v45, 0.0  ;;  %v4132_v51 = vmul.f32 %v7621_v0, %v7614_v63 }
 0x292   : > { %v4073_v54 = vpop.permute.xlu1 %4072 }
 0x293   : > { %v4130_v6 = vmul.f32 %v7621_v0, %v4073_v54  ;;  %v4373_v29 = vpack.c.bf16 %v4359_v16, %v4358_v30 }
 0x294   : > { %v7627_v60 = vpop.permute.xlu0 %4097 }
 0x295   : > { %v4146_v19 = vadd.f32 %v4130_v6, %v4001_v38 }
 0x296   : > { %v4078_v43 = vpop.permute.xlu1 %4077 }
 0x297   : > { %v4131_v42 = vmul.f32 %v7621_v0, %v4078_v43 }
 0x298   : > { %v7635_v13 = vpop.permute.xlu0 %4107 }
 0x299   : > { %v4147_v54 = vadd.f32 %v4131_v42, %v4004_v48  ;;  %v4332_v48 = vmul.f32 %v7638_v20, %v7607_v32 }
 0x29b   : > { %v4178_v59 = vpop.permute.xlu1 %4177 }
 0x29c   : > { %v4229_v10 = vmul.f32 %v7624_v25, %v4178_v59 }
 0x29d   : > { %v4162_v35 = vpop.permute.xlu0 %4161 }
 0x29e   : > { %v4225_v34 = vmul.f32 %v7624_v25, %v4162_v35  ;;  %v4245_v23 = vadd.f32 %v4229_v10, %v4145_v61  ;;  %v5620_v10 = vld [vmem:[%s7918_s6 + $0x18] sm:$0xff]  }
 0x29f   : > { %v4182_v17 = vpop.permute.xlu1 %4181  ;;  %5369 = vmatprep.subr.bf16.mxu0 %v5620_v10 }
 0x2a0   : > { %v4241_v41 = vadd.f32 %v4225_v34, %v4141_v49  ;;  %v4345_v46 = vadd.f32 %v4329_v44, %v4245_v23  ;;  %v4230_v18 = vmul.f32 %v7624_v25, %v4182_v17  ;;  %5370 = vmatpush3.bf16.msra.mxu0 %v5620_v10 }
 0x2a1   : > { %v4174_v1 = vpop.permute.xlu0 %4173 }
 0x2a2   : > { %v4228_v9 = vmul.f32 %v7624_v25, %v4174_v1  ;;  %v4341_v58 = vadd.f32 %v4325_v12, %v4241_v41  ;;  %v4361_v27 = vmax.f32 %v4345_v46, 0.0  ;;  %v4246_v31 = vadd.f32 %v4230_v18, %v4146_v19 }
 0x2a3   : > { %v4135_v12 = vmul.f32 %v7621_v0, %v7627_v60 }
 0x2a4   : > { %v4274_v47 = vpop.permute.xlu1 %4273  ;;  %v4357_v15 = vmax.f32 %v4341_v58, 0.0  ;;  %v4244_v37 = vadd.f32 %v4228_v9, %v4144_v36 }
 0x2a5   : > { %v4328_v28 = vmul.f32 %v7638_v20, %v4274_v47  ;;  %v4186_v7 = vpop.permute.xlu0 %4185 }
 0x2a6   : > { %v4372_v57 = vpack.c.bf16 %v4357_v15, %v4356_v8  ;;  %v4231_v3 = vmul.f32 %v7624_v25, %v4186_v7  ;;  %v4335_v15 = vmul.f32 %v7638_v20, %v7609_v53 }
 0x2a7   : > { %v4344_v39 = vadd.f32 %v4328_v28, %v4244_v37 }
 0x2a8   : > { %v4282_v24 = vpop.permute.xlu1 %4281  ;;  %5353 = vmatprep.mubr.msk.bf16.mxu1 %vm4419_vm14, %v4372_v57  ;;  %v4247_v26 = vadd.f32 %v4231_v3, %v4147_v54 }
 0x2a9   : > { %v4360_v33 = vmax.f32 %v4344_v39, 0.0  ;;  %5354 = vmatmul.mubr.msk.bf16.vlgmr.msra.gmra.mxu1 %vm4419_vm14, %v4373_v29  ;;  %v4330_v43 = vmul.f32 %v7638_v20, %v4282_v24  ;;  %v4194_v44 = vpop.permute.xlu0 %4193 }
 0x2aa   : > { %v4233_v9 = vmul.f32 %v7624_v25, %v4194_v44 }
 0x2ab   : > { %v4374_v11 = vpack.c.bf16 %v4361_v27, %v4360_v33  ;;  %v4346_v55 = vadd.f32 %v4330_v43, %v4246_v31  ;;  %v5621_v31 = vld [vmem:[%s7918_s6 + $0x10] sm:$0xff]   ;;  %v5622_v33 = vld [vmem:[%s7918_s6 + $0x8] sm:$0xff]   ;;  %v5623_v43 = vld [vmem:[%s7918_s6] sm:$0xff]  }
 0x2ac   : > { %v4286_v22 = vpop.permute.xlu1 %4285  ;;  %5371 = vmatprep.subr.bf16.mxu0 %v5621_v31 }
 0x2ad   : > { %v4331_v52 = vmul.f32 %v7638_v20, %v4286_v22  ;;  %5357 = vmatprep.mubr.msk.bf16.mxu1 %vm4419_vm14, %v4374_v11  ;;  %v4362_v61 = vmax.f32 %v4346_v55, 0.0  ;;  %5372 = vmatpush3.bf16.msra.mxu0 %v5621_v31 }
 0x2ae   : > { %5373 = vmatprep.subr.bf16.mxu0 %v5622_v33 }
 0x2af   : > { %v4347_v59 = vadd.f32 %v4331_v52, %v4247_v26 }
 0x2b1   : > { %v4088_v21 = vpop.permute.xlu1 %4087  ;;  %v4363_v40 = vmax.f32 %v4347_v59, 0.0  ;;  %5374 = vmatpush3.bf16.msra.mxu0 %v5622_v33 }
 0x2b2   : > { %v4133_v14 = vmul.f32 %v7621_v0, %v4088_v21  ;;  %5375 = vmatprep.subr.bf16.mxu0 %v5623_v43  ;;  %v4206_v21 = vpop.permute.xlu0 %4205 }
 0x2b3   : > { %v4375_v50 = vpack.c.bf16 %v4363_v40, %v4362_v61 }
 0x2b5   : > { %v4093_v49 = vpop.permute.xlu1 %4092  ;;  %5358 = vmatmul.mubr.msk.bf16.gmra.mxu1 %vm4419_vm14, %v4375_v50  ;;  %5376 = vmatpush3.bf16.msra.mxu0 %v5623_v43 }
 0x2b6   : > { %v4134_v16 = vmul.f32 %v7621_v0, %v4093_v49  ;;  %v4218_v50 = vpop.permute.xlu0 %4217 }
 0x2b7   : > { %v4239_v44 = vmul.f32 %v7624_v25, %v4218_v50 }
 0x2ba   : > { %v4190_v56 = vpop.permute.xlu1 %4189 }
 0x2bb   : > { %v5339_v2 = vpop.f32.mrf.mxu1  ;;  %v4232_v41 = vmul.f32 %v7624_v25, %v4190_v56 }
 0x2bc   : > { %v4017_v63 = vadd.f32 %v5339_v2, %v7619_v62 }
 0x2bd   : > { %v4008_v35 = vpop.f32.mrf.mxu1 }
 0x2be   : > { %v4198_v5 = vpop.permute.xlu1 %4197  ;;  %v4009_v34 = vadd.f32 %v7619_v62, %v4008_v35  ;;  %v4150_v46 = vadd.f32 %v4134_v16, %v4017_v63 }
 0x2bf   : > { %v5340_v45 = vpop.f32.mrf.mxu1  ;;  %v4234_v37 = vmul.f32 %v7624_v25, %v4198_v5 }
 0x2c0   : > { %v4148_v17 = vadd.f32 %v4132_v51, %v4009_v34  ;;  %v4020_v23 = vadd.f32 %v5340_v45, %v7619_v62  ;;  %v4236_v34 = vmul.f32 %v7624_v25, %v4206_v21 }
 0x2c1   : > { %v4011_v4 = vpop.f32.mrf.mxu1  ;;  %v4250_v19 = vadd.f32 %v4234_v37, %v4150_v46 }
 0x2c2   : > { %v4202_v36 = vpop.permute.xlu1 %4201  ;;  %v4151_v1 = vadd.f32 %v4135_v12, %v4020_v23  ;;  %v4012_v38 = vadd.f32 %v7619_v62, %v4011_v4  ;;  %v4248_v58 = vadd.f32 %v4232_v41, %v4148_v17  ;;  %v4310_v23 = vpop.permute.xlu0 %4309 }
 0x2c3   : > { %v4235_v60 = vmul.f32 %v7624_v25, %v4202_v36 }
 0x2c4   : > { %v4149_v6 = vadd.f32 %v4133_v14, %v4012_v38  ;;  %v4348_v28 = vadd.f32 %v4332_v48, %v4248_v58  ;;  %v4137_v14 = vmul.f32 %v7621_v0, %v7635_v13  ;;  %v4337_v58 = vmul.f32 %v7638_v20, %v4310_v23 }
 0x2c5   : > { %v4251_v47 = vadd.f32 %v4235_v60, %v4151_v1 }
 0x2c6   : > { %v4249_v30 = vadd.f32 %v4233_v9, %v4149_v6  ;;  %v4364_v54 = vmax.f32 %v4348_v28, 0.0 }
 0x2c7   : > { %v4294_v8 = vpop.permute.xlu1 %4293  ;;  %v4351_v29 = vadd.f32 %v4335_v15, %v4251_v47 }
 0x2c8   : > { %v4333_v42 = vmul.f32 %v7638_v20, %v4294_v8 }
 0x2c9   : > { %v4367_v24 = vmax.f32 %v4351_v29, 0.0 }
 0x2ca   : > { %v4349_v57 = vadd.f32 %v4333_v42, %v4249_v30 }
 0x2cb   : > { %v4298_v18 = vpop.permute.xlu1 %4297 }
 0x2cc   : > { %v4334_v39 = vmul.f32 %v7638_v20, %v4298_v18  ;;  %v4365_v32 = vmax.f32 %v4349_v57, 0.0 }
 0x2ce   : > { %v4350_v27 = vadd.f32 %v4334_v39, %v4250_v19  ;;  %v4376_v7 = vpack.c.bf16 %v4365_v32, %v4364_v54  ;;  %v7731_v39 = vld [vmem:[%s7920_s8] ss:$0 sm:$0xff] }
 0x2d0   : > { %v4366_v3 = vmax.f32 %v4350_v27, 0.0  ;;  %5361 = vmatprep.mubr.msk.bf16.mxu1 %vm4419_vm14, %v4376_v7  ;;  %v4103_v26 = vpop.permute.xlu1 %4102 }
 0x2d1   : > { %v4136_v10 = vmul.f32 %v7621_v0, %v4103_v26 }
 0x2d2   : > { %v4377_v53 = vpack.c.bf16 %v4367_v24, %v4366_v3 }
 0x2d4   : > { %5362 = vmatmul.mubr.msk.bf16.gmra.mxu1 %vm4419_vm14, %v4377_v53  ;;  %v4113_v11 = vpop.permute.xlu1 %4112 }
 0x2d5   : > { %v4138_v56 = vmul.f32 %v7621_v0, %v4113_v11 }
 0x2d8   : > { %v4118_v22 = vpop.permute.xlu1 %4117 }
 0x2d9   : > { %v4139_v45 = vmul.f32 %v7621_v0, %v4118_v22 }
 0x2dd   : > { %v4210_v52 = vpop.permute.xlu1 %4209 }
 0x2de   : > { %v4237_v9 = vmul.f32 %v7624_v25, %v4210_v52 }
 0x2e1   : > { %v4214_v55 = vpop.permute.xlu1 %4213 }
 0x2e2   : > { %v4238_v4 = vmul.f32 %v7624_v25, %v4214_v55 }
 0x2e6   : > { %v4306_v59 = vpop.permute.xlu1 %4305 }
 0x2e7   : > { %v4336_v6 = vmul.f32 %v7638_v20, %v4306_v59 }
 0x2ea   : > { %v4314_v61 = vpop.permute.xlu1 %4313 }
 0x2eb   : > { %v4338_v16 = vmul.f32 %v7638_v20, %v4314_v61 }
 0x2ee   : > { %v4318_v41 = vpop.permute.xlu1 %4317 }
 0x2ef   : > { %v4339_v0 = vmul.f32 %v7638_v20, %v4318_v41  ;;  %v7725_v20 = vld [vmem:[%s7917_s5] ss:$0 sm:$0xff] }
 0x328   : > { %v5343_v40 = vpop.f32.mrf.mxu1 }
 0x329   : > { %v4033_v49 = vadd.f32 %v5343_v40, %v7619_v62 }
 0x32a   : > { %v4024_v2 = vpop.f32.mrf.mxu1 }
 0x32b   : > { %v4025_v35 = vadd.f32 %v7619_v62, %v4024_v2  ;;  %v4154_v51 = vadd.f32 %v4138_v56, %v4033_v49 }
 0x32c   : > { %v5344_v5 = vpop.f32.mrf.mxu1 }
 0x32d   : > { %v4152_v12 = vadd.f32 %v4136_v10, %v4025_v35  ;;  %v4036_v17 = vadd.f32 %v5344_v5, %v7619_v62  ;;  %v4254_v60 = vadd.f32 %v4238_v4, %v4154_v51 }
 0x32e   : > { %v4027_v36 = vpop.f32.mrf.mxu1 }
 0x32f   : > { %v4252_v63 = vadd.f32 %v4236_v34, %v4152_v12  ;;  %v4155_v1 = vadd.f32 %v4139_v45, %v4036_v17  ;;  %v4028_v38 = vadd.f32 %v7619_v62, %v4027_v36  ;;  %v4354_v8 = vadd.f32 %v4338_v16, %v4254_v60 }
 0x331   : > { %v4255_v13 = vadd.f32 %v4239_v44, %v4155_v1  ;;  %v4153_v48 = vadd.f32 %v4137_v14, %v4028_v38  ;;  %v4352_v46 = vadd.f32 %v4336_v6, %v4252_v63  ;;  %v4370_v25 = vmax.f32 %v4354_v8, 0.0 }
 0x333   : > { %v4355_v47 = vadd.f32 %v4339_v0, %v4255_v13  ;;  %v4253_v30 = vadd.f32 %v4237_v9, %v4153_v48  ;;  %v4368_v62 = vmax.f32 %v4352_v46, 0.0 }
 0x335   : > { %v4353_v15 = vadd.f32 %v4337_v58, %v4253_v30  ;;  %v4371_v37 = vmax.f32 %v4355_v47, 0.0 }
 0x337   : > { %v4369_v42 = vmax.f32 %v4353_v15, 0.0  ;;  %v4379_v19 = vpack.c.bf16 %v4371_v37, %v4370_v25 }
 0x339   : > { %v4378_v28 = vpack.c.bf16 %v4369_v42, %v4368_v62 }
 0x33b   : > { %5365 = vmatprep.mubr.msk.bf16.mxu1 %vm4419_vm14, %v4378_v28 }
 0x33c   : > { %5366 = vmatmul.mubr.msk.bf16.gmra.mxu1 %vm4419_vm14, %v4379_v19 }
 0x369   : > { %v5355_v29 = vpop.f32.mrf.mxu1 }
 0x36a   : > { %v4487_v57 = vadd.f32 %v5355_v29, %v7725_v20 }
 0x36b   : > { %v4478_v18 = vpop.f32.mrf.mxu1 }
 0x36c   : > { %v4543_v54 = vmax.f32 %v4487_v57, 0.0  ;;  %v4479_v32 = vadd.f32 %v7725_v20, %v4478_v18 }
 0x36d   : > { %v5356_v27 = vpop.f32.mrf.mxu1 }
 0x36e   : > { %v4541_v24 = vmax.f32 %v4479_v32, 0.0  ;;  %v4490_v7 = vadd.f32 %v5356_v27, %v7725_v20  ;;  %v4814_v3 = vmul.f32 %v7731_v39, %v4543_v54  ;;  %v7774_v32 = vld [vmem:[#allocation2] ss:$0 sm:$0xff] }
 0x36f   : > { %v4481_v53 = vpop.f32.mrf.mxu1 }
 0x370   : > { %v4544_v31 = vmax.f32 %v4490_v7, 0.0  ;;  %v4482_v33 = vadd.f32 %v7725_v20, %v4481_v53  ;;  %v4834_v43 = vsel %vm4419_vm14, %v4814_v3, 0.0  ;;  %v4812_v26 = vmul.f32 %v7731_v39, %v4541_v24 }
 0x371   : > { %4835 = vadd.xlane.f32.xlu0 %v4834_v43 }
 0x372   : > { %v4542_v11 = vmax.f32 %v4482_v33, 0.0  ;;  %v4828_v52 = vsel %vm4419_vm14, %v4812_v26, 0.0  ;;  %v4815_v59 = vmul.f32 %v7731_v39, %v4544_v31  ;;  %v4558_v21 = vpack.c.bf16 %v4544_v31, %v4543_v54 }
 0x374   : > { %v4557_v22 = vpack.c.bf16 %v4542_v11, %v4541_v24  ;;  %v4813_v55 = vmul.f32 %v7731_v39, %v4542_v11  ;;  %v4837_v10 = vsel %vm4419_vm14, %v4815_v59, 0.0 }
 0x375   : > { %v5359_v61 = vpop.f32.mrf.mxu1  ;;  %4829 = vadd.xlane.f32.xlu0 %v4828_v52 }
 0x376   : > { %v4503_v40 = vadd.f32 %v5359_v61, %v7725_v20  ;;  %5377 = vmatprep.mubr.msk.bf16.mxu0 %vm4419_vm14, %v4557_v22  ;;  %v4831_v50 = vsel %vm4419_vm14, %v4813_v55, 0.0 }
 0x377   : > { %v4494_v49 = vpop.f32.mrf.mxu1  ;;  %4832 = vadd.xlane.f32.xlu1 %v4831_v50  ;;  %5378 = vmatmul.mubr.msk.bf16.vlgmr.msra.gmra.mxu0 %vm4419_vm14, %v4558_v21 }
 0x378   : > { %v4547_v56 = vmax.f32 %v4503_v40, 0.0  ;;  %v4495_v2 = vadd.f32 %v7725_v20, %v4494_v49 }
 0x379   : > { %v5360_v35 = vpop.f32.mrf.mxu1  ;;  %4838 = vadd.xlane.f32.xlu0 %v4837_v10 }
 0x37a   : > { %v4545_v51 = vmax.f32 %v4495_v2, 0.0  ;;  %v4506_v5 = vadd.f32 %v5360_v35, %v7725_v20  ;;  %v4818_v34 = vmul.f32 %v7731_v39, %v4547_v56 }
 0x37b   : > { %v4497_v45 = vpop.f32.mrf.mxu1 }
 0x37c   : > { %v4548_v12 = vmax.f32 %v4506_v5, 0.0  ;;  %v4498_v17 = vadd.f32 %v7725_v20, %v4497_v45  ;;  %v4846_v23 = vsel %vm4419_vm14, %v4818_v34, 0.0  ;;  %v4816_v14 = vmul.f32 %v7731_v39, %v4545_v51 }
 0x37d   : > { %4847 = vadd.xlane.f32.xlu1 %v4846_v23 }
 0x37e   : > { %v4546_v4 = vmax.f32 %v4498_v17, 0.0  ;;  %v4819_v41 = vmul.f32 %v7731_v39, %v4548_v12  ;;  %v4840_v63 = vsel %vm4419_vm14, %v4816_v14, 0.0  ;;  %v4560_v38 = vpack.c.bf16 %v4548_v12, %v4547_v56 }
 0x380   : > { %v4559_v36 = vpack.c.bf16 %v4546_v4, %v4545_v51  ;;  %v4849_v44 = vsel %vm4419_vm14, %v4819_v41, 0.0  ;;  %v4817_v1 = vmul.f32 %v7731_v39, %v4546_v4 }
 0x381   : > { %4850 = vadd.xlane.f32.xlu0 %v4849_v44  ;;  %4841 = vadd.xlane.f32.xlu1 %v4840_v63 }
 0x382   : > { %5381 = vmatprep.mubr.msk.bf16.mxu0 %vm4419_vm14, %v4559_v36  ;;  %v4843_v9 = vsel %vm4419_vm14, %v4817_v1, 0.0 }
 0x383   : > { %5382 = vmatmul.mubr.msk.bf16.gmra.mxu0 %vm4419_vm14, %v4560_v38 }
 0x385   : > { %4844 = vadd.xlane.f32.xlu0 %v4843_v9 }
 0x394   : > { %v5363_v16 = vpop.f32.mrf.mxu1 }
 0x395   : > { %v4519_v60 = vadd.f32 %v5363_v16, %v7725_v20 }
 0x396   : > { %v4510_v58 = vpop.f32.mrf.mxu1 }
 0x397   : > { %v4551_v6 = vmax.f32 %v4519_v60, 0.0  ;;  %v4511_v0 = vadd.f32 %v7725_v20, %v4510_v58 }
 0x398   : > { %v5364_v13 = vpop.f32.mrf.mxu1 }
 0x399   : > { %v4549_v48 = vmax.f32 %v4511_v0, 0.0  ;;  %v4522_v46 = vadd.f32 %v5364_v13, %v7725_v20  ;;  %v4822_v47 = vmul.f32 %v7731_v39, %v4551_v6 }
 0x39a   : > { %v4513_v30 = vpop.f32.mrf.mxu1 }
 0x39b   : > { %v4552_v8 = vmax.f32 %v4522_v46, 0.0  ;;  %v4514_v15 = vadd.f32 %v7725_v20, %v4513_v30  ;;  %v4858_v37 = vsel %vm4419_vm14, %v4822_v47, 0.0  ;;  %v4820_v62 = vmul.f32 %v7731_v39, %v4549_v48 }
 0x39c   : > { %4859 = vadd.xlane.f32.xlu1 %v4858_v37 }
 0x39d   : > { %v4550_v42 = vmax.f32 %v4514_v15, 0.0  ;;  %v4823_v25 = vmul.f32 %v7731_v39, %v4552_v8  ;;  %v4852_v29 = vsel %vm4419_vm14, %v4820_v62, 0.0  ;;  %v4562_v18 = vpack.c.bf16 %v4552_v8, %v4551_v6 }
 0x39f   : > { %v4561_v28 = vpack.c.bf16 %v4550_v42, %v4549_v48  ;;  %v4861_v19 = vsel %vm4419_vm14, %v4823_v25, 0.0  ;;  %v4821_v57 = vmul.f32 %v7731_v39, %v4550_v42  ;;  %v5188_v48 = vld [vmem:[%s7919_s7] ss:$0 sm:$0xff] }
 0x3a0   : > { %4862 = vadd.xlane.f32.xlu0 %v4861_v19  ;;  %4853 = vadd.xlane.f32.xlu1 %v4852_v29 }
 0x3a1   : > { %5385 = vmatprep.mubr.msk.bf16.mxu0 %vm4419_vm14, %v4561_v28  ;;  %v4855_v54 = vsel %vm4419_vm14, %v4821_v57, 0.0 }
 0x3a2   : > { %5386 = vmatmul.mubr.msk.bf16.gmra.mxu0 %vm4419_vm14, %v4562_v18 }
 0x3a4   : > { %4856 = vadd.xlane.f32.xlu0 %v4855_v54 }
 0x3fa   : > { %v4836_v27 = vpop.xlane.xlu0 %4835 }
 0x3fb   : > { %v4885_v24 = vadd.f32 %v7774_v32, %v4836_v27 }
 0x3fc   : > { %v5367_v7 = vpop.f32.mrf.mxu1 }
 0x3fd   : > { %v4535_v3 = vadd.f32 %v5367_v7, %v7725_v20  ;;  %4902 = vst.msk [vmem:[%s7781_s14 + $0x10] sm:$0xff] %vm4899_vm13, %v4885_v24 }
 0x3fe   : > { %v4526_v53 = vpop.f32.mrf.mxu1  ;;  %v4830_v31 = vpop.xlane.xlu0 %4829 }
 0x3ff   : > { %v4527_v33 = vadd.f32 %v7725_v20, %v4526_v53  ;;  %v4883_v43 = vadd.f32 %v7774_v32, %v4830_v31  ;;  %v4555_v22 = vmax.f32 %v4535_v3, 0.0 }
 0x400   : > { %v5368_v26 = vpop.f32.mrf.mxu1  ;;  %v4833_v11 = vpop.xlane.xlu1 %4832 }
 0x401   : > { %v4553_v52 = vmax.f32 %v4527_v33, 0.0  ;;  %v4538_v55 = vadd.f32 %v5368_v26, %v7725_v20  ;;  %4900 = vst.msk [vmem:[%s7781_s14] sm:$0xff] %vm4899_vm13, %v4883_v43  ;;  %v4884_v59 = vadd.f32 %v7774_v32, %v4833_v11  ;;  %v4826_v35 = vmul.f32 %v7731_v39, %v4555_v22 }
 0x402   : > { %v4529_v21 = vpop.f32.mrf.mxu1  ;;  %v4839_v61 = vpop.xlane.xlu0 %4838 }
 0x403   : > { %v4530_v40 = vadd.f32 %v7725_v20, %v4529_v21  ;;  %v4824_v50 = vmul.f32 %v7731_v39, %v4553_v52  ;;  %4901 = vst.msk [vmem:[%s7781_s14 + $0x8] sm:$0xff] %vm4899_vm13, %v4884_v59  ;;  %v4886_v49 = vadd.f32 %v7774_v32, %v4839_v61  ;;  %v4556_v56 = vmax.f32 %v4538_v55, 0.0 }
 0x404   : > { %v4870_v12 = vsel %vm4419_vm14, %v4826_v35, 0.0 }
 0x405   : > { %v4554_v2 = vmax.f32 %v4530_v40, 0.0  ;;  %v4864_v10 = vsel %vm4419_vm14, %v4824_v50, 0.0  ;;  %4903 = vst.msk [vmem:[%s7781_s14 + $0x18] sm:$0xff] %vm4899_vm13, %v4886_v49  ;;  %v4564_v45 = vpack.c.bf16 %v4556_v56, %v4555_v22  ;;  %v4827_v23 = vmul.f32 %v7731_v39, %v4556_v56 }
 0x406   : > { %4865 = vadd.xlane.f32.xlu1 %v4864_v10  ;;  %v4848_v51 = vpop.xlane.xlu1 %4847 }
 0x407   : > { %v4563_v5 = vpack.c.bf16 %v4554_v2, %v4553_v52  ;;  %v4825_v20 = vmul.f32 %v7731_v39, %v4554_v2  ;;  %v4889_v34 = vadd.f32 %v7774_v32, %v4848_v51  ;;  %v4873_v44 = vsel %vm4419_vm14, %v4827_v23, 0.0 }
 0x409   : > { %5389 = vmatprep.mubr.msk.bf16.mxu0 %vm4419_vm14, %v4563_v5  ;;  %v4867_v17 = vsel %vm4419_vm14, %v4825_v20, 0.0  ;;  %4906 = vst.msk [vmem:[%s7781_s14 + $0x30] sm:$0xff] %vm4899_vm13, %v4889_v34 }
 0x40a   : > { %4871 = vadd.xlane.f32.xlu1 %v4870_v12  ;;  %4868 = vadd.xlane.f32.xlu0 %v4867_v17  ;;  %v4851_v14 = vpop.xlane.xlu0 %4850  ;;  %v4842_v4 = vpop.xlane.xlu1 %4841 }
 0x40b   : > { %5390 = vmatmul.mubr.msk.bf16.gmra.mxu0 %vm4419_vm14, %v4564_v45  ;;  %v4890_v41 = vadd.f32 %v7774_v32, %v4851_v14  ;;  %v4887_v36 = vadd.f32 %v7774_v32, %v4842_v4 }
 0x40d   : > { %4907 = vst.msk [vmem:[%s7781_s14 + $0x38] sm:$0xff] %vm4899_vm13, %v4890_v41  ;;  %4904 = vst.msk [vmem:[%s7781_s14 + $0x20] sm:$0xff] %vm4899_vm13, %v4887_v36 }
 0x40e   : > { %4874 = vadd.xlane.f32.xlu0 %v4873_v44  ;;  %v4845_v39 = vpop.xlane.xlu0 %4844 }
 0x40f   : > { %v4888_v63 = vadd.f32 %v7774_v32, %v4845_v39 }
 0x411   : > { %4905 = vst.msk [vmem:[%s7781_s14 + $0x28] sm:$0xff] %vm4899_vm13, %v4888_v63 }
 0x425   : > { %v4860_v1 = vpop.xlane.xlu1 %4859 }
 0x426   : > { %v4893_v38 = vadd.f32 %v7774_v32, %v4860_v1 }
 0x428   : > { %4910 = vst.msk [vmem:[%s7781_s14 + $0x50] sm:$0xff] %vm4899_vm13, %v4893_v38 }
 0x429   : > { %v4863_v9 = vpop.xlane.xlu0 %4862  ;;  %v4854_v16 = vpop.xlane.xlu1 %4853 }
 0x42a   : > { %v4894_v60 = vadd.f32 %v7774_v32, %v4863_v9  ;;  %v4891_v58 = vadd.f32 %v7774_v32, %v4854_v16 }
 0x42c   : > { %4911 = vst.msk [vmem:[%s7781_s14 + $0x58] sm:$0xff] %vm4899_vm13, %v4894_v60  ;;  %4908 = vst.msk [vmem:[%s7781_s14 + $0x40] sm:$0xff] %vm4899_vm13, %v4891_v58 }
 0x42d   : > { %v4857_v6 = vpop.xlane.xlu0 %4856 }
 0x42e   : > { %v4892_v0 = vadd.f32 %v7774_v32, %v4857_v6 }
 0x430   : > { %4909 = vst.msk [vmem:[%s7781_s14 + $0x48] sm:$0xff] %vm4899_vm13, %v4892_v0 }
 0x437   : > { %v5379_v13 = vpop.f32.mrf.mxu0 }
 0x438   : > { %v4671_v30 = vadd.f32 %v5379_v13, %v5188_v48 }
 0x439   : > { %v4662_v46 = vpop.f32.mrf.mxu0 }
 0x43a   : > { %v4663_v37 = vadd.f32 %v5188_v48, %v4662_v46 }
 0x43b   : > { %v5380_v47 = vpop.f32.mrf.mxu0 }
 0x43c   : > { %v4674_v8 = vadd.f32 %v5380_v47, %v5188_v48 }
 0x43d   : > { %v4665_v15 = vpop.f32.mrf.mxu0 }
 0x43e   : > { %v5249_v62 = vpack.c.bf16 %v4674_v8, %v4671_v30  ;;  %v4666_v42 = vadd.f32 %v5188_v48, %v4665_v15 }
 0x440   : > { %5281 = vst [vmem:[%s7839_s18 + $0x8] sm:$0xff] %v5249_v62   ;;  %v5244_v25 = vpack.c.bf16 %v4666_v42, %v4663_v37 }
 0x442   : > { %5245 = vst [vmem:[%s7839_s18] sm:$0xff] %v5244_v25  }
 0x443   : > { %v5383_v28 = vpop.f32.mrf.mxu0 }
 0x444   : > { %v4687_v57 = vadd.f32 %v5383_v28, %v5188_v48 }
 0x445   : > { %v4678_v19 = vpop.f32.mrf.mxu0 }
 0x446   : > { %v4679_v27 = vadd.f32 %v5188_v48, %v4678_v19 }
 0x447   : > { %v5384_v29 = vpop.f32.mrf.mxu0 }
 0x448   : > { %v4690_v18 = vadd.f32 %v5384_v29, %v5188_v48 }
 0x449   : > { %v4681_v54 = vpop.f32.mrf.mxu0 }
 0x44a   : > { %v5259_v24 = vpack.c.bf16 %v4690_v18, %v4687_v57  ;;  %v4682_v7 = vadd.f32 %v5188_v48, %v4681_v54 }
 0x44c   : > { %5283 = vst [vmem:[%s7839_s18 + $0x18] sm:$0xff] %v5259_v24   ;;  %v5254_v3 = vpack.c.bf16 %v4682_v7, %v4679_v27 }
 0x44e   : > { %5282 = vst [vmem:[%s7839_s18 + $0x10] sm:$0xff] %v5254_v3  }
 0x462   : > { %v5387_v53 = vpop.f32.mrf.mxu0 }
 0x463   : > { %v4703_v43 = vadd.f32 %v5387_v53, %v5188_v48 }
 0x464   : > { %v4694_v31 = vpop.f32.mrf.mxu0 }
 0x465   : > { %v4695_v22 = vadd.f32 %v5188_v48, %v4694_v31 }
 0x466   : > { %v5388_v33 = vpop.f32.mrf.mxu0 }
 0x467   : > { %v4706_v26 = vadd.f32 %v5388_v33, %v5188_v48 }
 0x468   : > { %v4697_v11 = vpop.f32.mrf.mxu0 }
 0x469   : > { %v5269_v52 = vpack.c.bf16 %v4706_v26, %v4703_v43  ;;  %v4698_v55 = vadd.f32 %v5188_v48, %v4697_v11 }
 0x46b   : > { %5285 = vst [vmem:[%s7839_s18 + $0x28] sm:$0xff] %v5269_v52   ;;  %v5264_v59 = vpack.c.bf16 %v4698_v55, %v4695_v22 }
 0x46d   : > { %5284 = vst [vmem:[%s7839_s18 + $0x20] sm:$0xff] %v5264_v59  }
 0x48f   : > { %v4866_v21 = vpop.xlane.xlu1 %4865 }
 0x490   : > { %v4895_v61 = vadd.f32 %v7774_v32, %v4866_v21 }
 0x492   : > { %4912 = vst.msk [vmem:[%s7781_s14 + $0x60] sm:$0xff] %vm4899_vm13, %v4895_v61 }
 0x493   : > { %v4872_v40 = vpop.xlane.xlu1 %4871  ;;  %v4869_v50 = vpop.xlane.xlu0 %4868 }
 0x494   : > { %v4897_v49 = vadd.f32 %v7774_v32, %v4872_v40  ;;  %v4896_v56 = vadd.f32 %v7774_v32, %v4869_v50 }
 0x496   : > { %4914 = vst.msk [vmem:[%s7781_s14 + $0x70] sm:$0xff] %vm4899_vm13, %v4897_v49  ;;  %4913 = vst.msk [vmem:[%s7781_s14 + $0x68] sm:$0xff] %vm4899_vm13, %v4896_v56 }
 0x497   : > { %v4875_v2 = vpop.xlane.xlu0 %4874 }
 0x498   : > { %v4898_v10 = vadd.f32 %v7774_v32, %v4875_v2 }
 0x49a   : > { %4915 = vst.msk [vmem:[%s7781_s14 + $0x78] sm:$0xff] %vm4899_vm13, %v4898_v10  ;;  %s5703_s14 = scalar_lea.vmem %s7866_s25, 1024 }
 0x49b   : > { %p5704_p11 = scmp.ne.s32.totalorder %s7866_s25, %s5703_s14  ;;  %p5711_p1 = scmp.lt.s32.totalorder %s5709_s17, %s5703_s14 }
 0x49d   : > { %p5705_p12 = pnand %p5704_p11, %p5880_p5  ;;  %p5712_p2 = por %p5711_p1, %p5710_p0 }
 0x49f   : > { %p5706_p13 = pneg %p5705_p12 }
 0x4a1   : > { %p5713_p3 = pnand %p5712_p2, %p5706_p13 }
 0x4cb   : > { %v5391_v35 = vpop.f32.mrf.mxu0 }
 0x4cc   : > { %v4719_v20 = vadd.f32 %v5391_v35, %v5188_v48 }
 0x4cd   : > { %v4710_v51 = vpop.f32.mrf.mxu0 }
 0x4ce   : > { %v4711_v12 = vadd.f32 %v5188_v48, %v4710_v51 }
 0x4cf   : > { %v5392_v5 = vpop.f32.mrf.mxu0 }
 0x4d0   : > { %v4722_v34 = vadd.f32 %v5392_v5, %v5188_v48 }
 0x4d1   : > { %v4713_v45 = vpop.f32.mrf.mxu0 }
 0x4d2   : > { %v5279_v17 = vpack.c.bf16 %v4722_v34, %v4719_v20  ;;  %v4714_v23 = vadd.f32 %v5188_v48, %v4713_v45 }
 0x4d4   : > { %5287 = vst [vmem:[%s7839_s18 + $0x38] sm:$0xff] %v5279_v17   ;;  %v5274_v32 = vpack.c.bf16 %v4714_v23, %v4711_v12 }
 0x4d6   : > { %5286 = vst [vmem:[%s7839_s18 + $0x30] sm:$0xff] %v5274_v32  }
 0x4d7   : > { %5716 = shalt.err (!%p5713_p3)
}
 0x4d8   : > { %s5717_s30 = scalar_lea.hbm %s7864_s13, 1024  ;;  %s5721_s26 = scalar_lea.hbm %s7923_s11, 2048 }
 0x4d9   : > { %p5718_p4 = scmp.ne.s32.totalorder %s7864_s13, %s5717_s30  ;;  %p5722_p9 = scmp.lt.s32.totalorder %s7864_s13, %s7923_s11 }
 0x4da   : > { %p5723_p10 = scmp.lt.s32.totalorder %s5721_s26, %s5717_s30 }
 0x4db   : > { %p5719_p7 = pnand %p5718_p4, %p5880_p5 }
 0x4dc   : > { %p5724_p11 = por %p5723_p10, %p5722_p9 }
 0x4dd   : > { %p5720_p8 = pneg %p5719_p7 }
 0x4df   : > { %p5725_p12 = pnand %p5724_p11, %p5720_p8 }
 0x4e1   : > { %5728 = shalt.err (!%p5725_p12)
}
 0x4e2   : > { %s5777_s14 = smov 64   ;;  %s5778_s16 = smov 4  }
 0x4e3   : > { %5465 = dma.vmem_to_hbm [thread:$0]  (%p5880_p5), %s7866_s25, 1024, %s7864_s13, %s7872_s9, %s5777_s14, %s5777_s14, %s5778_s16  }
 0x4e4 PF: > { %p5471_p13 = scmp.ge.s32.totalorder %s5763_s22, 2  ;;  %s4962_s17 = sand.u32 1, %s5751_s19  }
 0x4e5   : > { %s4963_s30 = scalar_lea.sflag [#allocation4], %s4962_s17 }
 0x4e6   : > { %p5468_p0 = pnand %p5471_p13, %p5884_p6 }
 0x4e8   : > { %p5469_p1 = pneg %p5468_p0 }
 0x4ea   : > { %5746 = dma.done.wait (%p5469_p1), %s4963_s30, 1024  }
 0x4eb   : > { %5748 = vsyncadd (%p5469_p1), %s4963_s30, 4294966272  ;;  %p24_p2 = scmp.ge.s32.totalorder %s5867_s24, 4   ;;  %s7954_s19 = smov %s5755_s20 }
 0x4ec   : > { %s7955_s20 = smov %s5759_s21  ;;  %s7956_s21 = smov %s5878_s27 }
 0x4ed   : > { %s7957_s22 = smov %s5867_s24  ;;  %26 = sbr.rel (!%p24_p2) target bundleno = 6 (0x6), region = 107 }
 0x4f2   :  { %4968 = vsyncpa [#allocation4], 1 }
 0x4f3   :  { %4970 = vsyncpa [#allocation4 + $0x1], 1 }

</bundles_post_ra>
